<compile_context>
chip_gen: v7x
topology: tpu7x:2x2x1
jax: 0.10.0
libtpu: 0.0.40
codegen_flags: <defaults>
</compile_context>

<pallas_src>
import jax
import jax.numpy as jnp
from jax.experimental import pallas as pl
from jax.experimental.pallas import tpu as pltpu


# -----------------------------------------------------------------------------
# Fused kernel:  out = res_block_{L-1}( ... res_block_0( relu(x @ W_fc1) ) ... )
# where res_block(x) = relu( relu(x @ W1) @ W2 + x )
# Grid tiles rows only; all weights are fully resident in VMEM.
# -----------------------------------------------------------------------------
def _make_fused_kernel(num_res):
    def kernel(x_ref, fc1_ref, *rest):
        o_ref = rest[-1]
        w_refs = rest[:-1]          # (w1_0, w2_0, w1_1, w2_1, ...)

        x = x_ref[...]
        # fc1 + relu1  (f32 accumulation on the MXU)
        out = jnp.maximum(
            jnp.dot(x, fc1_ref[...], preferred_element_type=jnp.float32), 0.0
        )

        # Residual blocks, statically unrolled (num_res is a Python int).
        # The relu/add epilogues stay on the f32 accumulator in vregs; the
        # intermediate h never round-trips HBM.
        for b in range(num_res):
            w1 = w_refs[2 * b][...]
            w2 = w_refs[2 * b + 1][...]
            h = jnp.maximum(
                jnp.dot(out.astype(w1.dtype), w1,
                        preferred_element_type=jnp.float32), 0.0
            )
            out = jnp.maximum(
                jnp.dot(h.astype(w2.dtype), w2,
                        preferred_element_type=jnp.float32) + out, 0.0
            )

        o_ref[...] = out.astype(o_ref.dtype)

    return kernel


# -----------------------------------------------------------------------------
# Tiling / budget helpers
# -----------------------------------------------------------------------------
def _tensorcores_per_chip():
    """Best-effort detection of v7x-class (2 TensorCores per chip)."""
    try:
        kind = jax.devices()[0].device_kind.lower()
        if "v7" in kind:
            return 2
    except Exception:
        pass
    return 1


def _pick_tm(M, requested, n_cores):
    """Row-tile size: big tiles, 8-aligned, >= n_cores grid steps on 2-TC chips."""
    tm = min(requested, M)
    if n_cores > 1:
        per_core = -(-M // n_cores)            # ceil(M / n_cores)
        per_core = -(-per_core // 8) * 8       # round up to sublane multiple
        tm = min(tm, max(per_core, 8))
    if tm < M:
        tm = max(8, (tm // 8) * 8)             # partial tiles must be 8-aligned
    return max(tm, 1)


def _vmem_limit_bytes(tm, C, D, num_res, elt, single_buffer_weights, n_cores):
    act = 2 * (tm * C + tm * D) * elt                      # double-buffered x/out tiles
    wbuf = 1 if single_buffer_weights else 2
    wts = wbuf * (C * D + 2 * num_res * D * D) * elt       # resident weights
    need = int(1.5 * (act + wts)) + (4 << 20)              # headroom (sems, internal scratch)
    cap = (56 << 20) if n_cores > 1 else (100 << 20)       # v7x: 64 MiB/TC physical
    return min(max(need, 32 << 20), cap)


# -----------------------------------------------------------------------------
# Wrapper
# -----------------------------------------------------------------------------
def dim_reduction_forward(x, params, *, tm=512, compute_dtype=None,
                          single_buffer_weights=True):
    """Fused DimReduction forward.

    x:        [M, C] activations
    params:   {"fc1": [C, D], "res_blocks": [(w1 [D,D], w2 [D,D]), ...]}
    tm:       requested row-tile size (clamped / aligned internally)
    compute_dtype: e.g. jnp.bfloat16 for full MXU rate; accumulation stays f32.
                   Default None == f32 exactly (matches PyTorch).
    """
    fc1 = params["fc1"]
    res_blocks = list(params["res_blocks"])
    num_res = len(res_blocks)

    M, C = x.shape
    C2, D = fc1.shape
    assert C == C2
    for w1, w2 in res_blocks:
        assert w1.shape == (D, D) and w2.shape == (D, D)

    out_dtype = x.dtype
    if compute_dtype is not None:
        x = x.astype(compute_dtype)
        fc1 = fc1.astype(compute_dtype)
        res_blocks = [(w1.astype(compute_dtype), w2.astype(compute_dtype))
                      for (w1, w2) in res_blocks]
    elt = jnp.dtype(x.dtype).itemsize

    n_cores = _tensorcores_per_chip()
    tm = _pick_tm(M, tm, n_cores)
    grid = (pl.cdiv(M, tm),)                   # partial last tile is masked by Pallas

    flat_weights = []
    for (w1, w2) in res_blocks:
        flat_weights += [w1, w2]

    # Advisory cost for XLA's scheduler around the custom call.
    flops = 2 * M * (C * D + 2 * num_res * D * D)
    bytes_accessed = (M * C + M * D + C * D + 2 * num_res * D * D) * elt
    cost = pl.CostEstimate(flops=flops, transcendentals=0,
                           bytes_accessed=bytes_accessed)

    # TODO(synk): for weight sets exceeding ~50 MiB (v7x per-TC VMEM), add a
    # streaming path (pltpu.emit_pipeline over residual blocks / K with an f32
    # accumulator) instead of holding every weight resident.

    def _weight_spec(shape, single_buffer):
        if single_buffer:
            # Constant index_map -> block never changes; one buffer is enough.
            return pl.BlockSpec(shape, lambda i: (0, 0),
                                pipeline_mode=pl.Buffered(1))
        return pl.BlockSpec(shape, lambda i: (0, 0))

    def _call(single_buffer):
        in_specs = [pl.BlockSpec((tm, C), lambda i: (i, 0)),        # row tile of x
                    _weight_spec((C, D), single_buffer)]            # fc1, resident
        in_specs += [_weight_spec((D, D), single_buffer)            # res weights, resident
                     for _ in flat_weights]
        return pl.pallas_call(
            _make_fused_kernel(num_res),
            out_shape=jax.ShapeDtypeStruct((M, D), out_dtype),
            grid_spec=pltpu.PrefetchScalarGridSpec(
                num_scalar_prefetch=0,
                grid=grid,
                in_specs=in_specs,
                out_specs=pl.BlockSpec((tm, D), lambda i: (i, 0)),
            ),
            compiler_params=pltpu.CompilerParams(
                dimension_semantics=("parallel",),
                vmem_limit_bytes=_vmem_limit_bytes(
                    tm, C, D, num_res, elt, single_buffer, n_cores),
            ),
            cost_estimate=cost,
        )(x, fc1, *flat_weights)

    if single_buffer_weights:
        try:
            return _call(True)
        except Exception:
            # Older jax without BlockSpec pipeline_mode support: fall back to
            # the (previously verified) default double-buffered weight path.
            pass
    return _call(False)


# -----------------------------------------------------------------------------
# Params + pure-JAX reference
# -----------------------------------------------------------------------------
def init_params(key, n_channels, m_dim, num_layer_res, dtype=jnp.float32):
    keys = jax.random.split(key, max(1 + 2 * num_layer_res, 2))
    fc1 = (jax.random.normal(keys[0], (n_channels, m_dim), jnp.float32)
           * (1.0 / jnp.sqrt(n_channels))).astype(dtype)
    res_blocks = []
    for ii in range(num_layer_res):
        w1 = (jax.random.normal(keys[1 + 2 * ii], (m_dim, m_dim), jnp.float32)
              * (1.0 / jnp.sqrt(m_dim))).astype(dtype)
        w2 = (jax.random.normal(keys[2 + 2 * ii], (m_dim, m_dim), jnp.float32)
              * (1.0 / jnp.sqrt(m_dim))).astype(dtype)
        res_blocks.append((w1, w2))
    return {"fc1": fc1, "res_blocks": res_blocks}


def reference_forward(x, params):
    out = jnp.maximum(x @ params["fc1"], 0.0)
    for (w1, w2) in params["res_blocks"]:
        h = jnp.maximum(out @ w1, 0.0)
        out = jnp.maximum(h @ w2 + out, 0.0)
    return out


if __name__ == "__main__":
    # Small shapes: 256 instances, n_channels=256, m_dim=128, 2 residual layers.
    N_TOKENS, N_CHANNELS, M_DIM, NUM_RES = 256, 256, 128, 2

    key = jax.random.PRNGKey(0)
    kx, kp = jax.random.split(key)
    x = jax.random.normal(kx, (N_TOKENS, N_CHANNELS), jnp.float32)

    # --- f32 path: matches PyTorch nn.Linear(bias=False) semantics ---
    params = init_params(kp, N_CHANNELS, M_DIM, NUM_RES)
    out = jax.block_until_ready(dim_reduction_forward(x, params))
    ref = reference_forward(x, params)
    assert out.shape == (N_TOKENS, M_DIM)
    assert jnp.allclose(out, ref, atol=1e-4, rtol=1e-4), "mismatch vs reference"

    # --- zero-residual-block path (DimReduction default numLayer_Res=0) ---
    params0 = init_params(kp, N_CHANNELS, M_DIM, 0)
    out0 = jax.block_until_ready(dim_reduction_forward(x, params0))
    assert jnp.allclose(out0, reference_forward(x, params0),
                        atol=1e-4, rtol=1e-4), "mismatch (numRes=0)"

    # --- production path: weights stored bf16 once, bf16 MXU, f32 accumulation ---
    params_bf16 = jax.tree_util.tree_map(lambda w: w.astype(jnp.bfloat16), params)
    out_bf = jax.block_until_ready(
        dim_reduction_forward(x, params_bf16, compute_dtype=jnp.bfloat16))
    assert jnp.allclose(out_bf.astype(jnp.float32), ref,
                        atol=5e-2, rtol=5e-2), "mismatch (bf16 path)"

    print("KERNEL_OK")
</pallas_src>

<mosaic_0001>
module attributes {stable_mosaic.version = 11 : i64} {
  func.func @kernel(%arg0: i32, %arg1: memref<256x256xf32, #tpu.memory_space<vmem>>, %arg2: memref<256x128xf32, #tpu.memory_space<vmem>>, %arg3: memref<128x128xf32, #tpu.memory_space<vmem>>, %arg4: memref<128x128xf32, #tpu.memory_space<vmem>>, %arg5: memref<128x128xf32, #tpu.memory_space<vmem>>, %arg6: memref<128x128xf32, #tpu.memory_space<vmem>>, %arg7: memref<256x128xf32, #tpu.memory_space<vmem>>) attributes {dimension_semantics = [#tpu.dimension_semantics<parallel>], iteration_bounds = array<i64: 1>, scalar_prefetch = 0 : i64, scratch_operands = 0 : i64, tpu.core_type = #tpu.core_type<tc>, window_params = [{transform_indices = @transform_0, window_bounds = array<i64: 256, 256>}, {pipeline_mode = #tpu.pipeline_mode<synchronous>, transform_indices = @transform_1, window_bounds = array<i64: 256, 128>}, {pipeline_mode = #tpu.pipeline_mode<synchronous>, transform_indices = @transform_2, window_bounds = array<i64: 128, 128>}, {pipeline_mode = #tpu.pipeline_mode<synchronous>, transform_indices = @transform_3, window_bounds = array<i64: 128, 128>}, {pipeline_mode = #tpu.pipeline_mode<synchronous>, transform_indices = @transform_4, window_bounds = array<i64: 128, 128>}, {pipeline_mode = #tpu.pipeline_mode<synchronous>, transform_indices = @transform_5, window_bounds = array<i64: 128, 128>}, {transform_indices = @transform_6, window_bounds = array<i64: 256, 128>}]} {
    %c0 = arith.constant 0 : index
    %c0_0 = arith.constant 0 : index
    %0 = vector.load %arg1[%c0, %c0_0] : memref<256x256xf32, #tpu.memory_space<vmem>>, vector<256x256xf32>
    %c0_1 = arith.constant 0 : index
    %c0_2 = arith.constant 0 : index
    %1 = vector.load %arg2[%c0_1, %c0_2] : memref<256x128xf32, #tpu.memory_space<vmem>>, vector<256x128xf32>
    %cst = arith.constant dense<0.000000e+00> : vector<256x128xf32>
    %2 = tpu.matmul %0, %1, %cst {dimension_numbers = #tpu.dot_dimension_numbers<[1], [0], [0], [1], [0, 0, 1, 1], [], []>} : vector<256x256xf32>, vector<256x128xf32>, vector<256x128xf32> -> vector<256x128xf32>
    %cst_3 = arith.constant 0.000000e+00 : f32
    %3 = vector.broadcast %cst_3 : f32 to vector<256x128xf32>
    %4 = arith.maximumf %2, %3 : vector<256x128xf32>
    %c0_4 = arith.constant 0 : index
    %c0_5 = arith.constant 0 : index
    %5 = vector.load %arg3[%c0_4, %c0_5] : memref<128x128xf32, #tpu.memory_space<vmem>>, vector<128x128xf32>
    %c0_6 = arith.constant 0 : index
    %c0_7 = arith.constant 0 : index
    %6 = vector.load %arg4[%c0_6, %c0_7] : memref<128x128xf32, #tpu.memory_space<vmem>>, vector<128x128xf32>
    %cst_8 = arith.constant dense<0.000000e+00> : vector<256x128xf32>
    %7 = tpu.matmul %4, %5, %cst_8 {dimension_numbers = #tpu.dot_dimension_numbers<[1], [0], [0], [1], [0, 0, 1, 1], [], []>} : vector<256x128xf32>, vector<128x128xf32>, vector<256x128xf32> -> vector<256x128xf32>
    %cst_9 = arith.constant 0.000000e+00 : f32
    %8 = vector.broadcast %cst_9 : f32 to vector<256x128xf32>
    %9 = arith.maximumf %7, %8 : vector<256x128xf32>
    %cst_10 = arith.constant dense<0.000000e+00> : vector<256x128xf32>
    %10 = tpu.matmul %9, %6, %cst_10 {dimension_numbers = #tpu.dot_dimension_numbers<[1], [0], [0], [1], [0, 0, 1, 1], [], []>} : vector<256x128xf32>, vector<128x128xf32>, vector<256x128xf32> -> vector<256x128xf32>
    %11 = arith.addf %10, %4 : vector<256x128xf32>
    %cst_11 = arith.constant 0.000000e+00 : f32
    %12 = vector.broadcast %cst_11 : f32 to vector<256x128xf32>
    %13 = arith.maximumf %11, %12 : vector<256x128xf32>
    %c0_12 = arith.constant 0 : index
    %c0_13 = arith.constant 0 : index
    %14 = vector.load %arg5[%c0_12, %c0_13] : memref<128x128xf32, #tpu.memory_space<vmem>>, vector<128x128xf32>
    %c0_14 = arith.constant 0 : index
    %c0_15 = arith.constant 0 : index
    %15 = vector.load %arg6[%c0_14, %c0_15] : memref<128x128xf32, #tpu.memory_space<vmem>>, vector<128x128xf32>
    %cst_16 = arith.constant dense<0.000000e+00> : vector<256x128xf32>
    %16 = tpu.matmul %13, %14, %cst_16 {dimension_numbers = #tpu.dot_dimension_numbers<[1], [0], [0], [1], [0, 0, 1, 1], [], []>} : vector<256x128xf32>, vector<128x128xf32>, vector<256x128xf32> -> vector<256x128xf32>
    %cst_17 = arith.constant 0.000000e+00 : f32
    %17 = vector.broadcast %cst_17 : f32 to vector<256x128xf32>
    %18 = arith.maximumf %16, %17 : vector<256x128xf32>
    %cst_18 = arith.constant dense<0.000000e+00> : vector<256x128xf32>
    %19 = tpu.matmul %18, %15, %cst_18 {dimension_numbers = #tpu.dot_dimension_numbers<[1], [0], [0], [1], [0, 0, 1, 1], [], []>} : vector<256x128xf32>, vector<128x128xf32>, vector<256x128xf32> -> vector<256x128xf32>
    %20 = arith.addf %19, %13 : vector<256x128xf32>
    %cst_19 = arith.constant 0.000000e+00 : f32
    %21 = vector.broadcast %cst_19 : f32 to vector<256x128xf32>
    %22 = arith.maximumf %20, %21 : vector<256x128xf32>
    %c0_20 = arith.constant 0 : index
    %c0_21 = arith.constant 0 : index
    %23 = vector.load %arg7[%c0_20, %c0_21] : memref<256x128xf32, #tpu.memory_space<vmem>>, vector<256x128xf32>
    tpu.vector_store %arg7[%c0_20, %c0_21], %22 {strides = array<i32>} : memref<256x128xf32, #tpu.memory_space<vmem>>, vector<256x128xf32>,
    return
  }
  func.func @transform_0(%arg0: i32) -> (i32, i32) {
    %c0_i32 = arith.constant 0 : i32
    %c0_i32_0 = arith.constant 0 : i32
    return %arg0, %c0_i32 : i32, i32
  }
  func.func @transform_1(%arg0: i32) -> (i32, i32) {
    %c0_i32 = arith.constant 0 : i32
    %c0_i32_0 = arith.constant 0 : i32
    %c0_i32_1 = arith.constant 0 : i32
    return %c0_i32, %c0_i32_0 : i32, i32
  }
  func.func @transform_2(%arg0: i32) -> (i32, i32) {
    %c0_i32 = arith.constant 0 : i32
    %c0_i32_0 = arith.constant 0 : i32
    %c0_i32_1 = arith.constant 0 : i32
    return %c0_i32, %c0_i32_0 : i32, i32
  }
  func.func @transform_3(%arg0: i32) -> (i32, i32) {
    %c0_i32 = arith.constant 0 : i32
    %c0_i32_0 = arith.constant 0 : i32
    %c0_i32_1 = arith.constant 0 : i32
    return %c0_i32, %c0_i32_0 : i32, i32
  }
  func.func @transform_4(%arg0: i32) -> (i32, i32) {
    %c0_i32 = arith.constant 0 : i32
    %c0_i32_0 = arith.constant 0 : i32
    %c0_i32_1 = arith.constant 0 : i32
    return %c0_i32, %c0_i32_0 : i32, i32
  }
  func.func @transform_5(%arg0: i32) -> (i32, i32) {
    %c0_i32 = arith.constant 0 : i32
    %c0_i32_0 = arith.constant 0 : i32
    %c0_i32_1 = arith.constant 0 : i32
    return %c0_i32, %c0_i32_0 : i32, i32
  }
  func.func @transform_6(%arg0: i32) -> (i32, i32) {
    %c0_i32 = arith.constant 0 : i32
    %c0_i32_0 = arith.constant 0 : i32
    return %arg0, %c0_i32 : i32, i32
  }
}

module attributes {stable_mosaic.version = 11 : i64} {
  func.func @kernel(%arg0: i32, %arg1: memref<256x256xf32, #tpu.memory_space<vmem>>, %arg2: memref<256x128xf32, #tpu.memory_space<vmem>>, %arg3: memref<128x128xf32, #tpu.memory_space<vmem>>, %arg4: memref<128x128xf32, #tpu.memory_space<vmem>>, %arg5: memref<128x128xf32, #tpu.memory_space<vmem>>, %arg6: memref<128x128xf32, #tpu.memory_space<vmem>>, %arg7: memref<256x128xf32, #tpu.memory_space<vmem>>) attributes {dimension_semantics = [#tpu.dimension_semantics<parallel>], iteration_bounds = array<i64: 1>, scalar_prefetch = 0 : i64, scratch_operands = 0 : i64, tpu.core_type = #tpu.core_type<tc>, window_params = [{transform_indices = @transform_0, window_bounds = array<i64: 256, 256>}, {pipeline_mode = #tpu.pipeline_mode<synchronous>, transform_indices = @transform_1, window_bounds = array<i64: 256, 128>}, {pipeline_mode = #tpu.pipeline_mode<synchronous>, transform_indices = @transform_2, window_bounds = array<i64: 128, 128>}, {pipeline_mode = #tpu.pipeline_mode<synchronous>, transform_indices = @transform_3, window_bounds = array<i64: 128, 128>}, {pipeline_mode = #tpu.pipeline_mode<synchronous>, transform_indices = @transform_4, window_bounds = array<i64: 128, 128>}, {pipeline_mode = #tpu.pipeline_mode<synchronous>, transform_indices = @transform_5, window_bounds = array<i64: 128, 128>}, {transform_indices = @transform_6, window_bounds = array<i64: 256, 128>}]} {
    %c0 = arith.constant 0 : index
    %c0_0 = arith.constant 0 : index
    %0 = vector.load %arg1[%c0, %c0_0] : memref<256x256xf32, #tpu.memory_space<vmem>>, vector<256x256xf32>
    %c0_1 = arith.constant 0 : index
    %c0_2 = arith.constant 0 : index
    %1 = vector.load %arg2[%c0_1, %c0_2] : memref<256x128xf32, #tpu.memory_space<vmem>>, vector<256x128xf32>
    %cst = arith.constant dense<0.000000e+00> : vector<256x128xf32>
    %2 = tpu.matmul %0, %1, %cst {dimension_numbers = #tpu.dot_dimension_numbers<[1], [0], [0], [1], [0, 0, 1, 1], [], []>} : vector<256x256xf32>, vector<256x128xf32>, vector<256x128xf32> -> vector<256x128xf32>
    %cst_3 = arith.constant 0.000000e+00 : f32
    %3 = vector.broadcast %cst_3 : f32 to vector<256x128xf32>
    %4 = arith.maximumf %2, %3 : vector<256x128xf32>
    %c0_4 = arith.constant 0 : index
    %c0_5 = arith.constant 0 : index
    %5 = vector.load %arg3[%c0_4, %c0_5] : memref<128x128xf32, #tpu.memory_space<vmem>>, vector<128x128xf32>
    %c0_6 = arith.constant 0 : index
    %c0_7 = arith.constant 0 : index
    %6 = vector.load %arg4[%c0_6, %c0_7] : memref<128x128xf32, #tpu.memory_space<vmem>>, vector<128x128xf32>
    %cst_8 = arith.constant dense<0.000000e+00> : vector<256x128xf32>
    %7 = tpu.matmul %4, %5, %cst_8 {dimension_numbers = #tpu.dot_dimension_numbers<[1], [0], [0], [1], [0, 0, 1, 1], [], []>} : vector<256x128xf32>, vector<128x128xf32>, vector<256x128xf32> -> vector<256x128xf32>
    %cst_9 = arith.constant 0.000000e+00 : f32
    %8 = vector.broadcast %cst_9 : f32 to vector<256x128xf32>
    %9 = arith.maximumf %7, %8 : vector<256x128xf32>
    %cst_10 = arith.constant dense<0.000000e+00> : vector<256x128xf32>
    %10 = tpu.matmul %9, %6, %cst_10 {dimension_numbers = #tpu.dot_dimension_numbers<[1], [0], [0], [1], [0, 0, 1, 1], [], []>} : vector<256x128xf32>, vector<128x128xf32>, vector<256x128xf32> -> vector<256x128xf32>
    %11 = arith.addf %10, %4 : vector<256x128xf32>
    %cst_11 = arith.constant 0.000000e+00 : f32
    %12 = vector.broadcast %cst_11 : f32 to vector<256x128xf32>
    %13 = arith.maximumf %11, %12 : vector<256x128xf32>
    %c0_12 = arith.constant 0 : index
    %c0_13 = arith.constant 0 : index
    %14 = vector.load %arg5[%c0_12, %c0_13] : memref<128x128xf32, #tpu.memory_space<vmem>>, vector<128x128xf32>
    %c0_14 = arith.constant 0 : index
    %c0_15 = arith.constant 0 : index
    %15 = vector.load %arg6[%c0_14, %c0_15] : memref<128x128xf32, #tpu.memory_space<vmem>>, vector<128x128xf32>
    %cst_16 = arith.constant dense<0.000000e+00> : vector<256x128xf32>
    %16 = tpu.matmul %13, %14, %cst_16 {dimension_numbers = #tpu.dot_dimension_numbers<[1], [0], [0], [1], [0, 0, 1, 1], [], []>} : vector<256x128xf32>, vector<128x128xf32>, vector<256x128xf32> -> vector<256x128xf32>
    %cst_17 = arith.constant 0.000000e+00 : f32
    %17 = vector.broadcast %cst_17 : f32 to vector<256x128xf32>
    %18 = arith.maximumf %16, %17 : vector<256x128xf32>
    %cst_18 = arith.constant dense<0.000000e+00> : vector<256x128xf32>
    %19 = tpu.matmul %18, %15, %cst_18 {dimension_numbers = #tpu.dot_dimension_numbers<[1], [0], [0], [1], [0, 0, 1, 1], [], []>} : vector<256x128xf32>, vector<128x128xf32>, vector<256x128xf32> -> vector<256x128xf32>
    %20 = arith.addf %19, %13 : vector<256x128xf32>
    %cst_19 = arith.constant 0.000000e+00 : f32
    %21 = vector.broadcast %cst_19 : f32 to vector<256x128xf32>
    %22 = arith.maximumf %20, %21 : vector<256x128xf32>
    %c0_20 = arith.constant 0 : index
    %c0_21 = arith.constant 0 : index
    %23 = vector.load %arg7[%c0_20, %c0_21] : memref<256x128xf32, #tpu.memory_space<vmem>>, vector<256x128xf32>
    tpu.vector_store %arg7[%c0_20, %c0_21], %22 {strides = array<i32>} : memref<256x128xf32, #tpu.memory_space<vmem>>, vector<256x128xf32>,
    return
  }
  func.func @transform_0(%arg0: i32) -> (i32, i32) {
    %c0_i32 = arith.constant 0 : i32
    %c0_i32_0 = arith.constant 0 : i32
    return %arg0, %c0_i32 : i32, i32
  }
  func.func @transform_1(%arg0: i32) -> (i32, i32) {
    %c0_i32 = arith.constant 0 : i32
    %c0_i32_0 = arith.constant 0 : i32
    %c0_i32_1 = arith.constant 0 : i32
    return %c0_i32, %c0_i32_0 : i32, i32
  }
  func.func @transform_2(%arg0: i32) -> (i32, i32) {
    %c0_i32 = arith.constant 0 : i32
    %c0_i32_0 = arith.constant 0 : i32
    %c0_i32_1 = arith.constant 0 : i32
    return %c0_i32, %c0_i32_0 : i32, i32
  }
  func.func @transform_3(%arg0: i32) -> (i32, i32) {
    %c0_i32 = arith.constant 0 : i32
    %c0_i32_0 = arith.constant 0 : i32
    %c0_i32_1 = arith.constant 0 : i32
    return %c0_i32, %c0_i32_0 : i32, i32
  }
  func.func @transform_4(%arg0: i32) -> (i32, i32) {
    %c0_i32 = arith.constant 0 : i32
    %c0_i32_0 = arith.constant 0 : i32
    %c0_i32_1 = arith.constant 0 : i32
    return %c0_i32, %c0_i32_0 : i32, i32
  }
  func.func @transform_5(%arg0: i32) -> (i32, i32) {
    %c0_i32 = arith.constant 0 : i32
    %c0_i32_0 = arith.constant 0 : i32
    %c0_i32_1 = arith.constant 0 : i32
    return %c0_i32, %c0_i32_0 : i32, i32
  }
  func.func @transform_6(%arg0: i32) -> (i32, i32) {
    %c0_i32 = arith.constant 0 : i32
    %c0_i32_0 = arith.constant 0 : i32
    return %arg0, %c0_i32 : i32, i32
  }
}

</mosaic_0001>

<bundles_post_ra>
// kernel: tpu_custom_call.1
= control target key start
LH: loop header
LB: loop body
LE: loop exit
PB: predicated region body
PF: predicated region fallthrough
CT: control target
= control target key end

     0   :  { %11 = vsyncpa [#allocation3], 0  ;;  %s3096_s0 = inlined_call_operand.hbm [shape: f32[256,256], index: 0, kind: input, shape index: {}]   ;;  %s3097_s1 = inlined_call_operand.hbm [shape: f32[256,128], index: 1, kind: input, shape index: {}]   ;;  %s3098_s2 = inlined_call_operand.hbm [shape: f32[128,128], index: 2, kind: input, shape index: {}]   ;;  %s3099_s3 = inlined_call_operand.hbm [shape: f32[128,128], index: 3, kind: input, shape index: {}]   ;;  %s3100_s4 = inlined_call_operand.hbm [shape: f32[128,128], index: 4, kind: input, shape index: {}]   ;;  %s3101_s5 = inlined_call_operand.hbm [shape: f32[128,128], index: 5, kind: input, shape index: {}]   ;;  %s3102_s6 = inlined_call_operand.hbm [shape: f32[256,128], index: 6, kind: output, shape index: {}]  }
   0x1   :  { %12 = vsyncpa [#allocation6], 0 }
   0x2   :  { %13 = vsyncpa [#allocation9], 0 }
   0x3   :  { %14 = vsyncpa [#allocation12], 0 }
   0x4   :  { %15 = vsyncpa [#allocation4], 0  ;;  %s2483_s21 = smov [#allocation5]   ;;  %s2319_s25 = scalar_lea.hbm %s3097_s1, 4096 }
   0x5   :  { %s33_s22 = sshll.u32 %s2483_s21, 4  ;;  %p2320_p0 = scmp.ne.s32.totalorder %s3097_s1, %s2319_s25  ;;  %s34_s22 = int_to_ptr.vmem [resolvable:$true] %s33_s22 }
   0x6   :  { %p2323_p1 = scmp.lt.u32.totalorder %s2319_s25, %s3097_s1 }
   0x8   :  { %p2325_p2 = pnand %p2323_p1, %p2320_p0 }
   0xa   :  { %2328 = shalt.err (!%p2325_p2)
}
   0xb   :  { %s2329_s30 = scalar_lea.vmem %s34_s22, 4096  ;;  %p2334_p4 = scmp.lt.s32.totalorder %s34_s22, %s34_s22 }
   0xc   :  { %p2330_p3 = scmp.ne.s32.totalorder %s34_s22, %s2329_s30  ;;  %p2335_p5 = scmp.lt.s32.totalorder %s2329_s30, %s2329_s30 }
   0xe   :  { %p2336_p6 = por %p2335_p5, %p2334_p4 }
  0x10   :  { %p2337_p7 = pnand %p2336_p6, %p2330_p3 }
  0x12   :  { %2340 = shalt.err (!%p2337_p7)
}
  0x13   :  { %s2484_s7 = smov 128   ;;  %s2485_s8 = smov 8  }
  0x14   :  { %39 = dma.hbm_to_vmem [thread:$0]  %s3097_s1, 4096, %s34_s22, [#allocation6], %s2484_s7, %s2484_s7, %s2485_s8  }
  0x15   :  { %s2486_s11 = smov [#allocation8]   ;;  %s2487_s13 = smov [#allocation2]  }
  0x16   :  { %s57_s12 = sshll.u32 %s2486_s11, 4  ;;  %s21_s14 = sshll.u32 %s2487_s13, 4  ;;  %s58_s12 = int_to_ptr.vmem [resolvable:$true] %s57_s12  ;;  %s22_s14 = int_to_ptr.vmem [resolvable:$true] %s21_s14 }
  0x17   :  { %s2341_s17 = scalar_lea.hbm %s3099_s3, 2048 }
  0x18   :  { %p2342_p8 = scmp.ne.s32.totalorder %s3099_s3, %s2341_s17  ;;  %p2345_p9 = scmp.lt.u32.totalorder %s2341_s17, %s3099_s3 }
  0x1a   :  { %p2347_p10 = pnand %p2345_p9, %p2342_p8 }
  0x1c   :  { %2350 = shalt.err (!%p2347_p10)
}
  0x1d   :  { %s2351_s1 = scalar_lea.vmem %s58_s12, 2048  ;;  %p2356_p12 = scmp.lt.s32.totalorder %s58_s12, %s58_s12 }
  0x1e   :  { %p2352_p11 = scmp.ne.s32.totalorder %s58_s12, %s2351_s1  ;;  %p2357_p13 = scmp.lt.s32.totalorder %s2351_s1, %s2351_s1 }
  0x20   :  { %p2358_p0 = por %p2357_p13, %p2356_p12 }
  0x22   :  { %p2359_p1 = pnand %p2358_p0, %p2352_p11 }
  0x24   :  { %2362 = shalt.err (!%p2359_p1)
}
  0x25   :  { %63 = dma.hbm_to_vmem [thread:$0]  %s3099_s3, 2048, %s58_s12, [#allocation9], %s2484_s7, %s2484_s7, %s2485_s8  }
  0x26   :  { %s2363_s26 = scalar_lea.hbm %s3096_s0, 8192 }
  0x27   :  { %p2364_p2 = scmp.ne.s32.totalorder %s3096_s0, %s2363_s26  ;;  %p2367_p3 = scmp.lt.u32.totalorder %s2363_s26, %s3096_s0 }
  0x29   :  { %p2369_p4 = pnand %p2367_p3, %p2364_p2 }
  0x2b   :  { %2372 = shalt.err (!%p2369_p4)
}
  0x2c   :  { %s2373_s9 = scalar_lea.vmem %s22_s14, 8192  ;;  %p2378_p6 = scmp.lt.s32.totalorder %s22_s14, %s22_s14 }
  0x2d   :  { %p2374_p5 = scmp.ne.s32.totalorder %s22_s14, %s2373_s9  ;;  %p2379_p7 = scmp.lt.s32.totalorder %s2373_s9, %s2373_s9 }
  0x2f   :  { %p2380_p8 = por %p2379_p7, %p2378_p6 }
  0x31   :  { %p2381_p9 = pnand %p2380_p8, %p2374_p5 }
  0x33   :  { %2384 = shalt.err (!%p2381_p9)
}
  0x34   :  { %s2488_s3 = smov 256   ;;  %s2489_s10 = smov 16  }
  0x35   :  { %27 = dma.hbm_to_vmem [thread:$0]  %s3096_s0, 8192, %s22_s14, [#allocation3], %s2488_s3, %s2488_s3, %s2489_s10  }
  0x36   :  { %s2490_s13 = smov [#allocation7]   ;;  %s2491_s16 = smov [#allocation10]  }
  0x37   :  { %s45_s15 = sshll.u32 %s2490_s13, 4  ;;  %s69_s17 = sshll.u32 %s2491_s16, 4  ;;  %s46_s15 = int_to_ptr.vmem [resolvable:$true] %s45_s15  ;;  %s70_s17 = int_to_ptr.vmem [resolvable:$true] %s69_s17 }
  0x38   :  { %s2385_s20 = scalar_lea.hbm %s3098_s2, 2048 }
  0x39   :  { %p2386_p10 = scmp.ne.s32.totalorder %s3098_s2, %s2385_s20  ;;  %p2389_p11 = scmp.lt.u32.totalorder %s2385_s20, %s3098_s2 }
  0x3b   :  { %p2391_p12 = pnand %p2389_p11, %p2386_p10 }
  0x3d   :  { %2394 = shalt.err (!%p2391_p12)
}
  0x3e   :  { %s2395_s0 = scalar_lea.vmem %s46_s15, 2048  ;;  %p2400_p0 = scmp.lt.s32.totalorder %s46_s15, %s46_s15 }
  0x3f   :  { %p2396_p13 = scmp.ne.s32.totalorder %s46_s15, %s2395_s0  ;;  %p2401_p1 = scmp.lt.s32.totalorder %s2395_s0, %s2395_s0 }
  0x41   :  { %p2402_p2 = por %p2401_p1, %p2400_p0 }
  0x43   :  { %p2403_p3 = pnand %p2402_p2, %p2396_p13 }
  0x45   :  { %2406 = shalt.err (!%p2403_p3)
}
  0x46   :  { %51 = dma.hbm_to_vmem [thread:$0]  %s3098_s2, 2048, %s46_s15, [#allocation6], %s2484_s7, %s2484_s7, %s2485_s8  }
  0x47   :  { %s2407_s27 = scalar_lea.hbm %s3100_s4, 2048 }
  0x48   :  { %p2408_p4 = scmp.ne.s32.totalorder %s3100_s4, %s2407_s27  ;;  %p2411_p5 = scmp.lt.u32.totalorder %s2407_s27, %s3100_s4 }
  0x4a   :  { %p2413_p6 = pnand %p2411_p5, %p2408_p4 }
  0x4c   :  { %2416 = shalt.err (!%p2413_p6)
}
  0x4d   :  { %s2417_s3 = scalar_lea.vmem %s70_s17, 2048  ;;  %p2422_p8 = scmp.lt.s32.totalorder %s70_s17, %s70_s17 }
  0x4e   :  { %p2418_p7 = scmp.ne.s32.totalorder %s70_s17, %s2417_s3  ;;  %p2423_p9 = scmp.lt.s32.totalorder %s2417_s3, %s2417_s3 }
  0x50   :  { %p2424_p10 = por %p2423_p9, %p2422_p8 }
  0x52   :  { %p2425_p11 = pnand %p2424_p10, %p2418_p7 }
  0x54   :  { %2428 = shalt.err (!%p2425_p11)
}
  0x55   :  { %75 = dma.hbm_to_vmem [thread:$0]  %s3100_s4, 2048, %s70_s17, [#allocation9], %s2484_s7, %s2484_s7, %s2485_s8  }
  0x56   :  { %s2492_s11 = smov [#allocation11]   ;;  %s2429_s16 = scalar_lea.hbm %s3101_s5, 2048 }
  0x57   :  { %s81_s12 = sshll.u32 %s2492_s11, 4  ;;  %p2430_p12 = scmp.ne.s32.totalorder %s3101_s5, %s2429_s16  ;;  %s82_s12 = int_to_ptr.vmem [resolvable:$true] %s81_s12 }
  0x58   :  { %p2433_p13 = scmp.lt.u32.totalorder %s2429_s16, %s3101_s5 }
  0x5a   :  { %p2435_p0 = pnand %p2433_p13, %p2430_p12 }
  0x5c   :  { %2438 = shalt.err (!%p2435_p0)
}
  0x5d   :  { %s2439_s1 = scalar_lea.vmem %s82_s12, 2048  ;;  %p2444_p2 = scmp.lt.s32.totalorder %s82_s12, %s82_s12 }
  0x5e   :  { %p2440_p1 = scmp.ne.s32.totalorder %s82_s12, %s2439_s1  ;;  %p2445_p3 = scmp.lt.s32.totalorder %s2439_s1, %s2439_s1 }
  0x60   :  { %p2446_p4 = por %p2445_p3, %p2444_p2 }
  0x62   :  { %p2447_p5 = pnand %p2446_p4, %p2440_p1 }
  0x64   :  { %2450 = shalt.err (!%p2447_p5)
}
  0x65   :  { %87 = dma.hbm_to_vmem [thread:$0]  %s3101_s5, 2048, %s82_s12, [#allocation12], %s2484_s7, %s2484_s7, %s2485_s8  }
  0x66   :  { %2473 = dma.done.wait [#allocation3], 8192  }
  0x67   :  { %2474 = vsyncadd [#allocation3], 4294959104 }
  0x68   :  { %2475 = dma.done.wait [#allocation6], 6144  }
  0x69   :  { %2476 = vsyncadd [#allocation6], 4294961152 }
  0x6a   :  { %2477 = dma.done.wait [#allocation9], 4096  }
  0x6b   :  { %2478 = vsyncadd [#allocation9], 4294963200 }
  0x6c   :  { %2479 = dma.done.wait [#allocation12], 2048  }
  0x6d   :  { %2480 = vsyncadd [#allocation12], 4294965248  ;;  %v2493_v0 = vmov 0.0|0.0   ;;  %v170_v1 = vld [vmem:[#allocation5] sm:$0xff]  ;;  %v171_v2 = vld [vmem:[#allocation5 + $0x8] sm:$0xff]  ;;  %s2494_s5 = smov [#allocation13]  }
  0x6e   :  { %2115 = vmatprep.subr.bf16.mxu0 %v2493_v0  ;;  %v172_v3 = vld [vmem:[#allocation5 + $0x10] sm:$0xff]  ;;  %v2116_v4 = vpack.c.bf16 %v171_v2, %v170_v1  ;;  %v173_v5 = vld [vmem:[#allocation5 + $0x18] sm:$0xff]  ;;  %v174_v7 = vld [vmem:[#allocation5 + $0x20] sm:$0xff]  ;;  %s1588_s22 = sshll.u32 %s2494_s5, 4  ;;  %s1589_s22 = int_to_ptr.vmem [resolvable:$true] %s1588_s22 }
  0x6f   :  { %v2119_v6 = vpack.c.bf16 %v173_v5, %v172_v3  ;;  %v175_v8 = vld [vmem:[#allocation5 + $0x28] sm:$0xff]  ;;  %v176_v10 = vld [vmem:[#allocation5 + $0x30] sm:$0xff]  ;;  %v177_v11 = vld [vmem:[#allocation5 + $0x38] sm:$0xff]  ;;  %s2451_s23 = scalar_lea.vmem %s1589_s22, 4096  ;;  %p2456_p7 = scmp.lt.s32.totalorder %s1589_s22, %s1589_s22 }
  0x70   :  { %2117 = vmatpush1.bf16.msra.mxu0 %v2116_v4  ;;  %v2122_v9 = vpack.c.bf16 %v175_v8, %v174_v7  ;;  %v107_v12 = vld [vmem:[#allocation2 + $0x8] sm:$0xff]  ;;  %v2125_v13 = vpack.c.bf16 %v177_v11, %v176_v10  ;;  %v178_v14 = vld [vmem:[#allocation5 + $0x40] sm:$0xff]  ;;  %v180_v17 = vld [vmem:[#allocation5 + $0x50] sm:$0xff]  ;;  %p2452_p6 = scmp.ne.s32.totalorder %s1589_s22, %s2451_s23  ;;  %p2457_p8 = scmp.lt.s32.totalorder %s2451_s23, %s2451_s23 }
  0x71   :  { %2118 = vmatprep.subr.bf16.mxu0 %v2493_v0  ;;  %266 = vmatprep.mubr.f32.mxu0 %v107_v12  ;;  %v179_v15 = vld [vmem:[#allocation5 + $0x48] sm:$0xff]  ;;  %v181_v18 = vld [vmem:[#allocation5 + $0x58] sm:$0xff]  ;;  %v182_v20 = vld [vmem:[#allocation5 + $0x60] sm:$0xff] }
  0x72   :  { %v2128_v16 = vpack.c.bf16 %v179_v15, %v178_v14  ;;  %v2131_v19 = vpack.c.bf16 %v181_v18, %v180_v17  ;;  %v183_v21 = vld [vmem:[#allocation5 + $0x68] sm:$0xff]  ;;  %v184_v23 = vld [vmem:[#allocation5 + $0x70] sm:$0xff]  ;;  %v185_v24 = vld [vmem:[#allocation5 + $0x78] sm:$0xff]  ;;  %p2458_p9 = por %p2457_p8, %p2456_p7 }
  0x73   :  { %v2134_v22 = vpack.c.bf16 %v183_v21, %v182_v20  ;;  %v2137_v25 = vpack.c.bf16 %v185_v24, %v184_v23  ;;  %v186_v26 = vld [vmem:[#allocation5 + $0x80] sm:$0xff]  ;;  %v187_v27 = vld [vmem:[#allocation5 + $0x88] sm:$0xff]  ;;  %v188_v29 = vld [vmem:[#allocation5 + $0x90] sm:$0xff] }
  0x74   :  { %2120 = vmatpush1.bf16.msra.mxu0 %v2119_v6  ;;  %v2140_v28 = vpack.c.bf16 %v187_v27, %v186_v26  ;;  %v189_v30 = vld [vmem:[#allocation5 + $0x98] sm:$0xff]  ;;  %v190_v32 = vld [vmem:[#allocation5 + $0xa0] sm:$0xff]  ;;  %v191_v33 = vld [vmem:[#allocation5 + $0xa8] sm:$0xff]  ;;  %p2459_p10 = pnand %p2458_p9, %p2452_p6 }
  0x75   :  { %2121 = vmatprep.subr.bf16.mxu0 %v2493_v0  ;;  %v2143_v31 = vpack.c.bf16 %v189_v30, %v188_v29  ;;  %v2146_v34 = vpack.c.bf16 %v191_v33, %v190_v32  ;;  %v192_v35 = vld [vmem:[#allocation5 + $0xb0] sm:$0xff]  ;;  %v193_v36 = vld [vmem:[#allocation5 + $0xb8] sm:$0xff]  ;;  %v194_v38 = vld [vmem:[#allocation5 + $0xc0] sm:$0xff] }
  0x76   :  { %v2149_v37 = vpack.c.bf16 %v193_v36, %v192_v35  ;;  %v195_v39 = vld [vmem:[#allocation5 + $0xc8] sm:$0xff]  ;;  %v196_v41 = vld [vmem:[#allocation5 + $0xd0] sm:$0xff]  ;;  %v197_v42 = vld [vmem:[#allocation5 + $0xd8] sm:$0xff] }
  0x77   :  { %v2152_v40 = vpack.c.bf16 %v195_v39, %v194_v38  ;;  %v2155_v43 = vpack.c.bf16 %v197_v42, %v196_v41  ;;  %v198_v44 = vld [vmem:[#allocation5 + $0xe0] sm:$0xff]  ;;  %v199_v45 = vld [vmem:[#allocation5 + $0xe8] sm:$0xff]  ;;  %v200_v47 = vld [vmem:[#allocation5 + $0xf0] sm:$0xff] }
  0x78   :  { %2123 = vmatpush1.bf16.msra.mxu0 %v2122_v9  ;;  %v2158_v46 = vpack.c.bf16 %v199_v45, %v198_v44  ;;  %v201_v48 = vld [vmem:[#allocation5 + $0xf8] sm:$0xff]  ;;  %v459_v50 = vld [vmem:[#allocation7] sm:$0xff]  ;;  %v460_v51 = vld [vmem:[#allocation7 + $0x8] sm:$0xff] }
  0x79   :  { %2124 = vmatprep.subr.bf16.mxu0 %v2493_v0  ;;  %v2161_v49 = vpack.c.bf16 %v201_v48, %v200_v47  ;;  %v461_v52 = vld [vmem:[#allocation7 + $0x10] sm:$0xff]  ;;  %v106_v53 = vld [vmem:[#allocation2] sm:$0xff]  ;;  %v2163_v54 = vpack.c.bf16 %v460_v51, %v459_v50  ;;  %v462_v55 = vld [vmem:[#allocation7 + $0x18] sm:$0xff] }
  0x7a   :  { %v109_v56 = vld [vmem:[#allocation2 + $0x18] sm:$0xff]  ;;  %v2167_v57 = vpack.c.bf16 %v462_v55, %v461_v52  ;;  %v463_v58 = vld [vmem:[#allocation7 + $0x20] sm:$0xff]  ;;  %v464_v59 = vld [vmem:[#allocation7 + $0x28] sm:$0xff] }
  0x7b   :  { %2164 = vmatprep.subr.bf16.mxu1 %v2163_v54  ;;  %v108_v60 = vld [vmem:[#allocation2 + $0x10] sm:$0xff]  ;;  %v2171_v61 = vpack.c.bf16 %v464_v59, %v463_v58  ;;  %v111_v62 = vld [vmem:[#allocation2 + $0x28] sm:$0xff]  ;;  %v110_v1 = vld [vmem:[#allocation2 + $0x20] sm:$0xff] }
  0x7c   :  { %2126 = vmatpush1.bf16.msra.mxu0 %v2125_v13  ;;  %2166 = vmatpush3.bf16.msra.mxu1 %v2163_v54  ;;  %v465_v63 = vld [vmem:[#allocation7 + $0x30] sm:$0xff]  ;;  %v113_v3 = vld [vmem:[#allocation2 + $0x38] sm:$0xff]  ;;  %v467_v4 = vld [vmem:[#allocation7 + $0x40] sm:$0xff] }
  0x7d   :  { %2127 = vmatprep.subr.bf16.mxu0 %v2493_v0  ;;  %2168 = vmatprep.subr.bf16.mxu1 %v2167_v57  ;;  %v468_v5 = vld [vmem:[#allocation7 + $0x48] sm:$0xff]  ;;  %v112_v6 = vld [vmem:[#allocation2 + $0x30] sm:$0xff]  ;;  %v470_v10 = vld [vmem:[#allocation7 + $0x58] sm:$0xff] }
  0x7e   :  { %v2179_v7 = vpack.c.bf16 %v468_v5, %v467_v4  ;;  %v115_v8 = vld [vmem:[#allocation2 + $0x48] sm:$0xff]  ;;  %v469_v9 = vld [vmem:[#allocation7 + $0x50] sm:$0xff]  ;;  %v114_v11 = vld [vmem:[#allocation2 + $0x40] sm:$0xff] }
  0x7f   :  { %v2183_v12 = vpack.c.bf16 %v470_v10, %v469_v9  ;;  %v117_v13 = vld [vmem:[#allocation2 + $0x58] sm:$0xff]  ;;  %v471_v14 = vld [vmem:[#allocation7 + $0x60] sm:$0xff]  ;;  %v472_v15 = vld [vmem:[#allocation7 + $0x68] sm:$0xff] }
  0x80   :  { %2129 = vmatpush1.bf16.msra.mxu0 %v2128_v16  ;;  %2170 = vmatpush3.bf16.msra.mxu1 %v2167_v57  ;;  %v116_v16 = vld [vmem:[#allocation2 + $0x50] sm:$0xff]  ;;  %v2187_v17 = vpack.c.bf16 %v472_v15, %v471_v14  ;;  %v119_v18 = vld [vmem:[#allocation2 + $0x68] sm:$0xff]  ;;  %v121_v20 = vld [vmem:[#allocation2 + $0x78] sm:$0xff] }
  0x81   :  { %2130 = vmatprep.subr.bf16.mxu0 %v2493_v0  ;;  %2172 = vmatprep.subr.bf16.mxu1 %v2171_v61  ;;  %v120_v21 = vld [vmem:[#allocation2 + $0x70] sm:$0xff]  ;;  %v122_v23 = vld [vmem:[#allocation2 + $0x80] sm:$0xff]  ;;  %v125_v24 = vld [vmem:[#allocation2 + $0x98] sm:$0xff] }
  0x82   :  { %v127_v26 = vld [vmem:[#allocation2 + $0xa8] sm:$0xff]  ;;  %v126_v27 = vld [vmem:[#allocation2 + $0xa0] sm:$0xff]  ;;  %v128_v29 = vld [vmem:[#allocation2 + $0xb0] sm:$0xff] }
  0x83   :  { %v131_v30 = vld [vmem:[#allocation2 + $0xc8] sm:$0xff]  ;;  %v133_v32 = vld [vmem:[#allocation2 + $0xd8] sm:$0xff]  ;;  %v132_v33 = vld [vmem:[#allocation2 + $0xd0] sm:$0xff] }
  0x84   :  { %2132 = vmatpush1.bf16.msra.mxu0 %v2131_v19  ;;  %2174 = vmatpush3.bf16.msra.mxu1 %v2171_v61  ;;  %v118_v19 = vld [vmem:[#allocation2 + $0x60] sm:$0xff]  ;;  %v137_v36 = vld [vmem:[#allocation2 + $0xf8] sm:$0xff]  ;;  %v139_v38 = vld [vmem:[#allocation2 + $0x108] sm:$0xff] }
  0x85   :  { %2133 = vmatprep.subr.bf16.mxu0 %v2493_v0  ;;  %v134_v35 = vld [vmem:[#allocation2 + $0xe0] sm:$0xff]  ;;  %v140_v41 = vld [vmem:[#allocation2 + $0x110] sm:$0xff]  ;;  %v143_v42 = vld [vmem:[#allocation2 + $0x128] sm:$0xff] }
  0x86   :  { %v138_v39 = vld [vmem:[#allocation2 + $0x100] sm:$0xff]  ;;  %v145_v44 = vld [vmem:[#allocation2 + $0x138] sm:$0xff]  ;;  %v144_v45 = vld [vmem:[#allocation2 + $0x130] sm:$0xff] }
  0x87   :  { %v146_v47 = vld [vmem:[#allocation2 + $0x140] sm:$0xff]  ;;  %v149_v48 = vld [vmem:[#allocation2 + $0x158] sm:$0xff]  ;;  %v151_v50 = vld [vmem:[#allocation2 + $0x168] sm:$0xff] }
  0x88   :  { %2135 = vmatpush1.bf16.msra.mxu0 %v2134_v22  ;;  %v123_v22 = vld [vmem:[#allocation2 + $0x88] sm:$0xff]  ;;  %v473_v51 = vld [vmem:[#allocation7 + $0x70] sm:$0xff]  ;;  %v474_v52 = vld [vmem:[#allocation7 + $0x78] sm:$0xff] }
  0x89   :  { %2136 = vmatprep.subr.bf16.mxu0 %v2493_v0  ;;  %v150_v54 = vld [vmem:[#allocation2 + $0x160] sm:$0xff]  ;;  %v153_v55 = vld [vmem:[#allocation2 + $0x178] sm:$0xff]  ;;  %v155_v57 = vld [vmem:[#allocation2 + $0x188] sm:$0xff] }
  0x8a   :  { %v154_v58 = vld [vmem:[#allocation2 + $0x180] sm:$0xff]  ;;  %v157_v59 = vld [vmem:[#allocation2 + $0x198] sm:$0xff]  ;;  %v159_v61 = vld [vmem:[#allocation2 + $0x1a8] sm:$0xff] }
  0x8b   :  { %v164_v4 = vld [vmem:[#allocation2 + $0x1d0] sm:$0xff]  ;;  %v167_v5 = vld [vmem:[#allocation2 + $0x1e8] sm:$0xff]  ;;  %v475_v9 = vld [vmem:[#allocation8] sm:$0xff] }
  0x8c   :  { %2138 = vmatpush1.bf16.msra.mxu0 %v2137_v25  ;;  %v124_v25 = vld [vmem:[#allocation2 + $0x90] sm:$0xff]  ;;  %v476_v10 = vld [vmem:[#allocation8 + $0x8] sm:$0xff] }
  0x8d   :  { %2139 = vmatprep.subr.bf16.mxu0 %v2493_v0  ;;  %v477_v15 = vld [vmem:[#allocation8 + $0x10] sm:$0xff] }
  0x90   :  { %2141 = vmatpush1.bf16.msra.mxu0 %v2140_v28  ;;  %v129_v28 = vld [vmem:[#allocation2 + $0xb8] sm:$0xff] }
  0x91   :  { %2142 = vmatprep.subr.bf16.mxu0 %v2493_v0 }
  0x94   :  { %2144 = vmatpush1.bf16.msra.mxu0 %v2143_v31  ;;  %v130_v31 = vld [vmem:[#allocation2 + $0xc0] sm:$0xff] }
  0x95   :  { %2145 = vmatprep.subr.bf16.mxu0 %v2493_v0 }
  0x98   :  { %2147 = vmatpush1.bf16.msra.mxu0 %v2146_v34  ;;  %v135_v34 = vld [vmem:[#allocation2 + $0xe8] sm:$0xff] }
  0x99   :  { %2148 = vmatprep.subr.bf16.mxu0 %v2493_v0 }
  0x9c   :  { %2150 = vmatpush1.bf16.msra.mxu0 %v2149_v37  ;;  %v136_v37 = vld [vmem:[#allocation2 + $0xf0] sm:$0xff] }
  0x9d   :  { %2151 = vmatprep.subr.bf16.mxu0 %v2493_v0 }
  0xa0   :  { %2153 = vmatpush1.bf16.msra.mxu0 %v2152_v40  ;;  %v141_v40 = vld [vmem:[#allocation2 + $0x118] sm:$0xff] }
  0xa1   :  { %2154 = vmatprep.subr.bf16.mxu0 %v2493_v0 }
  0xa4   :  { %2156 = vmatpush1.bf16.msra.mxu0 %v2155_v43  ;;  %v142_v43 = vld [vmem:[#allocation2 + $0x120] sm:$0xff] }
  0xa5   :  { %2157 = vmatprep.subr.bf16.mxu0 %v2493_v0 }
  0xa8   :  { %2159 = vmatpush1.bf16.msra.mxu0 %v2158_v46  ;;  %v147_v46 = vld [vmem:[#allocation2 + $0x148] sm:$0xff] }
  0xa9   :  { %2160 = vmatprep.subr.bf16.mxu0 %v2493_v0  ;;  %v466_v0 = vld [vmem:[#allocation7 + $0x38] sm:$0xff] }
  0xaa   :  { %v2175_v2 = vpack.c.bf16 %v466_v0, %v465_v63  ;;  %v161_v63 = vld [vmem:[#allocation2 + $0x1b8] sm:$0xff]  ;;  %v160_v0 = vld [vmem:[#allocation2 + $0x1b0] sm:$0xff] }
  0xac   :  { %2162 = vmatpush1.bf16.msra.mxu0 %v2161_v49  ;;  %2176 = vmatprep.subr.bf16.mxu1 %v2175_v2  ;;  %v148_v49 = vld [vmem:[#allocation2 + $0x150] sm:$0xff] }
  0xad   :  { %2178 = vmatpush3.bf16.msra.mxu1 %v2175_v2  ;;  %v162_v2 = vld [vmem:[#allocation2 + $0x1c0] sm:$0xff] }
  0xae   :  { %2180 = vmatprep.subr.bf16.mxu1 %v2179_v7 }
  0xaf   :  { %267 = vmatmul.mubr.f32.vlgmr.msra.gmra.mrb[0].mxu0 %v106_v53  ;;  %v2191_v53 = vpack.c.bf16 %v474_v52, %v473_v51 }
  0xb0   :  { %271 = vmatprep.mubr.f32.mxu0 %v109_v56  ;;  %v152_v56 = vld [vmem:[#allocation2 + $0x170] sm:$0xff] }
  0xb1   :  { %2182 = vmatpush3.bf16.msra.mxu1 %v2179_v7  ;;  %v169_v7 = vld [vmem:[#allocation2 + $0x1f8] sm:$0xff] }
  0xb2   :  { %2184 = vmatprep.subr.bf16.mxu1 %v2183_v12 }
  0xb3   :  { %272 = vmatmul.mubr.f32.gmra.mrb[2].mxu0 %v108_v60  ;;  %v156_v60 = vld [vmem:[#allocation2 + $0x190] sm:$0xff] }
  0xb4   :  { %276 = vmatprep.mubr.f32.mxu0 %v111_v62  ;;  %v158_v62 = vld [vmem:[#allocation2 + $0x1a0] sm:$0xff] }
  0xb5   :  { %2186 = vmatpush3.bf16.msra.mxu1 %v2183_v12  ;;  %v2195_v12 = vpack.c.bf16 %v476_v10, %v475_v9 }
  0xb6   :  { %2188 = vmatprep.subr.bf16.mxu1 %v2187_v17 }
  0xb7   :  { %277 = vmatmul.mubr.f32.gmra.mrb[4].mxu0 %v110_v1  ;;  %v163_v1 = vld [vmem:[#allocation2 + $0x1c8] sm:$0xff] }
  0xb8   :  { %281 = vmatprep.mubr.f32.mxu0 %v113_v3  ;;  %v165_v3 = vld [vmem:[#allocation2 + $0x1d8] sm:$0xff] }
  0xb9   :  { %2190 = vmatpush3.bf16.msra.mxu1 %v2187_v17 }
  0xba   :  { %2192 = vmatprep.subr.bf16.mxu1 %v2191_v53 }
  0xbb   :  { %282 = vmatmul.mubr.f32.gmra.mrb[6].mxu0 %v112_v6  ;;  %v166_v6 = vld [vmem:[#allocation2 + $0x1e0] sm:$0xff] }
  0xbc   :  { %286 = vmatprep.mubr.f32.mxu0 %v115_v8  ;;  %v168_v8 = vld [vmem:[#allocation2 + $0x1f0] sm:$0xff] }
  0xbd   :  { %2194 = vmatpush3.bf16.msra.mxu1 %v2191_v53 }
  0xbe   :  { %2196 = vmatprep.subr.bf16.mxu1 %v2195_v12 }
  0xbf   :  { %287 = vmatmul.mubr.f32.gmra.mrb[8].mxu0 %v114_v11 }
  0xc0   :  { %291 = vmatprep.mubr.f32.mxu0 %v117_v13 }
  0xc3   :  { %292 = vmatmul.mubr.f32.gmra.mrb[10].mxu0 %v116_v16  ;;  %v478_v16 = vld [vmem:[#allocation8 + $0x18] sm:$0xff] }
  0xc4   :  { %296 = vmatprep.mubr.f32.mxu0 %v119_v18 }
  0xc7   :  { %297 = vmatmul.mubr.f32.gmra.mrb[12].mxu0 %v118_v19 }
  0xc8   :  { %301 = vmatprep.mubr.f32.mxu0 %v121_v20  ;;  %v2199_v20 = vpack.c.bf16 %v478_v16, %v477_v15 }
  0xcb   :  { %302 = vmatmul.mubr.f32.gmra.mrb[14].mxu0 %v120_v21  ;;  %v479_v21 = vld [vmem:[#allocation8 + $0x20] sm:$0xff] }
  0xcc   :  { %306 = vmatprep.mubr.f32.mxu0 %v123_v22  ;;  %v480_v22 = vld [vmem:[#allocation8 + $0x28] sm:$0xff] }
  0xcf   :  { %307 = vmatmul.mubr.f32.gmra.mrb[16].mxu0 %v122_v23 }
  0xd0   :  { %311 = vmatprep.mubr.f32.mxu0 %v125_v24 }
  0xd3   :  { %312 = vmatmul.mubr.f32.gmra.mrb[18].mxu0 %v124_v25 }
  0xd4   :  { %316 = vmatprep.mubr.f32.mxu0 %v127_v26  ;;  %v2203_v26 = vpack.c.bf16 %v480_v22, %v479_v21 }
  0xd7   :  { %317 = vmatmul.mubr.f32.gmra.mrb[20].mxu0 %v126_v27  ;;  %v481_v27 = vld [vmem:[#allocation8 + $0x30] sm:$0xff] }
  0xd8   :  { %321 = vmatprep.mubr.f32.mxu0 %v129_v28  ;;  %v482_v28 = vld [vmem:[#allocation8 + $0x38] sm:$0xff] }
  0xdb   :  { %322 = vmatmul.mubr.f32.gmra.mrb[22].mxu0 %v128_v29 }
  0xdc   :  { %326 = vmatprep.mubr.f32.mxu0 %v131_v30 }
  0xdf   :  { %327 = vmatmul.mubr.f32.gmra.mrb[24].mxu0 %v130_v31 }
  0xe0   :  { %331 = vmatprep.mubr.f32.mxu0 %v133_v32  ;;  %v2207_v32 = vpack.c.bf16 %v482_v28, %v481_v27 }
  0xe3   :  { %332 = vmatmul.mubr.f32.gmra.mrb[26].mxu0 %v132_v33  ;;  %v483_v33 = vld [vmem:[#allocation8 + $0x40] sm:$0xff] }
  0xe4   :  { %336 = vmatprep.mubr.f32.mxu0 %v135_v34  ;;  %v484_v34 = vld [vmem:[#allocation8 + $0x48] sm:$0xff] }
  0xe7   :  { %337 = vmatmul.mubr.f32.gmra.mrb[28].mxu0 %v134_v35 }
  0xe8   :  { %341 = vmatprep.mubr.f32.mxu0 %v137_v36 }
  0xeb   :  { %342 = vmatmul.mubr.f32.gmra.mrb[30].mxu0 %v136_v37 }
  0xec   :  { %346 = vmatprep.mubr.f32.mxu0 %v139_v38  ;;  %v2211_v38 = vpack.c.bf16 %v484_v34, %v483_v33 }
  0xef   :  { %347 = vmatmul.mubr.f32.gmra.mrb[32].mxu0 %v138_v39  ;;  %v485_v39 = vld [vmem:[#allocation8 + $0x50] sm:$0xff] }
  0xf0   :  { %351 = vmatprep.mubr.f32.mxu0 %v141_v40  ;;  %v486_v40 = vld [vmem:[#allocation8 + $0x58] sm:$0xff] }
  0xf3   :  { %352 = vmatmul.mubr.f32.gmra.mrb[34].mxu0 %v140_v41 }
  0xf4   :  { %356 = vmatprep.mubr.f32.mxu0 %v143_v42 }
  0xf7   :  { %357 = vmatmul.mubr.f32.gmra.mrb[36].mxu0 %v142_v43 }
  0xf8   :  { %361 = vmatprep.mubr.f32.mxu0 %v145_v44  ;;  %v2215_v44 = vpack.c.bf16 %v486_v40, %v485_v39 }
  0xfb   :  { %362 = vmatmul.mubr.f32.gmra.mrb[38].mxu0 %v144_v45  ;;  %v487_v45 = vld [vmem:[#allocation8 + $0x60] sm:$0xff] }
  0xfc   :  { %366 = vmatprep.mubr.f32.mxu0 %v147_v46  ;;  %v488_v46 = vld [vmem:[#allocation8 + $0x68] sm:$0xff] }
  0xff   :  { %367 = vmatmul.mubr.f32.gmra.mrb[40].mxu0 %v146_v47 }
 0x100   :  { %371 = vmatprep.mubr.f32.mxu0 %v149_v48 }
 0x103   :  { %372 = vmatmul.mubr.f32.gmra.mrb[42].mxu0 %v148_v49 }
 0x104   :  { %376 = vmatprep.mubr.f32.mxu0 %v151_v50  ;;  %v2219_v50 = vpack.c.bf16 %v488_v46, %v487_v45  ;;  %v489_v45 = vld [vmem:[#allocation8 + $0x70] sm:$0xff]  ;;  %v490_v46 = vld [vmem:[#allocation8 + $0x78] sm:$0xff] }
 0x107   :  { %377 = vmatmul.mubr.f32.gmra.mrb[44].mxu0 %v150_v54 }
 0x108   :  { %381 = vmatprep.mubr.f32.mxu0 %v153_v55 }
 0x10b   :  { %382 = vmatmul.mubr.f32.gmra.mrb[46].mxu0 %v152_v56 }
 0x10c   :  { %386 = vmatprep.mubr.f32.mxu0 %v155_v57 }
 0x10f   :  { %387 = vmatmul.mubr.f32.gmra.mrb[48].mxu0 %v154_v58 }
 0x110   :  { %391 = vmatprep.mubr.f32.mxu0 %v157_v59 }
 0x113   :  { %392 = vmatmul.mubr.f32.gmra.mrb[50].mxu0 %v156_v60 }
 0x114   :  { %396 = vmatprep.mubr.f32.mxu0 %v159_v61 }
 0x117   :  { %397 = vmatmul.mubr.f32.gmra.mrb[52].mxu0 %v158_v62 }
 0x118   :  { %401 = vmatprep.mubr.f32.mxu0 %v161_v63 }
 0x11b   :  { %402 = vmatmul.mubr.f32.gmra.mrb[54].mxu0 %v160_v0 }
 0x11c   :  { %406 = vmatprep.mubr.f32.mxu0 %v163_v1 }
 0x11f   :  { %407 = vmatmul.mubr.f32.gmra.mrb[56].mxu0 %v162_v2 }
 0x120   :  { %411 = vmatprep.mubr.f32.mxu0 %v165_v3 }
 0x123   :  { %412 = vmatmul.mubr.f32.gmra.mrb[58].mxu0 %v164_v4 }
 0x124   :  { %416 = vmatprep.mubr.f32.mxu0 %v167_v5 }
 0x127   :  { %417 = vmatmul.mubr.f32.gmra.mrb[60].mxu0 %v166_v6 }
 0x128   :  { %421 = vmatprep.mubr.f32.mxu0 %v169_v7 }
 0x12b   :  { %422 = vmatmul.mubr.f32.gmra.mrb[62].mxu0 %v168_v8 }
 0x182   :  { %v2633_v11 = vpop.f32.mrb[0].mxu0 }
 0x183   :  { %v427_v13 = vmax.f32 %v2633_v11, 0.0  ;;  %v270_v14 = vpop.f32.mrb[1].mxu0 }
 0x185   :  { %1827 = vmatprep.mubr.f32.mxu1 %v427_v13 }
 0x186   :  { %v2638_v17 = vpop.f32.mrb[2].mxu0 }
 0x187   :  { %v428_v18 = vmax.f32 %v2638_v17, 0.0  ;;  %v275_v19 = vpop.f32.mrb[3].mxu0  ;;  %v1027_v17 = vld [vmem:[#allocation11 + $0x30] sm:$0xff] }
 0x189   :  { %1828 = vmatmul.mubr.f32.vlgmr.msra.gmra.mrb[0].mxu1 %v428_v18 }
 0x18a   :  { %v2643_v23 = vpop.f32.mrb[4].mxu0  ;;  %2198 = vmatpush3.bf16.msra.mxu1 %v2195_v12 }
 0x18b   :  { %v429_v24 = vmax.f32 %v2643_v23, 0.0  ;;  %v280_v25 = vpop.f32.mrb[5].mxu0  ;;  %2200 = vmatprep.subr.bf16.mxu1 %v2199_v20 }
 0x18d   :  { %1830 = vmatprep.mubr.f32.mxu1 %v429_v24 }
 0x18e   :  { %v2648_v29 = vpop.f32.mrb[6].mxu0  ;;  %2202 = vmatpush3.bf16.msra.mxu1 %v2199_v20 }
 0x18f   :  { %v430_v30 = vmax.f32 %v2648_v29, 0.0  ;;  %v285_v31 = vpop.f32.mrb[7].mxu0  ;;  %2204 = vmatprep.subr.bf16.mxu1 %v2203_v26  ;;  %v1032_v29 = vld [vmem:[#allocation11 + $0x58] sm:$0xff] }
 0x191   :  { %1831 = vmatmul.mubr.f32.gmra.mrb[2].mxu1 %v430_v30 }
 0x192   :  { %v2653_v35 = vpop.f32.mrb[8].mxu0  ;;  %2206 = vmatpush3.bf16.msra.mxu1 %v2203_v26 }
 0x193   :  { %v431_v36 = vmax.f32 %v2653_v35, 0.0  ;;  %v290_v37 = vpop.f32.mrb[9].mxu0  ;;  %2208 = vmatprep.subr.bf16.mxu1 %v2207_v32 }
 0x195   :  { %1833 = vmatprep.mubr.f32.mxu1 %v431_v36 }
 0x196   :  { %v2658_v41 = vpop.f32.mrb[10].mxu0  ;;  %2210 = vmatpush3.bf16.msra.mxu1 %v2207_v32 }
 0x197   :  { %v432_v42 = vmax.f32 %v2658_v41, 0.0  ;;  %v295_v43 = vpop.f32.mrb[11].mxu0  ;;  %2212 = vmatprep.subr.bf16.mxu1 %v2211_v38 }
 0x199   :  { %1834 = vmatmul.mubr.f32.gmra.mrb[4].mxu1 %v432_v42 }
 0x19a   :  { %v2663_v47 = vpop.f32.mrb[12].mxu0  ;;  %2214 = vmatpush3.bf16.msra.mxu1 %v2211_v38 }
 0x19b   :  { %v433_v48 = vmax.f32 %v2663_v47, 0.0  ;;  %v300_v49 = vpop.f32.mrb[13].mxu0  ;;  %2216 = vmatprep.subr.bf16.mxu1 %v2215_v44 }
 0x19d   :  { %1836 = vmatprep.mubr.f32.mxu1 %v433_v48 }
 0x19e   :  { %v2668_v51 = vpop.f32.mrb[14].mxu0  ;;  %2218 = vmatpush3.bf16.msra.mxu1 %v2215_v44 }
 0x19f   :  { %v434_v52 = vmax.f32 %v2668_v51, 0.0  ;;  %v305_v53 = vpop.f32.mrb[15].mxu0  ;;  %2220 = vmatprep.subr.bf16.mxu1 %v2219_v50 }
 0x1a0   :  { %v2223_v53 = vpack.c.bf16 %v490_v46, %v489_v45 }
 0x1a1   :  { %1837 = vmatmul.mubr.f32.gmra.mrb[6].mxu1 %v434_v52 }
 0x1a2   :  { %v2673_v54 = vpop.f32.mrb[16].mxu0  ;;  %2222 = vmatpush3.bf16.msra.mxu1 %v2219_v50 }
 0x1a3   :  { %v435_v55 = vmax.f32 %v2673_v54, 0.0  ;;  %v310_v56 = vpop.f32.mrb[17].mxu0  ;;  %2224 = vmatprep.subr.bf16.mxu1 %v2223_v53 }
 0x1a5   :  { %1839 = vmatprep.mubr.f32.mxu1 %v435_v55 }
 0x1a6   :  { %v2678_v57 = vpop.f32.mrb[18].mxu0  ;;  %2226 = vmatpush3.bf16.msra.mxu1 %v2223_v53 }
 0x1a7   :  { %v436_v58 = vmax.f32 %v2678_v57, 0.0  ;;  %v315_v59 = vpop.f32.mrb[19].mxu0 }
 0x1a9   :  { %1840 = vmatmul.mubr.f32.gmra.mrb[8].mxu1 %v436_v58 }
 0x1aa   :  { %v2683_v60 = vpop.f32.mrb[20].mxu0 }
 0x1ab   :  { %v437_v61 = vmax.f32 %v2683_v60, 0.0  ;;  %v320_v62 = vpop.f32.mrb[21].mxu0 }
 0x1ad   :  { %1842 = vmatprep.mubr.f32.mxu1 %v437_v61 }
 0x1ae   :  { %v2688_v63 = vpop.f32.mrb[22].mxu0 }
 0x1af   :  { %v438_v0 = vmax.f32 %v2688_v63, 0.0  ;;  %v325_v1 = vpop.f32.mrb[23].mxu0 }
 0x1b1   :  { %1843 = vmatmul.mubr.f32.gmra.mrb[10].mxu1 %v438_v0 }
 0x1b2   :  { %v2693_v2 = vpop.f32.mrb[24].mxu0 }
 0x1b3   :  { %v439_v3 = vmax.f32 %v2693_v2, 0.0  ;;  %v330_v4 = vpop.f32.mrb[25].mxu0 }
 0x1b5   :  { %1845 = vmatprep.mubr.f32.mxu1 %v439_v3 }
 0x1b6   :  { %v2698_v5 = vpop.f32.mrb[26].mxu0 }
 0x1b7   :  { %v440_v6 = vmax.f32 %v2698_v5, 0.0  ;;  %v335_v7 = vpop.f32.mrb[27].mxu0 }
 0x1b9   :  { %1846 = vmatmul.mubr.f32.gmra.mrb[12].mxu1 %v440_v6 }
 0x1ba   :  { %v2703_v8 = vpop.f32.mrb[28].mxu0 }
 0x1bb   :  { %v3119_v9 = vmax.f32 %v2703_v8, 0.0  ;;  %v340_v10 = vpop.f32.mrb[29].mxu0  ;;  %v3138_v2 = vmax.f32 %v2703_v8, 0.0 }
 0x1bd   :  { %1848 = vmatprep.mubr.f32.mxu1 %v3119_v9 }
 0x1be   :  { %v2708_v12 = vpop.f32.mrb[30].mxu0 }
 0x1bf   :  { %v3120_v14 = vmax.f32 %v2708_v12, 0.0  ;;  %v345_v15 = vpop.f32.mrb[31].mxu0  ;;  %v3137_v5 = vmax.f32 %v2708_v12, 0.0 }
 0x1c1   :  { %1849 = vmatmul.mubr.f32.gmra.mrb[14].mxu1 %v3120_v14 }
 0x1c2   :  { %v2713_v16 = vpop.f32.mrb[32].mxu0 }
 0x1c3   :  { %v3116_v19 = vmax.f32 %v2713_v16, 0.0  ;;  %v350_v20 = vpop.f32.mrb[33].mxu0  ;;  %v3140_v8 = vmax.f32 %v2713_v16, 0.0 }
 0x1c5   :  { %1851 = vmatprep.mubr.f32.mxu1 %v3116_v19 }
 0x1c6   :  { %v2718_v21 = vpop.f32.mrb[34].mxu0 }
 0x1c7   :  { %v3118_v22 = vmax.f32 %v2718_v21, 0.0  ;;  %v355_v25 = vpop.f32.mrb[35].mxu0  ;;  %v3139_v12 = vmax.f32 %v2718_v21, 0.0 }
 0x1c9   :  { %1852 = vmatmul.mubr.f32.gmra.mrb[16].mxu1 %v3118_v22  ;;  %v1012_v22 = vld [vmem:[#allocation10 + $0x38] sm:$0xff] }
 0x1ca   :  { %v2723_v26 = vpop.f32.mrb[36].mxu0 }
 0x1cb   :  { %v3113_v27 = vmax.f32 %v2723_v26, 0.0  ;;  %v360_v28 = vpop.f32.mrb[37].mxu0  ;;  %v3142_v16 = vmax.f32 %v2723_v26, 0.0 }
 0x1cd   :  { %1854 = vmatprep.mubr.f32.mxu1 %v3113_v27 }
 0x1ce   :  { %v2728_v31 = vpop.f32.mrb[38].mxu0 }
 0x1cf   :  { %v3115_v32 = vmax.f32 %v2728_v31, 0.0  ;;  %v365_v33 = vpop.f32.mrb[39].mxu0  ;;  %v3141_v21 = vmax.f32 %v2728_v31, 0.0 }
 0x1d1   :  { %1855 = vmatmul.mubr.f32.gmra.mrb[18].mxu1 %v3115_v32  ;;  %v1010_v32 = vld [vmem:[#allocation10 + $0x28] sm:$0xff] }
 0x1d2   :  { %v2733_v34 = vpop.f32.mrb[40].mxu0 }
 0x1d3   :  { %v3111_v37 = vmax.f32 %v2733_v34, 0.0  ;;  %v370_v38 = vpop.f32.mrb[41].mxu0  ;;  %v3144_v26 = vmax.f32 %v2733_v34, 0.0 }
 0x1d5   :  { %1857 = vmatprep.mubr.f32.mxu1 %v3111_v37 }
 0x1d6   :  { %v2738_v39 = vpop.f32.mrb[42].mxu0 }
 0x1d7   :  { %v3112_v40 = vmax.f32 %v2738_v39, 0.0  ;;  %v375_v43 = vpop.f32.mrb[43].mxu0  ;;  %v3143_v31 = vmax.f32 %v2738_v39, 0.0  ;;  %v1036_v39 = vld [vmem:[#allocation11 + $0x78] sm:$0xff] }
 0x1d9   :  { %1858 = vmatmul.mubr.f32.gmra.mrb[20].mxu1 %v3112_v40 }
 0x1da   :  { %v2743_v44 = vpop.f32.mrb[44].mxu0 }
 0x1db   :  { %v3109_v49 = vmax.f32 %v2743_v44, 0.0  ;;  %v380_v50 = vpop.f32.mrb[45].mxu0 }
 0x1dd   :  { %1860 = vmatprep.mubr.f32.mxu1 %v3109_v49  ;;  %v1007_v49 = vld [vmem:[#allocation10 + $0x10] sm:$0xff] }
 0x1de   :  { %v2748_v56 = vpop.f32.mrb[46].mxu0 }
 0x1df   :  { %v3110_v59 = vmax.f32 %v2748_v56, 0.0  ;;  %v385_v62 = vpop.f32.mrb[47].mxu0 }
 0x1e1   :  { %1861 = vmatmul.mubr.f32.gmra.mrb[22].mxu1 %v3110_v59  ;;  %v1008_v59 = vld [vmem:[#allocation10 + $0x18] sm:$0xff] }
 0x1e2   :  { %v2753_v1 = vpop.f32.mrb[48].mxu0  ;;  %v2231_v27 = vpack.c.bf16 %v1008_v59, %v1007_v49  ;;  %v1015_v59 = vld [vmem:[#allocation10 + $0x50] sm:$0xff] }
 0x1e3   :  { %v3106_v4 = vmax.f32 %v2753_v1, 0.0  ;;  %v390_v7 = vpop.f32.mrb[49].mxu0 }
 0x1e5   :  { %1863 = vmatprep.mubr.f32.mxu1 %v3106_v4  ;;  %v1006_v4 = vld [vmem:[#allocation10 + $0x8] sm:$0xff] }
 0x1e6   :  { %v2758_v10 = vpop.f32.mrb[50].mxu0 }
 0x1e7   :  { %v3107_v15 = vmax.f32 %v2758_v10, 0.0  ;;  %v395_v20 = vpop.f32.mrb[51].mxu0 }
 0x1e9   :  { %1864 = vmatmul.mubr.f32.gmra.mrb[24].mxu1 %v3107_v15 }
 0x1ea   :  { %v2763_v25 = vpop.f32.mrb[52].mxu0 }
 0x1eb   :  { %v3103_v28 = vmax.f32 %v2763_v25, 0.0  ;;  %v400_v33 = vpop.f32.mrb[53].mxu0 }
 0x1ed   :  { %1866 = vmatprep.mubr.f32.mxu1 %v3103_v28 }
 0x1ee   :  { %v2768_v38 = vpop.f32.mrb[54].mxu0 }
 0x1ef   :  { %v3105_v43 = vmax.f32 %v2768_v38, 0.0  ;;  %v405_v45 = vpop.f32.mrb[55].mxu0 }
 0x1f1   :  { %1867 = vmatmul.mubr.f32.gmra.mrb[26].mxu1 %v3105_v43 }
 0x1f2   :  { %v2773_v46 = vpop.f32.mrb[56].mxu0 }
 0x1f3   :  { %v3104_v50 = vmax.f32 %v2773_v46, 0.0  ;;  %v410_v53 = vpop.f32.mrb[57].mxu0 }
 0x1f5   :  { %1869 = vmatprep.mubr.f32.mxu1 %v3104_v50 }
 0x1f6   :  { %v2778_v62 = vpop.f32.mrb[58].mxu0 }
 0x1f7   :  { %v3108_v7 = vmax.f32 %v2778_v62, 0.0  ;;  %v415_v20 = vpop.f32.mrb[59].mxu0 }
 0x1f8   :  { %v1005_v20 = vld [vmem:[#allocation10] sm:$0xff] }
 0x1f9   :  { %1870 = vmatmul.mubr.f32.gmra.mrb[28].mxu1 %v3108_v7  ;;  %v2227_v15 = vpack.c.bf16 %v1006_v4, %v1005_v20 }
 0x1fa   :  { %v2783_v33 = vpop.f32.mrb[60].mxu0 }
 0x1fb   :  { %v3114_v45 = vmax.f32 %v2783_v33, 0.0  ;;  %v420_v28 = vpop.f32.mrb[61].mxu0  ;;  %2228 = vmatprep.subr.bf16.mxu1 %v2227_v15 }
 0x1fd   :  { %1872 = vmatprep.mubr.f32.mxu1 %v3114_v45  ;;  %v1009_v45 = vld [vmem:[#allocation10 + $0x20] sm:$0xff] }
 0x1fe   :  { %v2788_v53 = vpop.f32.mrb[62].mxu0 }
 0x1ff   :  { %v3117_v50 = vmax.f32 %v2788_v53, 0.0  ;;  %v425_v43 = vpop.f32.mrb[63].mxu0 }
 0x200   :  { %v2235_v43 = vpack.c.bf16 %v1010_v32, %v1009_v45 }
 0x201   :  { %1873 = vmatmul.mubr.f32.gmra.mrb[30].mxu1 %v3117_v50  ;;  %v1011_v50 = vld [vmem:[#allocation10 + $0x30] sm:$0xff] }
 0x202   :  { %v2239_v14 = vpack.c.bf16 %v1012_v22, %v1011_v50 }
 0x25c   :  { %v1829_v7 = vpop.f32.mrb[0].mxu1 }
 0x25d   :  { %v557_v37 = vpop.f32.mrb[1].mxu1  ;;  %v717_v40 = vmax.f32 %v1829_v7, 0.0  ;;  %v1014_v7 = vld [vmem:[#allocation10 + $0x48] sm:$0xff] }
 0x25e   :  { %v716_v28 = vmax.f32 %v557_v37, 0.0  ;;  %v1013_v37 = vld [vmem:[#allocation10 + $0x40] sm:$0xff] }
 0x25f   :  { %v2243_v49 = vpack.c.bf16 %v1014_v7, %v1013_v37 }
 0x260   :  { %1907 = vmatprep.mubr.f32.mxu1 %v716_v28 }
 0x261   :  { %1908 = vmatmul.mubr.f32.vlgmr.msra.gmra.mrb[32].mxu1 %v717_v40 }
 0x262   :  { %2230 = vmatpush3.bf16.msra.mxu1 %v2227_v15  ;;  %v1016_v15 = vld [vmem:[#allocation10 + $0x58] sm:$0xff] }
 0x263   :  { %2232 = vmatprep.subr.bf16.mxu1 %v2231_v27 }
 0x264   :  { %v1832_v19 = vpop.f32.mrb[2].mxu1 }
 0x265   :  { %v567_v9 = vpop.f32.mrb[3].mxu1  ;;  %v719_v20 = vmax.f32 %v1832_v19, 0.0  ;;  %v1017_v19 = vld [vmem:[#allocation10 + $0x60] sm:$0xff] }
 0x266   :  { %v718_v4 = vmax.f32 %v567_v9, 0.0  ;;  %2234 = vmatpush3.bf16.msra.mxu1 %v2231_v27  ;;  %v2247_v9 = vpack.c.bf16 %v1016_v15, %v1015_v59  ;;  %v1018_v27 = vld [vmem:[#allocation10 + $0x68] sm:$0xff] }
 0x267   :  { %2236 = vmatprep.subr.bf16.mxu1 %v2235_v43  ;;  %v2251_v22 = vpack.c.bf16 %v1018_v27, %v1017_v19 }
 0x268   :  { %1910 = vmatprep.mubr.f32.mxu1 %v718_v4 }
 0x269   :  { %1911 = vmatmul.mubr.f32.gmra.mrb[34].mxu1 %v719_v20 }
 0x26a   :  { %2238 = vmatpush3.bf16.msra.mxu1 %v2235_v43 }
 0x26b   :  { %2240 = vmatprep.subr.bf16.mxu1 %v2239_v14 }
 0x26c   :  { %v1835_v40 = vpop.f32.mrb[4].mxu1 }
 0x26d   :  { %v577_v32 = vpop.f32.mrb[5].mxu1  ;;  %v721_v28 = vmax.f32 %v1835_v40, 0.0 }
 0x26e   :  { %v720_v45 = vmax.f32 %v577_v32, 0.0  ;;  %2242 = vmatpush3.bf16.msra.mxu1 %v2239_v14 }
 0x26f   :  { %2244 = vmatprep.subr.bf16.mxu1 %v2243_v49 }
 0x270   :  { %1913 = vmatprep.mubr.f32.mxu1 %v720_v45 }
 0x271   :  { %1914 = vmatmul.mubr.f32.gmra.mrb[36].mxu1 %v721_v28 }
 0x272   :  { %2246 = vmatpush3.bf16.msra.mxu1 %v2243_v49 }
 0x273   :  { %2248 = vmatprep.subr.bf16.mxu1 %v2247_v9 }
 0x274   :  { %v1838_v50 = vpop.f32.mrb[6].mxu1 }
 0x275   :  { %v587_v43 = vpop.f32.mrb[7].mxu1  ;;  %v723_v20 = vmax.f32 %v1838_v50, 0.0 }
 0x276   :  { %v722_v4 = vmax.f32 %v587_v43, 0.0  ;;  %2250 = vmatpush3.bf16.msra.mxu1 %v2247_v9 }
 0x277   :  { %2252 = vmatprep.subr.bf16.mxu1 %v2251_v22 }
 0x278   :  { %1916 = vmatprep.mubr.f32.mxu1 %v722_v4 }
 0x279   :  { %1917 = vmatmul.mubr.f32.gmra.mrb[38].mxu1 %v723_v20 }
 0x27a   :  { %2254 = vmatpush3.bf16.msra.mxu1 %v2251_v22 }
 0x27c   :  { %v1841_v14 = vpop.f32.mrb[8].mxu1 }
 0x27d   :  { %v597_v37 = vpop.f32.mrb[9].mxu1  ;;  %v725_v40 = vmax.f32 %v1841_v14, 0.0 }
 0x27e   :  { %v724_v7 = vmax.f32 %v597_v37, 0.0 }
 0x280   :  { %1919 = vmatprep.mubr.f32.mxu1 %v724_v7 }
 0x281   :  { %1920 = vmatmul.mubr.f32.gmra.mrb[40].mxu1 %v725_v40 }
 0x284   :  { %v1844_v59 = vpop.f32.mrb[10].mxu1 }
 0x285   :  { %v607_v15 = vpop.f32.mrb[11].mxu1  ;;  %v727_v32 = vmax.f32 %v1844_v59, 0.0 }
 0x286   :  { %v726_v49 = vmax.f32 %v607_v15, 0.0 }
 0x288   :  { %1922 = vmatprep.mubr.f32.mxu1 %v726_v49 }
 0x289   :  { %1923 = vmatmul.mubr.f32.gmra.mrb[42].mxu1 %v727_v32 }
 0x28c   :  { %v1847_v45 = vpop.f32.mrb[12].mxu1 }
 0x28d   :  { %v617_v28 = vpop.f32.mrb[13].mxu1  ;;  %v729_v19 = vmax.f32 %v1847_v45, 0.0 }
 0x28e   :  { %v728_v9 = vmax.f32 %v617_v28, 0.0 }
 0x290   :  { %1925 = vmatprep.mubr.f32.mxu1 %v728_v9 }
 0x291   :  { %1926 = vmatmul.mubr.f32.gmra.mrb[44].mxu1 %v729_v19  ;;  %v1019_v19 = vld [vmem:[#allocation10 + $0x70] sm:$0xff] }
 0x294   :  { %v1850_v27 = vpop.f32.mrb[14].mxu1 }
 0x295   :  { %v627_v22 = vpop.f32.mrb[15].mxu1  ;;  %v731_v43 = vmax.f32 %v1850_v27, 0.0  ;;  %v1020_v27 = vld [vmem:[#allocation10 + $0x78] sm:$0xff] }
 0x296   :  { %v730_v50 = vmax.f32 %v627_v22, 0.0 }
 0x298   :  { %1928 = vmatprep.mubr.f32.mxu1 %v730_v50  ;;  %v2255_v50 = vpack.c.bf16 %v1020_v27, %v1019_v19 }
 0x299   :  { %1929 = vmatmul.mubr.f32.gmra.mrb[46].mxu1 %v731_v43 }
 0x29a   :  { %2256 = vmatprep.subr.bf16.mxu1 %v2255_v50 }
 0x29b   :  { %2258 = vmatpush3.bf16.msra.mxu1 %v2255_v50 }
 0x29c   :  { %v1853_v4 = vpop.f32.mrb[16].mxu1 }
 0x29d   :  { %v637_v20 = vpop.f32.mrb[17].mxu1  ;;  %v733_v37 = vmax.f32 %v1853_v4, 0.0 }
 0x29e   :  { %v732_v14 = vmax.f32 %v637_v20, 0.0 }
 0x2a0   :  { %1931 = vmatprep.mubr.f32.mxu1 %v732_v14 }
 0x2a1   :  { %1932 = vmatmul.mubr.f32.gmra.mrb[48].mxu1 %v733_v37 }
 0x2a4   :  { %v1856_v7 = vpop.f32.mrb[18].mxu1 }
 0x2a5   :  { %v647_v40 = vpop.f32.mrb[19].mxu1  ;;  %v735_v15 = vmax.f32 %v1856_v7, 0.0 }
 0x2a6   :  { %v734_v59 = vmax.f32 %v647_v40, 0.0 }
 0x2a8   :  { %1934 = vmatprep.mubr.f32.mxu1 %v734_v59 }
 0x2a9   :  { %1935 = vmatmul.mubr.f32.gmra.mrb[50].mxu1 %v735_v15 }
 0x2ac   :  { %v1859_v49 = vpop.f32.mrb[20].mxu1 }
 0x2ad   :  { %v657_v32 = vpop.f32.mrb[21].mxu1  ;;  %v737_v28 = vmax.f32 %v1859_v49, 0.0 }
 0x2ae   :  { %v736_v45 = vmax.f32 %v657_v32, 0.0 }
 0x2b0   :  { %1937 = vmatprep.mubr.f32.mxu1 %v736_v45 }
 0x2b1   :  { %1938 = vmatmul.mubr.f32.gmra.mrb[52].mxu1 %v737_v28 }
 0x2b4   :  { %v1862_v9 = vpop.f32.mrb[22].mxu1 }
 0x2b5   :  { %v667_v22 = vpop.f32.mrb[23].mxu1  ;;  %v739_v4 = vmax.f32 %v1862_v9, 0.0 }
 0x2b6   :  { %v738_v43 = vmax.f32 %v667_v22, 0.0 }
 0x2b8   :  { %1940 = vmatprep.mubr.f32.mxu1 %v738_v43  ;;  %v1021_v43 = vld [vmem:[#allocation11] sm:$0xff] }
 0x2b9   :  { %1941 = vmatmul.mubr.f32.gmra.mrb[54].mxu1 %v739_v4  ;;  %v1022_v4 = vld [vmem:[#allocation11 + $0x8] sm:$0xff] }
 0x2bc   :  { %v1865_v20 = vpop.f32.mrb[24].mxu1 }
 0x2bd   :  { %v677_v14 = vpop.f32.mrb[25].mxu1  ;;  %v741_v7 = vmax.f32 %v1865_v20, 0.0  ;;  %v1023_v20 = vld [vmem:[#allocation11 + $0x10] sm:$0xff] }
 0x2be   :  { %v740_v37 = vmax.f32 %v677_v14, 0.0 }
 0x2c0   :  { %1943 = vmatprep.mubr.f32.mxu1 %v740_v37  ;;  %v2259_v37 = vpack.c.bf16 %v1022_v4, %v1021_v43  ;;  %v1030_v43 = vld [vmem:[#allocation11 + $0x48] sm:$0xff] }
 0x2c1   :  { %1944 = vmatmul.mubr.f32.gmra.mrb[56].mxu1 %v741_v7  ;;  %v1024_v7 = vld [vmem:[#allocation11 + $0x18] sm:$0xff] }
 0x2c2   :  { %2260 = vmatprep.subr.bf16.mxu0 %v2259_v37  ;;  %2291 = vmatprep.subr.bf16.mxu1 %v2259_v37 }
 0x2c3   :  { %2262 = vmatpush3.bf16.msra.mxu0 %v2259_v37 }
 0x2c4   :  { %v1868_v40 = vpop.f32.mrb[26].mxu1 }
 0x2c5   :  { %v687_v59 = vpop.f32.mrb[27].mxu1  ;;  %v743_v49 = vmax.f32 %v1868_v40, 0.0 }
 0x2c6   :  { %v742_v15 = vmax.f32 %v687_v59, 0.0 }
 0x2c8   :  { %1946 = vmatprep.mubr.f32.mxu1 %v742_v15  ;;  %v2263_v15 = vpack.c.bf16 %v1024_v7, %v1023_v20  ;;  %v1031_v7 = vld [vmem:[#allocation11 + $0x50] sm:$0xff] }
 0x2c9   :  { %1947 = vmatmul.mubr.f32.gmra.mrb[58].mxu1 %v743_v49  ;;  %v1025_v49 = vld [vmem:[#allocation11 + $0x20] sm:$0xff] }
 0x2ca   :  { %2264 = vmatprep.subr.bf16.mxu0 %v2263_v15 }
 0x2cb   :  { %2266 = vmatpush3.bf16.msra.mxu0 %v2263_v15 }
 0x2cc   :  { %v1871_v32 = vpop.f32.mrb[28].mxu1 }
 0x2cd   :  { %v697_v45 = vpop.f32.mrb[29].mxu1  ;;  %v745_v9 = vmax.f32 %v1871_v32, 0.0  ;;  %v1026_v32 = vld [vmem:[#allocation11 + $0x28] sm:$0xff] }
 0x2ce   :  { %v744_v28 = vmax.f32 %v697_v45, 0.0 }
 0x2d0   :  { %1949 = vmatprep.mubr.f32.mxu1 %v744_v28 }
 0x2d1   :  { %1950 = vmatmul.mubr.f32.gmra.mrb[60].mxu1 %v745_v9  ;;  %v2267_v9 = vpack.c.bf16 %v1026_v32, %v1025_v49  ;;  %v1034_v49 = vld [vmem:[#allocation11 + $0x68] sm:$0xff] }
 0x2d3   :  { %2268 = vmatprep.subr.bf16.mxu0 %v2267_v9 }
 0x2d4   :  { %v1874_v19 = vpop.f32.mrb[30].mxu1  ;;  %2270 = vmatpush3.bf16.msra.mxu0 %v2267_v9 }
 0x2d5   :  { %v707_v27 = vpop.f32.mrb[31].mxu1  ;;  %v747_v50 = vmax.f32 %v1874_v19, 0.0 }
 0x2d6   :  { %v746_v22 = vmax.f32 %v707_v27, 0.0 }
 0x2d8   :  { %1952 = vmatprep.mubr.f32.mxu1 %v746_v22 }
 0x2d9   :  { %1953 = vmatmul.mubr.f32.gmra.mrb[62].mxu1 %v747_v50  ;;  %v1029_v50 = vld [vmem:[#allocation11 + $0x40] sm:$0xff] }
 0x334   :  { %v1909_v14 = vpop.f32.mrb[32].mxu1 }
 0x335   :  { %v2795_v40 = vadd.f32 %v1909_v14, %v428_v18  ;;  %v814_v59 = vpop.f32.mrb[33].mxu1  ;;  %v1028_v18 = vld [vmem:[#allocation11 + $0x38] sm:$0xff]  ;;  %v2275_v14 = vpack.c.bf16 %v1030_v43, %v1029_v50 }
 0x336   :  { %v2799_v45 = vadd.f32 %v814_v59, %v427_v13  ;;  %v2271_v13 = vpack.c.bf16 %v1028_v18, %v1027_v17 }
 0x337   :  { %v974_v19 = vmax.f32 %v2795_v40, 0.0 }
 0x338   :  { %v973_v28 = vmax.f32 %v2799_v45, 0.0  ;;  %2272 = vmatprep.subr.bf16.mxu0 %v2271_v13 }
 0x339   :  { %2274 = vmatpush3.bf16.msra.mxu0 %v2271_v13 }
 0x33a   :  { %1987 = vmatprep.mubr.f32.mxu1 %v973_v28  ;;  %2276 = vmatprep.subr.bf16.mxu0 %v2275_v14 }
 0x33b   :  { %1988 = vmatmul.mubr.f32.vlgmr.msra.gmra.mrb[64].mxu1 %v974_v19 }
 0x33c   :  { %v1912_v11 = vpop.f32.mrb[34].mxu1  ;;  %2299 = vmatpush3.bf16.msra.mxu1 %v2259_v37 }
 0x33d   :  { %v2809_v27 = vadd.f32 %v1912_v11, %v430_v30  ;;  %v824_v22 = vpop.f32.mrb[35].mxu1  ;;  %2292 = vmatprep.subr.bf16.mxu1 %v2263_v15  ;;  %2278 = vmatpush3.bf16.msra.mxu0 %v2275_v14 }
 0x33e   :  { %v2813_v4 = vadd.f32 %v824_v22, %v429_v24  ;;  %v2279_v24 = vpack.c.bf16 %v1032_v29, %v1031_v7 }
 0x33f   :  { %v976_v37 = vmax.f32 %v2809_v27, 0.0 }
 0x340   :  { %v975_v20 = vmax.f32 %v2813_v4, 0.0  ;;  %2300 = vmatpush3.bf16.msra.mxu1 %v2263_v15  ;;  %v1033_v15 = vld [vmem:[#allocation11 + $0x60] sm:$0xff]  ;;  %2280 = vmatprep.subr.bf16.mxu0 %v2279_v24 }
 0x341   :  { %2293 = vmatprep.subr.bf16.mxu1 %v2267_v9  ;;  %v2283_v18 = vpack.c.bf16 %v1034_v49, %v1033_v15  ;;  %2282 = vmatpush3.bf16.msra.mxu0 %v2279_v24 }
 0x342   :  { %1990 = vmatprep.mubr.f32.mxu1 %v975_v20 }
 0x343   :  { %1991 = vmatmul.mubr.f32.gmra.mrb[66].mxu1 %v976_v37  ;;  %2284 = vmatprep.subr.bf16.mxu0 %v2283_v18 }
 0x344   :  { %v1915_v23 = vpop.f32.mrb[36].mxu1  ;;  %2301 = vmatpush3.bf16.msra.mxu1 %v2267_v9 }
 0x345   :  { %v2823_v30 = vadd.f32 %v1915_v23, %v432_v42  ;;  %v834_v59 = vpop.f32.mrb[37].mxu1  ;;  %2294 = vmatprep.subr.bf16.mxu1 %v2271_v13  ;;  %2286 = vmatpush3.bf16.msra.mxu0 %v2283_v18 }
 0x346   :  { %v2827_v32 = vadd.f32 %v834_v59, %v431_v36 }
 0x347   :  { %v978_v9 = vmax.f32 %v2823_v30, 0.0 }
 0x348   :  { %v977_v17 = vmax.f32 %v2827_v32, 0.0  ;;  %2302 = vmatpush3.bf16.msra.mxu1 %v2271_v13 }
 0x349   :  { %2295 = vmatprep.subr.bf16.mxu1 %v2275_v14 }
 0x34a   :  { %1993 = vmatprep.mubr.f32.mxu1 %v977_v17 }
 0x34b   :  { %1994 = vmatmul.mubr.f32.gmra.mrb[68].mxu1 %v978_v9 }
 0x34c   :  { %v1918_v41 = vpop.f32.mrb[38].mxu1  ;;  %2303 = vmatpush3.bf16.msra.mxu1 %v2275_v14 }
 0x34d   :  { %v2837_v35 = vadd.f32 %v1918_v41, %v434_v52  ;;  %v844_v36 = vpop.f32.mrb[39].mxu1  ;;  %2296 = vmatprep.subr.bf16.mxu1 %v2279_v24 }
 0x34e   :  { %v2841_v42 = vadd.f32 %v844_v36, %v433_v48 }
 0x34f   :  { %v980_v13 = vmax.f32 %v2837_v35, 0.0 }
 0x350   :  { %v979_v11 = vmax.f32 %v2841_v42, 0.0  ;;  %2304 = vmatpush3.bf16.msra.mxu1 %v2279_v24 }
 0x351   :  { %2297 = vmatprep.subr.bf16.mxu1 %v2283_v18 }
 0x352   :  { %1996 = vmatprep.mubr.f32.mxu1 %v979_v11 }
 0x353   :  { %1997 = vmatmul.mubr.f32.gmra.mrb[70].mxu1 %v980_v13 }
 0x354   :  { %v1921_v51 = vpop.f32.mrb[40].mxu1  ;;  %2305 = vmatpush3.bf16.msra.mxu1 %v2283_v18 }
 0x355   :  { %v2851_v47 = vadd.f32 %v1921_v51, %v436_v58  ;;  %v854_v48 = vpop.f32.mrb[41].mxu1 }
 0x356   :  { %v2855_v52 = vadd.f32 %v854_v48, %v435_v55 }
 0x357   :  { %v982_v50 = vmax.f32 %v2851_v47, 0.0 }
 0x358   :  { %v981_v22 = vmax.f32 %v2855_v52, 0.0 }
 0x35a   :  { %1999 = vmatprep.mubr.f32.mxu1 %v981_v22 }
 0x35b   :  { %2000 = vmatmul.mubr.f32.gmra.mrb[72].mxu1 %v982_v50 }
 0x35c   :  { %v1924_v43 = vpop.f32.mrb[42].mxu1 }
 0x35d   :  { %v2865_v57 = vadd.f32 %v1924_v43, %v438_v0  ;;  %v864_v58 = vpop.f32.mrb[43].mxu1 }
 0x35e   :  { %v2869_v54 = vadd.f32 %v864_v58, %v437_v61 }
 0x35f   :  { %v984_v14 = vmax.f32 %v2865_v57, 0.0 }
 0x360   :  { %v983_v55 = vmax.f32 %v2869_v54, 0.0 }
 0x362   :  { %2002 = vmatprep.mubr.f32.mxu1 %v983_v55 }
 0x363   :  { %2003 = vmatmul.mubr.f32.gmra.mrb[74].mxu1 %v984_v14 }
 0x364   :  { %v1927_v7 = vpop.f32.mrb[44].mxu1 }
 0x365   :  { %v2879_v63 = vadd.f32 %v1927_v7, %v440_v6  ;;  %v874_v0 = vpop.f32.mrb[45].mxu1 }
 0x366   :  { %v2883_v60 = vadd.f32 %v874_v0, %v439_v3 }
 0x367   :  { %v986_v29 = vmax.f32 %v2879_v63, 0.0 }
 0x368   :  { %v985_v61 = vmax.f32 %v2883_v60, 0.0 }
 0x36a   :  { %2005 = vmatprep.mubr.f32.mxu1 %v985_v61 }
 0x36b   :  { %2006 = vmatmul.mubr.f32.gmra.mrb[76].mxu1 %v986_v29 }
 0x36c   :  { %v1930_v23 = vpop.f32.mrb[46].mxu1 }
 0x36d   :  { %v2893_v6 = vadd.f32 %v1930_v23, %v3137_v5  ;;  %v884_v24 = vpop.f32.mrb[47].mxu1 }
 0x36e   :  { %v2897_v3 = vadd.f32 %v884_v24, %v3138_v2 }
 0x36f   :  { %v988_v15 = vmax.f32 %v2893_v6, 0.0 }
 0x370   :  { %v987_v59 = vmax.f32 %v2897_v3, 0.0 }
 0x372   :  { %2008 = vmatprep.mubr.f32.mxu1 %v987_v59 }
 0x373   :  { %2009 = vmatmul.mubr.f32.gmra.mrb[78].mxu1 %v988_v15 }
 0x374   :  { %v1933_v49 = vpop.f32.mrb[48].mxu1 }
 0x375   :  { %v2907_v18 = vadd.f32 %v1933_v49, %v3139_v12  ;;  %v894_v41 = vpop.f32.mrb[49].mxu1 }
 0x376   :  { %v2911_v36 = vadd.f32 %v894_v41, %v3140_v8 }
 0x377   :  { %v3136_v48 = vmax.f32 %v2907_v18, 0.0  ;;  %v3155_v60 = vmax.f32 %v2907_v18, 0.0 }
 0x378   :  { %v3135_v51 = vmax.f32 %v2911_v36, 0.0 }
 0x37a   :  { %2011 = vmatprep.mubr.f32.mxu1 %v3135_v51 }
 0x37b   :  { %2012 = vmatmul.mubr.f32.gmra.mrb[80].mxu1 %v3136_v48 }
 0x37c   :  { %v1936_v43 = vpop.f32.mrb[50].mxu1 }
 0x37d   :  { %v2921_v58 = vadd.f32 %v1936_v43, %v3141_v21  ;;  %v904_v7 = vpop.f32.mrb[51].mxu1  ;;  %v1035_v21 = vld [vmem:[#allocation11 + $0x70] sm:$0xff] }
 0x37e   :  { %v2925_v0 = vadd.f32 %v904_v7, %v3142_v16  ;;  %v3145_v7 = vmax.f32 %v2748_v56, 0.0 }
 0x37f   :  { %v3132_v5 = vmax.f32 %v2921_v58, 0.0  ;;  %v3157_v3 = vmax.f32 %v2921_v58, 0.0 }
 0x380   :  { %v3131_v23 = vmax.f32 %v2925_v0, 0.0 }
 0x382   :  { %2014 = vmatprep.mubr.f32.mxu1 %v3131_v23 }
 0x383   :  { %2015 = vmatmul.mubr.f32.gmra.mrb[82].mxu1 %v3132_v5 }
 0x384   :  { %v1939_v24 = vpop.f32.mrb[52].mxu1 }
 0x385   :  { %v2935_v2 = vadd.f32 %v1939_v24, %v3143_v31  ;;  %v914_v49 = vpop.f32.mrb[53].mxu1  ;;  %v2287_v24 = vpack.c.bf16 %v1036_v39, %v1035_v21  ;;  %v3146_v31 = vmax.f32 %v2743_v44, 0.0  ;;  %v3148_v39 = vmax.f32 %v2753_v1, 0.0 }
 0x386   :  { %v2939_v12 = vadd.f32 %v914_v49, %v3144_v26  ;;  %v3150_v1 = vmax.f32 %v2763_v25, 0.0  ;;  %v3152_v25 = vmax.f32 %v2773_v46, 0.0  ;;  %v3154_v46 = vmax.f32 %v2783_v33, 0.0 }
 0x387   :  { %v3130_v8 = vmax.f32 %v2935_v2, 0.0  ;;  %2288 = vmatprep.subr.bf16.mxu0 %v2287_v24  ;;  %2298 = vmatprep.subr.bf16.mxu1 %v2287_v24 }
 0x388   :  { %v3121_v41 = vmax.f32 %v2939_v12, 0.0  ;;  %2290 = vmatpush3.bf16.msra.mxu0 %v2287_v24  ;;  %2306 = vmatpush3.bf16.msra.mxu1 %v2287_v24 }
 0x38a   :  { %2017 = vmatprep.mubr.f32.mxu1 %v3121_v41 }
 0x38b   :  { %2018 = vmatmul.mubr.f32.gmra.mrb[84].mxu1 %v3130_v8 }
 0x38c   :  { %v1942_v43 = vpop.f32.mrb[54].mxu1 }
 0x38d   :  { %v2949_v16 = vadd.f32 %v1942_v43, %v3145_v7  ;;  %v924_v34 = vpop.f32.mrb[55].mxu1  ;;  %v3147_v43 = vmax.f32 %v2758_v10, 0.0  ;;  %v3149_v10 = vmax.f32 %v2768_v38, 0.0  ;;  %v3151_v38 = vmax.f32 %v2778_v62, 0.0 }
 0x38e   :  { %v2953_v49 = vadd.f32 %v924_v34, %v3146_v31  ;;  %v3153_v62 = vmax.f32 %v2788_v53, 0.0 }
 0x38f   :  { %v3129_v41 = vmax.f32 %v2949_v16, 0.0 }
 0x390   :  { %v3122_v26 = vmax.f32 %v2953_v49, 0.0 }
 0x392   :  { %2020 = vmatprep.mubr.f32.mxu1 %v3122_v26 }
 0x393   :  { %2021 = vmatmul.mubr.f32.gmra.mrb[86].mxu1 %v3129_v41 }
 0x394   :  { %v1945_v56 = vpop.f32.mrb[56].mxu1 }
 0x395   :  { %v2963_v44 = vadd.f32 %v1945_v56, %v3147_v43  ;;  %v934_v21 = vpop.f32.mrb[57].mxu1 }
 0x396   :  { %v2967_v7 = vadd.f32 %v934_v21, %v3148_v39 }
 0x397   :  { %v3124_v24 = vmax.f32 %v2963_v44, 0.0 }
 0x398   :  { %v3123_v34 = vmax.f32 %v2967_v7, 0.0 }
 0x39a   :  { %2023 = vmatprep.mubr.f32.mxu1 %v3123_v34 }
 0x39b   :  { %2024 = vmatmul.mubr.f32.gmra.mrb[88].mxu1 %v3124_v24 }
 0x39c   :  { %v1948_v31 = vpop.f32.mrb[58].mxu1 }
 0x39d   :  { %v2977_v56 = vadd.f32 %v1948_v31, %v3149_v10  ;;  %v944_v43 = vpop.f32.mrb[59].mxu1 }
 0x39e   :  { %v2981_v21 = vadd.f32 %v944_v43, %v3150_v1 }
 0x39f   :  { %v3126_v26 = vmax.f32 %v2977_v56, 0.0 }
 0x3a0   :  { %v3125_v39 = vmax.f32 %v2981_v21, 0.0 }
 0x3a2   :  { %2026 = vmatprep.mubr.f32.mxu1 %v3125_v39 }
 0x3a3   :  { %2027 = vmatmul.mubr.f32.gmra.mrb[90].mxu1 %v3126_v26 }
 0x3a4   :  { %v1951_v34 = vpop.f32.mrb[60].mxu1 }
 0x3a5   :  { %v2991_v31 = vadd.f32 %v1951_v34, %v3151_v38  ;;  %v954_v10 = vpop.f32.mrb[61].mxu1 }
 0x3a6   :  { %v2995_v43 = vadd.f32 %v954_v10, %v3152_v25 }
 0x3a7   :  { %v3128_v24 = vmax.f32 %v2991_v31, 0.0 }
 0x3a8   :  { %v3127_v1 = vmax.f32 %v2995_v43, 0.0 }
 0x3aa   :  { %2029 = vmatprep.mubr.f32.mxu1 %v3127_v1 }
 0x3ab   :  { %2030 = vmatmul.mubr.f32.gmra.mrb[92].mxu1 %v3128_v24 }
 0x3ac   :  { %v1954_v39 = vpop.f32.mrb[62].mxu1 }
 0x3ad   :  { %v3005_v34 = vadd.f32 %v1954_v39, %v3153_v62  ;;  %v964_v38 = vpop.f32.mrb[63].mxu1 }
 0x3ae   :  { %v3009_v10 = vadd.f32 %v964_v38, %v3154_v46 }
 0x3af   :  { %v3134_v26 = vmax.f32 %v3005_v34, 0.0 }
 0x3b0   :  { %v3133_v25 = vmax.f32 %v3009_v10, 0.0 }
 0x3b2   :  { %2032 = vmatprep.mubr.f32.mxu1 %v3133_v25 }
 0x3b3   :  { %2033 = vmatmul.mubr.f32.gmra.mrb[94].mxu1 %v3134_v26 }
 0x40e   :  { %v1989_v1 = vpop.f32.mrb[64].mxu1 }
 0x40f   :  { %v1103_v24 = vpop.f32.mrb[65].mxu1  ;;  %v1263_v39 = vmax.f32 %v1989_v1, 0.0 }
 0x410   :  { %v1262_v53 = vmax.f32 %v1103_v24, 0.0 }
 0x412   :  { %2067 = vmatprep.mubr.f32.mxu0 %v1262_v53 }
 0x413   :  { %2068 = vmatmul.mubr.f32.vlgmr.msra.gmra.mrb[64].mxu0 %v1263_v39 }
 0x416   :  { %v1992_v62 = vpop.f32.mrb[66].mxu1 }
 0x417   :  { %v1113_v33 = vpop.f32.mrb[67].mxu1  ;;  %v1265_v46 = vmax.f32 %v1992_v62, 0.0 }
 0x418   :  { %v1264_v38 = vmax.f32 %v1113_v33, 0.0 }
 0x41a   :  { %2070 = vmatprep.mubr.f32.mxu0 %v1264_v38 }
 0x41b   :  { %2071 = vmatmul.mubr.f32.gmra.mrb[66].mxu0 %v1265_v46 }
 0x41e   :  { %v1995_v41 = vpop.f32.mrb[68].mxu1 }
 0x41f   :  { %v1123_v8 = vpop.f32.mrb[69].mxu1  ;;  %v1267_v5 = vmax.f32 %v1995_v41, 0.0 }
 0x420   :  { %v1266_v23 = vmax.f32 %v1123_v8, 0.0 }
 0x422   :  { %2073 = vmatprep.mubr.f32.mxu0 %v1266_v23 }
 0x423   :  { %2074 = vmatmul.mubr.f32.gmra.mrb[68].mxu0 %v1267_v5 }
 0x426   :  { %v1998_v25 = vpop.f32.mrb[70].mxu1 }
 0x427   :  { %v1133_v26 = vpop.f32.mrb[71].mxu1  ;;  %v1269_v48 = vmax.f32 %v1998_v25, 0.0 }
 0x428   :  { %v1268_v51 = vmax.f32 %v1133_v26, 0.0 }
 0x42a   :  { %2076 = vmatprep.mubr.f32.mxu0 %v1268_v51 }
 0x42b   :  { %2077 = vmatmul.mubr.f32.gmra.mrb[70].mxu0 %v1269_v48 }
 0x42e   :  { %v2001_v24 = vpop.f32.mrb[72].mxu1 }
 0x42f   :  { %v1143_v1 = vpop.f32.mrb[73].mxu1  ;;  %v1271_v39 = vmax.f32 %v2001_v24, 0.0 }
 0x430   :  { %v1270_v53 = vmax.f32 %v1143_v1, 0.0 }
 0x432   :  { %2079 = vmatprep.mubr.f32.mxu0 %v1270_v53 }
 0x433   :  { %2080 = vmatmul.mubr.f32.gmra.mrb[72].mxu0 %v1271_v39 }
 0x436   :  { %v2004_v62 = vpop.f32.mrb[74].mxu1 }
 0x437   :  { %v1153_v33 = vpop.f32.mrb[75].mxu1  ;;  %v1273_v46 = vmax.f32 %v2004_v62, 0.0 }
 0x438   :  { %v1272_v38 = vmax.f32 %v1153_v33, 0.0 }
 0x43a   :  { %2082 = vmatprep.mubr.f32.mxu0 %v1272_v38 }
 0x43b   :  { %2083 = vmatmul.mubr.f32.gmra.mrb[74].mxu0 %v1273_v46 }
 0x43e   :  { %v2007_v23 = vpop.f32.mrb[76].mxu1 }
 0x43f   :  { %v1163_v5 = vpop.f32.mrb[77].mxu1  ;;  %v1275_v8 = vmax.f32 %v2007_v23, 0.0 }
 0x440   :  { %v1274_v41 = vmax.f32 %v1163_v5, 0.0 }
 0x442   :  { %2085 = vmatprep.mubr.f32.mxu0 %v1274_v41 }
 0x443   :  { %2086 = vmatmul.mubr.f32.gmra.mrb[76].mxu0 %v1275_v8 }
 0x446   :  { %v2010_v51 = vpop.f32.mrb[78].mxu1 }
 0x447   :  { %v1173_v48 = vpop.f32.mrb[79].mxu1  ;;  %v1277_v25 = vmax.f32 %v2010_v51, 0.0 }
 0x448   :  { %v1276_v26 = vmax.f32 %v1173_v48, 0.0 }
 0x44a   :  { %2088 = vmatprep.mubr.f32.mxu0 %v1276_v26 }
 0x44b   :  { %2089 = vmatmul.mubr.f32.gmra.mrb[78].mxu0 %v1277_v25 }
 0x44e   :  { %v2013_v24 = vpop.f32.mrb[80].mxu1 }
 0x44f   :  { %v1183_v1 = vpop.f32.mrb[81].mxu1  ;;  %v1279_v39 = vmax.f32 %v2013_v24, 0.0 }
 0x450   :  { %v1278_v53 = vmax.f32 %v1183_v1, 0.0 }
 0x452   :  { %2091 = vmatprep.mubr.f32.mxu0 %v1278_v53 }
 0x453   :  { %2092 = vmatmul.mubr.f32.gmra.mrb[80].mxu0 %v1279_v39 }
 0x456   :  { %v2016_v62 = vpop.f32.mrb[82].mxu1 }
 0x457   :  { %v1193_v33 = vpop.f32.mrb[83].mxu1  ;;  %v1281_v46 = vmax.f32 %v2016_v62, 0.0 }
 0x458   :  { %v1280_v38 = vmax.f32 %v1193_v33, 0.0 }
 0x45a   :  { %2094 = vmatprep.mubr.f32.mxu0 %v1280_v38 }
 0x45b   :  { %2095 = vmatmul.mubr.f32.gmra.mrb[82].mxu0 %v1281_v46 }
 0x45e   :  { %v2019_v23 = vpop.f32.mrb[84].mxu1 }
 0x45f   :  { %v1203_v5 = vpop.f32.mrb[85].mxu1  ;;  %v1283_v8 = vmax.f32 %v2019_v23, 0.0 }
 0x460   :  { %v1282_v41 = vmax.f32 %v1203_v5, 0.0 }
 0x462   :  { %2097 = vmatprep.mubr.f32.mxu0 %v1282_v41 }
 0x463   :  { %2098 = vmatmul.mubr.f32.gmra.mrb[84].mxu0 %v1283_v8 }
 0x466   :  { %v2022_v51 = vpop.f32.mrb[86].mxu1 }
 0x467   :  { %v1213_v48 = vpop.f32.mrb[87].mxu1  ;;  %v1285_v25 = vmax.f32 %v2022_v51, 0.0 }
 0x468   :  { %v1284_v26 = vmax.f32 %v1213_v48, 0.0 }
 0x46a   :  { %2100 = vmatprep.mubr.f32.mxu0 %v1284_v26 }
 0x46b   :  { %2101 = vmatmul.mubr.f32.gmra.mrb[86].mxu0 %v1285_v25 }
 0x46e   :  { %v2025_v24 = vpop.f32.mrb[88].mxu1 }
 0x46f   :  { %v1223_v1 = vpop.f32.mrb[89].mxu1  ;;  %v1287_v39 = vmax.f32 %v2025_v24, 0.0 }
 0x470   :  { %v1286_v53 = vmax.f32 %v1223_v1, 0.0 }
 0x472   :  { %2103 = vmatprep.mubr.f32.mxu1 %v1286_v53 }
 0x473   :  { %2104 = vmatmul.mubr.f32.vlgmr.msra.gmra.mrb[96].mxu1 %v1287_v39 }
 0x476   :  { %v2028_v62 = vpop.f32.mrb[90].mxu1 }
 0x477   :  { %v1233_v33 = vpop.f32.mrb[91].mxu1  ;;  %v1289_v46 = vmax.f32 %v2028_v62, 0.0 }
 0x478   :  { %v1288_v38 = vmax.f32 %v1233_v33, 0.0 }
 0x47a   :  { %2106 = vmatprep.mubr.f32.mxu1 %v1288_v38 }
 0x47b   :  { %2107 = vmatmul.mubr.f32.gmra.mrb[98].mxu1 %v1289_v46 }
 0x47e   :  { %v2031_v23 = vpop.f32.mrb[92].mxu1 }
 0x47f   :  { %v1243_v5 = vpop.f32.mrb[93].mxu1  ;;  %v1291_v8 = vmax.f32 %v2031_v23, 0.0 }
 0x480   :  { %v1290_v41 = vmax.f32 %v1243_v5, 0.0 }
 0x482   :  { %2109 = vmatprep.mubr.f32.mxu1 %v1290_v41 }
 0x483   :  { %2110 = vmatmul.mubr.f32.gmra.mrb[100].mxu1 %v1291_v8 }
 0x486   :  { %v2034_v51 = vpop.f32.mrb[94].mxu1 }
 0x487   :  { %v1253_v48 = vpop.f32.mrb[95].mxu1  ;;  %v1293_v25 = vmax.f32 %v2034_v51, 0.0 }
 0x488   :  { %v1292_v26 = vmax.f32 %v1253_v48, 0.0 }
 0x48a   :  { %2112 = vmatprep.mubr.f32.mxu1 %v1292_v26 }
 0x48b   :  { %2113 = vmatmul.mubr.f32.gmra.mrb[102].mxu1 %v1293_v25 }
 0x4e6   :  { %v2069_v24 = vpop.f32.mrb[64].mxu0 }
 0x4e7   :  { %v1366_v1 = vadd.f32 %v2069_v24, %v974_v19  ;;  %v1360_v53 = vpop.f32.mrb[65].mxu0 }
 0x4e8   :  { %v1361_v39 = vadd.f32 %v1360_v53, %v973_v28 }
 0x4e9   :  { %v1520_v62 = vmax.f32 %v1366_v1, 0.0 }
 0x4ea   :  { %v1519_v33 = vmax.f32 %v1361_v39, 0.0 }
 0x4eb   :  { %1552 = vst [vmem:[#allocation13 + $0x8] sm:$0xff] %v1520_v62 }
 0x4ec   :  { %1551 = vst [vmem:[#allocation13] sm:$0xff] %v1519_v33 }
 0x4ee   :  { %v2072_v38 = vpop.f32.mrb[66].mxu0 }
 0x4ef   :  { %v1376_v46 = vadd.f32 %v2072_v38, %v976_v37  ;;  %v1370_v23 = vpop.f32.mrb[67].mxu0 }
 0x4f0   :  { %v1371_v5 = vadd.f32 %v1370_v23, %v975_v20  ;;  %v3156_v23 = vmax.f32 %v2911_v36, 0.0  ;;  %v3159_v36 = vmax.f32 %v2935_v2, 0.0 }
 0x4f1   :  { %v1522_v41 = vmax.f32 %v1376_v46, 0.0 }
 0x4f2   :  { %v1521_v8 = vmax.f32 %v1371_v5, 0.0 }
 0x4f3   :  { %1554 = vst [vmem:[#allocation13 + $0x18] sm:$0xff] %v1522_v41 }
 0x4f4   :  { %1553 = vst [vmem:[#allocation13 + $0x10] sm:$0xff] %v1521_v8 }
 0x4f6   :  { %v2075_v40 = vpop.f32.mrb[68].mxu0 }
 0x4f7   :  { %v1386_v45 = vadd.f32 %v2075_v40, %v978_v9  ;;  %v1380_v28 = vpop.f32.mrb[69].mxu0  ;;  %v3158_v40 = vmax.f32 %v2925_v0, 0.0  ;;  %v3161_v0 = vmax.f32 %v2949_v16, 0.0 }
 0x4f8   :  { %v1381_v19 = vadd.f32 %v1380_v28, %v977_v17 }
 0x4f9   :  { %v1524_v51 = vmax.f32 %v1386_v45, 0.0 }
 0x4fa   :  { %v1523_v48 = vmax.f32 %v1381_v19, 0.0 }
 0x4fb   :  { %1556 = vst [vmem:[#allocation13 + $0x28] sm:$0xff] %v1524_v51 }
 0x4fc   :  { %1555 = vst [vmem:[#allocation13 + $0x20] sm:$0xff] %v1523_v48 }
 0x4fe   :  { %v2078_v27 = vpop.f32.mrb[70].mxu0 }
 0x4ff   :  { %v1396_v4 = vadd.f32 %v2078_v27, %v980_v13  ;;  %v1390_v20 = vpop.f32.mrb[71].mxu0  ;;  %v3160_v27 = vmax.f32 %v2939_v12, 0.0  ;;  %v3163_v12 = vmax.f32 %v2963_v44, 0.0 }
 0x500   :  { %v1391_v37 = vadd.f32 %v1390_v20, %v979_v11 }
 0x501   :  { %v1526_v26 = vmax.f32 %v1396_v4, 0.0 }
 0x502   :  { %v1525_v25 = vmax.f32 %v1391_v37, 0.0 }
 0x503   :  { %1558 = vst [vmem:[#allocation13 + $0x38] sm:$0xff] %v1526_v26 }
 0x504   :  { %1557 = vst [vmem:[#allocation13 + $0x30] sm:$0xff] %v1525_v25 }
 0x506   :  { %v2081_v30 = vpop.f32.mrb[72].mxu0 }
 0x507   :  { %v1406_v32 = vadd.f32 %v2081_v30, %v982_v50  ;;  %v1400_v17 = vpop.f32.mrb[73].mxu0  ;;  %v3162_v30 = vmax.f32 %v2953_v49, 0.0  ;;  %v3165_v49 = vmax.f32 %v2977_v56, 0.0 }
 0x508   :  { %v1401_v9 = vadd.f32 %v1400_v17, %v981_v22 }
 0x509   :  { %v1528_v24 = vmax.f32 %v1406_v32, 0.0 }
 0x50a   :  { %v1527_v1 = vmax.f32 %v1401_v9, 0.0 }
 0x50b   :  { %1560 = vst [vmem:[#allocation13 + $0x48] sm:$0xff] %v1528_v24 }
 0x50c   :  { %1559 = vst [vmem:[#allocation13 + $0x40] sm:$0xff] %v1527_v1 }
 0x50e   :  { %v2084_v35 = vpop.f32.mrb[74].mxu0 }
 0x50f   :  { %v1416_v42 = vadd.f32 %v2084_v35, %v984_v14  ;;  %v1410_v11 = vpop.f32.mrb[75].mxu0  ;;  %v3164_v35 = vmax.f32 %v2967_v7, 0.0  ;;  %v3167_v7 = vmax.f32 %v2991_v31, 0.0 }
 0x510   :  { %v1411_v13 = vadd.f32 %v1410_v11, %v983_v55 }
 0x511   :  { %v1530_v53 = vmax.f32 %v1416_v42, 0.0 }
 0x512   :  { %v1529_v39 = vmax.f32 %v1411_v13, 0.0 }
 0x513   :  { %1562 = vst [vmem:[#allocation13 + $0x58] sm:$0xff] %v1530_v53 }
 0x514   :  { %1561 = vst [vmem:[#allocation13 + $0x50] sm:$0xff] %v1529_v39 }
 0x516   :  { %v2087_v47 = vpop.f32.mrb[76].mxu0 }
 0x517   :  { %v1426_v52 = vadd.f32 %v2087_v47, %v986_v29  ;;  %v1420_v22 = vpop.f32.mrb[77].mxu0  ;;  %v3166_v47 = vmax.f32 %v2981_v21, 0.0  ;;  %v3169_v21 = vmax.f32 %v3005_v34, 0.0 }
 0x518   :  { %v1421_v50 = vadd.f32 %v1420_v22, %v985_v61 }
 0x519   :  { %v1532_v62 = vmax.f32 %v1426_v52, 0.0 }
 0x51a   :  { %v1531_v33 = vmax.f32 %v1421_v50, 0.0 }
 0x51b   :  { %1564 = vst [vmem:[#allocation13 + $0x68] sm:$0xff] %v1532_v62 }
 0x51c   :  { %1563 = vst [vmem:[#allocation13 + $0x60] sm:$0xff] %v1531_v33 }
 0x51e   :  { %v2090_v57 = vpop.f32.mrb[78].mxu0 }
 0x51f   :  { %v1436_v54 = vadd.f32 %v2090_v57, %v988_v15  ;;  %v1430_v55 = vpop.f32.mrb[79].mxu0  ;;  %v3168_v57 = vmax.f32 %v2995_v43, 0.0 }
 0x520   :  { %v1431_v14 = vadd.f32 %v1430_v55, %v987_v59 }
 0x521   :  { %v1534_v38 = vmax.f32 %v1436_v54, 0.0 }
 0x522   :  { %v1533_v46 = vmax.f32 %v1431_v14, 0.0 }
 0x523   :  { %1566 = vst [vmem:[#allocation13 + $0x78] sm:$0xff] %v1534_v38 }
 0x524   :  { %1565 = vst [vmem:[#allocation13 + $0x70] sm:$0xff] %v1533_v46 }
 0x526   :  { %v2093_v63 = vpop.f32.mrb[80].mxu0 }
 0x527   :  { %v1446_v61 = vadd.f32 %v2093_v63, %v3155_v60  ;;  %v1440_v29 = vpop.f32.mrb[81].mxu0  ;;  %v3170_v63 = vmax.f32 %v3009_v10, 0.0 }
 0x528   :  { %v1441_v5 = vadd.f32 %v1440_v29, %v3156_v23 }
 0x529   :  { %v1536_v41 = vmax.f32 %v1446_v61, 0.0 }
 0x52a   :  { %v1535_v8 = vmax.f32 %v1441_v5, 0.0 }
 0x52b   :  { %1568 = vst [vmem:[#allocation13 + $0x88] sm:$0xff] %v1536_v41 }
 0x52c   :  { %1567 = vst [vmem:[#allocation13 + $0x80] sm:$0xff] %v1535_v8 }
 0x52e   :  { %v2096_v6 = vpop.f32.mrb[82].mxu0 }
 0x52f   :  { %v1456_v59 = vadd.f32 %v2096_v6, %v3157_v3  ;;  %v1450_v15 = vpop.f32.mrb[83].mxu0 }
 0x530   :  { %v1451_v45 = vadd.f32 %v1450_v15, %v3158_v40 }
 0x531   :  { %v1538_v28 = vmax.f32 %v1456_v59, 0.0 }
 0x532   :  { %v1537_v19 = vmax.f32 %v1451_v45, 0.0 }
 0x533   :  { %1570 = vst [vmem:[#allocation13 + $0x98] sm:$0xff] %v1538_v28 }
 0x534   :  { %1569 = vst [vmem:[#allocation13 + $0x90] sm:$0xff] %v1537_v19 }
 0x536   :  { %v2099_v18 = vpop.f32.mrb[84].mxu0 }
 0x537   :  { %v1466_v51 = vadd.f32 %v2099_v18, %v3159_v36  ;;  %v1460_v48 = vpop.f32.mrb[85].mxu0 }
 0x538   :  { %v1461_v4 = vadd.f32 %v1460_v48, %v3160_v27 }
 0x539   :  { %v1540_v20 = vmax.f32 %v1466_v51, 0.0 }
 0x53a   :  { %v1539_v37 = vmax.f32 %v1461_v4, 0.0 }
 0x53b   :  { %1572 = vst [vmem:[#allocation13 + $0xa8] sm:$0xff] %v1540_v20 }
 0x53c   :  { %1571 = vst [vmem:[#allocation13 + $0xa0] sm:$0xff] %v1539_v37 }
 0x53e   :  { %v2102_v58 = vpop.f32.mrb[86].mxu0 }
 0x53f   :  { %v1476_v26 = vadd.f32 %v2102_v58, %v3161_v0  ;;  %v1470_v25 = vpop.f32.mrb[87].mxu0 }
 0x540   :  { %v1471_v32 = vadd.f32 %v1470_v25, %v3162_v30 }
 0x541   :  { %v1542_v17 = vmax.f32 %v1476_v26, 0.0 }
 0x542   :  { %v1541_v9 = vmax.f32 %v1471_v32, 0.0 }
 0x543   :  { %1574 = vst [vmem:[#allocation13 + $0xb8] sm:$0xff] %v1542_v17 }
 0x544   :  { %1573 = vst [vmem:[#allocation13 + $0xb0] sm:$0xff] %v1541_v9 }
 0x546   :  { %v2105_v2 = vpop.f32.mrb[96].mxu1 }
 0x547   :  { %v1486_v24 = vadd.f32 %v2105_v2, %v3163_v12  ;;  %v1480_v1 = vpop.f32.mrb[97].mxu1 }
 0x548   :  { %v1481_v42 = vadd.f32 %v1480_v1, %v3164_v35 }
 0x549   :  { %v1544_v11 = vmax.f32 %v1486_v24, 0.0 }
 0x54a   :  { %v1543_v13 = vmax.f32 %v1481_v42, 0.0 }
 0x54b   :  { %1576 = vst [vmem:[#allocation13 + $0xc8] sm:$0xff] %v1544_v11 }
 0x54c   :  { %1575 = vst [vmem:[#allocation13 + $0xc0] sm:$0xff] %v1543_v13 }
 0x54e   :  { %v2108_v16 = vpop.f32.mrb[98].mxu1 }
 0x54f   :  { %v1496_v53 = vadd.f32 %v2108_v16, %v3165_v49  ;;  %v1490_v39 = vpop.f32.mrb[99].mxu1 }
 0x550   :  { %v1491_v52 = vadd.f32 %v1490_v39, %v3166_v47 }
 0x551   :  { %v1546_v22 = vmax.f32 %v1496_v53, 0.0 }
 0x552   :  { %v1545_v50 = vmax.f32 %v1491_v52, 0.0 }
 0x553   :  { %1578 = vst [vmem:[#allocation13 + $0xd8] sm:$0xff] %v1546_v22 }
 0x554   :  { %1577 = vst [vmem:[#allocation13 + $0xd0] sm:$0xff] %v1545_v50 }
 0x556   :  { %v2111_v44 = vpop.f32.mrb[100].mxu1 }
 0x557   :  { %v1506_v62 = vadd.f32 %v2111_v44, %v3167_v7  ;;  %v1500_v33 = vpop.f32.mrb[101].mxu1 }
 0x558   :  { %v1501_v54 = vadd.f32 %v1500_v33, %v3168_v57 }
 0x559   :  { %v1548_v55 = vmax.f32 %v1506_v62, 0.0 }
 0x55a   :  { %v1547_v14 = vmax.f32 %v1501_v54, 0.0 }
 0x55b   :  { %1580 = vst [vmem:[#allocation13 + $0xe8] sm:$0xff] %v1548_v55 }
 0x55c   :  { %1579 = vst [vmem:[#allocation13 + $0xe0] sm:$0xff] %v1547_v14 }
 0x55e   :  { %v2114_v56 = vpop.f32.mrb[102].mxu1 }
 0x55f   :  { %v1516_v38 = vadd.f32 %v2114_v56, %v3169_v21  ;;  %v1510_v46 = vpop.f32.mrb[103].mxu1 }
 0x560   :  { %v1511_v60 = vadd.f32 %v1510_v46, %v3170_v63 }
 0x561   :  { %v1550_v31 = vmax.f32 %v1516_v38, 0.0 }
 0x562   :  { %v1549_v61 = vmax.f32 %v1511_v60, 0.0 }
 0x563   :  { %1582 = vst [vmem:[#allocation13 + $0xf8] sm:$0xff] %v1550_v31 }
 0x564   :  { %1581 = vst [vmem:[#allocation13 + $0xf0] sm:$0xff] %v1549_v61 }
 0x565   :  { %2462 = shalt.err (!%p2459_p10)
}
 0x566   :  { %s2463_s24 = scalar_lea.hbm %s3102_s6, 4096 }
 0x567   :  { %p2464_p11 = scmp.ne.s32.totalorder %s3102_s6, %s2463_s24  ;;  %p2467_p12 = scmp.lt.u32.totalorder %s2463_s24, %s3102_s6 }
 0x569   :  { %p2469_p13 = pnand %p2467_p12, %p2464_p11 }
 0x56b   :  { %2472 = shalt.err (!%p2469_p13)
}
 0x56c   :  { %1594 = dma.vmem_to_hbm [thread:$0]  %s1589_s22, 4096, %s3102_s6, [#allocation4], %s2484_s7, %s2484_s7, %s2485_s8  }
 0x56d   :  { %2481 = dma.done.wait [#allocation4], 4096  }
 0x56e   :  { %2482 = vsyncadd [#allocation4], 4294963200 }
 0x56f   :  { %1598 = vsyncpa [#allocation3], 1 }
 0x570   :  { %1599 = vsyncpa [#allocation6], 1 }
 0x571   :  { %1600 = vsyncpa [#allocation9], 1 }
 0x572   :  { %1601 = vsyncpa [#allocation12], 1 }
 0x573   :  { %1602 = vsyncpa [#allocation4], 1 }

// kernel: tpu_custom_call.1
= control target key start
LH: loop header
LB: loop body
LE: loop exit
PB: predicated region body
PF: predicated region fallthrough
CT: control target
= control target key end

     0   :  { %11 = vsyncpa [#allocation3], 0  ;;  %s3096_s0 = inlined_call_operand.hbm [shape: f32[256,256], index: 0, kind: input, shape index: {}]   ;;  %s3097_s1 = inlined_call_operand.hbm [shape: f32[256,128], index: 1, kind: input, shape index: {}]   ;;  %s3098_s2 = inlined_call_operand.hbm [shape: f32[128,128], index: 2, kind: input, shape index: {}]   ;;  %s3099_s3 = inlined_call_operand.hbm [shape: f32[128,128], index: 3, kind: input, shape index: {}]   ;;  %s3100_s4 = inlined_call_operand.hbm [shape: f32[128,128], index: 4, kind: input, shape index: {}]   ;;  %s3101_s5 = inlined_call_operand.hbm [shape: f32[128,128], index: 5, kind: input, shape index: {}]   ;;  %s3102_s6 = inlined_call_operand.hbm [shape: f32[256,128], index: 6, kind: output, shape index: {}]  }
   0x1   :  { %12 = vsyncpa [#allocation6], 0 }
   0x2   :  { %13 = vsyncpa [#allocation9], 0 }
   0x3   :  { %14 = vsyncpa [#allocation12], 0 }
   0x4   :  { %15 = vsyncpa [#allocation4], 0  ;;  %s2483_s21 = smov [#allocation5]   ;;  %s2319_s25 = scalar_lea.hbm %s3097_s1, 4096 }
   0x5   :  { %s33_s22 = sshll.u32 %s2483_s21, 4  ;;  %p2320_p0 = scmp.ne.s32.totalorder %s3097_s1, %s2319_s25  ;;  %s34_s22 = int_to_ptr.vmem [resolvable:$true] %s33_s22 }
   0x6   :  { %p2323_p1 = scmp.lt.u32.totalorder %s2319_s25, %s3097_s1 }
   0x8   :  { %p2325_p2 = pnand %p2323_p1, %p2320_p0 }
   0xa   :  { %2328 = shalt.err (!%p2325_p2)
}
   0xb   :  { %s2329_s30 = scalar_lea.vmem %s34_s22, 4096  ;;  %p2334_p4 = scmp.lt.s32.totalorder %s34_s22, %s34_s22 }
   0xc   :  { %p2330_p3 = scmp.ne.s32.totalorder %s34_s22, %s2329_s30  ;;  %p2335_p5 = scmp.lt.s32.totalorder %s2329_s30, %s2329_s30 }
   0xe   :  { %p2336_p6 = por %p2335_p5, %p2334_p4 }
  0x10   :  { %p2337_p7 = pnand %p2336_p6, %p2330_p3 }
  0x12   :  { %2340 = shalt.err (!%p2337_p7)
}
  0x13   :  { %s2484_s7 = smov 128   ;;  %s2485_s8 = smov 8  }
  0x14   :  { %39 = dma.hbm_to_vmem [thread:$0]  %s3097_s1, 4096, %s34_s22, [#allocation6], %s2484_s7, %s2484_s7, %s2485_s8  }
  0x15   :  { %s2486_s11 = smov [#allocation8]   ;;  %s2487_s13 = smov [#allocation2]  }
  0x16   :  { %s57_s12 = sshll.u32 %s2486_s11, 4  ;;  %s21_s14 = sshll.u32 %s2487_s13, 4  ;;  %s58_s12 = int_to_ptr.vmem [resolvable:$true] %s57_s12  ;;  %s22_s14 = int_to_ptr.vmem [resolvable:$true] %s21_s14 }
  0x17   :  { %s2341_s17 = scalar_lea.hbm %s3099_s3, 2048 }
  0x18   :  { %p2342_p8 = scmp.ne.s32.totalorder %s3099_s3, %s2341_s17  ;;  %p2345_p9 = scmp.lt.u32.totalorder %s2341_s17, %s3099_s3 }
  0x1a   :  { %p2347_p10 = pnand %p2345_p9, %p2342_p8 }
  0x1c   :  { %2350 = shalt.err (!%p2347_p10)
}
  0x1d   :  { %s2351_s1 = scalar_lea.vmem %s58_s12, 2048  ;;  %p2356_p12 = scmp.lt.s32.totalorder %s58_s12, %s58_s12 }
  0x1e   :  { %p2352_p11 = scmp.ne.s32.totalorder %s58_s12, %s2351_s1  ;;  %p2357_p13 = scmp.lt.s32.totalorder %s2351_s1, %s2351_s1 }
  0x20   :  { %p2358_p0 = por %p2357_p13, %p2356_p12 }
  0x22   :  { %p2359_p1 = pnand %p2358_p0, %p2352_p11 }
  0x24   :  { %2362 = shalt.err (!%p2359_p1)
}
  0x25   :  { %63 = dma.hbm_to_vmem [thread:$0]  %s3099_s3, 2048, %s58_s12, [#allocation9], %s2484_s7, %s2484_s7, %s2485_s8  }
  0x26   :  { %s2363_s26 = scalar_lea.hbm %s3096_s0, 8192 }
  0x27   :  { %p2364_p2 = scmp.ne.s32.totalorder %s3096_s0, %s2363_s26  ;;  %p2367_p3 = scmp.lt.u32.totalorder %s2363_s26, %s3096_s0 }
  0x29   :  { %p2369_p4 = pnand %p2367_p3, %p2364_p2 }
  0x2b   :  { %2372 = shalt.err (!%p2369_p4)
}
  0x2c   :  { %s2373_s9 = scalar_lea.vmem %s22_s14, 8192  ;;  %p2378_p6 = scmp.lt.s32.totalorder %s22_s14, %s22_s14 }
  0x2d   :  { %p2374_p5 = scmp.ne.s32.totalorder %s22_s14, %s2373_s9  ;;  %p2379_p7 = scmp.lt.s32.totalorder %s2373_s9, %s2373_s9 }
  0x2f   :  { %p2380_p8 = por %p2379_p7, %p2378_p6 }
  0x31   :  { %p2381_p9 = pnand %p2380_p8, %p2374_p5 }
  0x33   :  { %2384 = shalt.err (!%p2381_p9)
}
  0x34   :  { %s2488_s3 = smov 256   ;;  %s2489_s10 = smov 16  }
  0x35   :  { %27 = dma.hbm_to_vmem [thread:$0]  %s3096_s0, 8192, %s22_s14, [#allocation3], %s2488_s3, %s2488_s3, %s2489_s10  }
  0x36   :  { %s2490_s13 = smov [#allocation7]   ;;  %s2491_s16 = smov [#allocation10]  }
  0x37   :  { %s45_s15 = sshll.u32 %s2490_s13, 4  ;;  %s69_s17 = sshll.u32 %s2491_s16, 4  ;;  %s46_s15 = int_to_ptr.vmem [resolvable:$true] %s45_s15  ;;  %s70_s17 = int_to_ptr.vmem [resolvable:$true] %s69_s17 }
  0x38   :  { %s2385_s20 = scalar_lea.hbm %s3098_s2, 2048 }
  0x39   :  { %p2386_p10 = scmp.ne.s32.totalorder %s3098_s2, %s2385_s20  ;;  %p2389_p11 = scmp.lt.u32.totalorder %s2385_s20, %s3098_s2 }
  0x3b   :  { %p2391_p12 = pnand %p2389_p11, %p2386_p10 }
  0x3d   :  { %2394 = shalt.err (!%p2391_p12)
}
  0x3e   :  { %s2395_s0 = scalar_lea.vmem %s46_s15, 2048  ;;  %p2400_p0 = scmp.lt.s32.totalorder %s46_s15, %s46_s15 }
  0x3f   :  { %p2396_p13 = scmp.ne.s32.totalorder %s46_s15, %s2395_s0  ;;  %p2401_p1 = scmp.lt.s32.totalorder %s2395_s0, %s2395_s0 }
  0x41   :  { %p2402_p2 = por %p2401_p1, %p2400_p0 }
  0x43   :  { %p2403_p3 = pnand %p2402_p2, %p2396_p13 }
  0x45   :  { %2406 = shalt.err (!%p2403_p3)
}
  0x46   :  { %51 = dma.hbm_to_vmem [thread:$0]  %s3098_s2, 2048, %s46_s15, [#allocation6], %s2484_s7, %s2484_s7, %s2485_s8  }
  0x47   :  { %s2407_s27 = scalar_lea.hbm %s3100_s4, 2048 }
  0x48   :  { %p2408_p4 = scmp.ne.s32.totalorder %s3100_s4, %s2407_s27  ;;  %p2411_p5 = scmp.lt.u32.totalorder %s2407_s27, %s3100_s4 }
  0x4a   :  { %p2413_p6 = pnand %p2411_p5, %p2408_p4 }
  0x4c   :  { %2416 = shalt.err (!%p2413_p6)
}
  0x4d   :  { %s2417_s3 = scalar_lea.vmem %s70_s17, 2048  ;;  %p2422_p8 = scmp.lt.s32.totalorder %s70_s17, %s70_s17 }
  0x4e   :  { %p2418_p7 = scmp.ne.s32.totalorder %s70_s17, %s2417_s3  ;;  %p2423_p9 = scmp.lt.s32.totalorder %s2417_s3, %s2417_s3 }
  0x50   :  { %p2424_p10 = por %p2423_p9, %p2422_p8 }
  0x52   :  { %p2425_p11 = pnand %p2424_p10, %p2418_p7 }
  0x54   :  { %2428 = shalt.err (!%p2425_p11)
}
  0x55   :  { %75 = dma.hbm_to_vmem [thread:$0]  %s3100_s4, 2048, %s70_s17, [#allocation9], %s2484_s7, %s2484_s7, %s2485_s8  }
  0x56   :  { %s2492_s11 = smov [#allocation11]   ;;  %s2429_s16 = scalar_lea.hbm %s3101_s5, 2048 }
  0x57   :  { %s81_s12 = sshll.u32 %s2492_s11, 4  ;;  %p2430_p12 = scmp.ne.s32.totalorder %s3101_s5, %s2429_s16  ;;  %s82_s12 = int_to_ptr.vmem [resolvable:$true] %s81_s12 }
  0x58   :  { %p2433_p13 = scmp.lt.u32.totalorder %s2429_s16, %s3101_s5 }
  0x5a   :  { %p2435_p0 = pnand %p2433_p13, %p2430_p12 }
  0x5c   :  { %2438 = shalt.err (!%p2435_p0)
}
  0x5d   :  { %s2439_s1 = scalar_lea.vmem %s82_s12, 2048  ;;  %p2444_p2 = scmp.lt.s32.totalorder %s82_s12, %s82_s12 }
  0x5e   :  { %p2440_p1 = scmp.ne.s32.totalorder %s82_s12, %s2439_s1  ;;  %p2445_p3 = scmp.lt.s32.totalorder %s2439_s1, %s2439_s1 }
  0x60   :  { %p2446_p4 = por %p2445_p3, %p2444_p2 }
  0x62   :  { %p2447_p5 = pnand %p2446_p4, %p2440_p1 }
  0x64   :  { %2450 = shalt.err (!%p2447_p5)
}
  0x65   :  { %87 = dma.hbm_to_vmem [thread:$0]  %s3101_s5, 2048, %s82_s12, [#allocation12], %s2484_s7, %s2484_s7, %s2485_s8  }
  0x66   :  { %2473 = dma.done.wait [#allocation3], 8192  }
  0x67   :  { %2474 = vsyncadd [#allocation3], 4294959104 }
  0x68   :  { %2475 = dma.done.wait [#allocation6], 6144  }
  0x69   :  { %2476 = vsyncadd [#allocation6], 4294961152 }
  0x6a   :  { %2477 = dma.done.wait [#allocation9], 4096  }
  0x6b   :  { %2478 = vsyncadd [#allocation9], 4294963200 }
  0x6c   :  { %2479 = dma.done.wait [#allocation12], 2048  }
  0x6d   :  { %2480 = vsyncadd [#allocation12], 4294965248  ;;  %v2493_v0 = vmov 0.0|0.0   ;;  %v170_v1 = vld [vmem:[#allocation5] sm:$0xff]  ;;  %v171_v2 = vld [vmem:[#allocation5 + $0x8] sm:$0xff]  ;;  %s2494_s5 = smov [#allocation13]  }
  0x6e   :  { %2115 = vmatprep.subr.bf16.mxu0 %v2493_v0  ;;  %v172_v3 = vld [vmem:[#allocation5 + $0x10] sm:$0xff]  ;;  %v2116_v4 = vpack.c.bf16 %v171_v2, %v170_v1  ;;  %v173_v5 = vld [vmem:[#allocation5 + $0x18] sm:$0xff]  ;;  %v174_v7 = vld [vmem:[#allocation5 + $0x20] sm:$0xff]  ;;  %s1588_s22 = sshll.u32 %s2494_s5, 4  ;;  %s1589_s22 = int_to_ptr.vmem [resolvable:$true] %s1588_s22 }
  0x6f   :  { %v2119_v6 = vpack.c.bf16 %v173_v5, %v172_v3  ;;  %v175_v8 = vld [vmem:[#allocation5 + $0x28] sm:$0xff]  ;;  %v176_v10 = vld [vmem:[#allocation5 + $0x30] sm:$0xff]  ;;  %v177_v11 = vld [vmem:[#allocation5 + $0x38] sm:$0xff]  ;;  %s2451_s23 = scalar_lea.vmem %s1589_s22, 4096  ;;  %p2456_p7 = scmp.lt.s32.totalorder %s1589_s22, %s1589_s22 }
  0x70   :  { %2117 = vmatpush1.bf16.msra.mxu0 %v2116_v4  ;;  %v2122_v9 = vpack.c.bf16 %v175_v8, %v174_v7  ;;  %v107_v12 = vld [vmem:[#allocation2 + $0x8] sm:$0xff]  ;;  %v2125_v13 = vpack.c.bf16 %v177_v11, %v176_v10  ;;  %v178_v14 = vld [vmem:[#allocation5 + $0x40] sm:$0xff]  ;;  %v180_v17 = vld [vmem:[#allocation5 + $0x50] sm:$0xff]  ;;  %p2452_p6 = scmp.ne.s32.totalorder %s1589_s22, %s2451_s23  ;;  %p2457_p8 = scmp.lt.s32.totalorder %s2451_s23, %s2451_s23 }
  0x71   :  { %2118 = vmatprep.subr.bf16.mxu0 %v2493_v0  ;;  %266 = vmatprep.mubr.f32.mxu0 %v107_v12  ;;  %v179_v15 = vld [vmem:[#allocation5 + $0x48] sm:$0xff]  ;;  %v181_v18 = vld [vmem:[#allocation5 + $0x58] sm:$0xff]  ;;  %v182_v20 = vld [vmem:[#allocation5 + $0x60] sm:$0xff] }
  0x72   :  { %v2128_v16 = vpack.c.bf16 %v179_v15, %v178_v14  ;;  %v2131_v19 = vpack.c.bf16 %v181_v18, %v180_v17  ;;  %v183_v21 = vld [vmem:[#allocation5 + $0x68] sm:$0xff]  ;;  %v184_v23 = vld [vmem:[#allocation5 + $0x70] sm:$0xff]  ;;  %v185_v24 = vld [vmem:[#allocation5 + $0x78] sm:$0xff]  ;;  %p2458_p9 = por %p2457_p8, %p2456_p7 }
  0x73   :  { %v2134_v22 = vpack.c.bf16 %v183_v21, %v182_v20  ;;  %v2137_v25 = vpack.c.bf16 %v185_v24, %v184_v23  ;;  %v186_v26 = vld [vmem:[#allocation5 + $0x80] sm:$0xff]  ;;  %v187_v27 = vld [vmem:[#allocation5 + $0x88] sm:$0xff]  ;;  %v188_v29 = vld [vmem:[#allocation5 + $0x90] sm:$0xff] }
  0x74   :  { %2120 = vmatpush1.bf16.msra.mxu0 %v2119_v6  ;;  %v2140_v28 = vpack.c.bf16 %v187_v27, %v186_v26  ;;  %v189_v30 = vld [vmem:[#allocation5 + $0x98] sm:$0xff]  ;;  %v190_v32 = vld [vmem:[#allocation5 + $0xa0] sm:$0xff]  ;;  %v191_v33 = vld [vmem:[#allocation5 + $0xa8] sm:$0xff]  ;;  %p2459_p10 = pnand %p2458_p9, %p2452_p6 }
  0x75   :  { %2121 = vmatprep.subr.bf16.mxu0 %v2493_v0  ;;  %v2143_v31 = vpack.c.bf16 %v189_v30, %v188_v29  ;;  %v2146_v34 = vpack.c.bf16 %v191_v33, %v190_v32  ;;  %v192_v35 = vld [vmem:[#allocation5 + $0xb0] sm:$0xff]  ;;  %v193_v36 = vld [vmem:[#allocation5 + $0xb8] sm:$0xff]  ;;  %v194_v38 = vld [vmem:[#allocation5 + $0xc0] sm:$0xff] }
  0x76   :  { %v2149_v37 = vpack.c.bf16 %v193_v36, %v192_v35  ;;  %v195_v39 = vld [vmem:[#allocation5 + $0xc8] sm:$0xff]  ;;  %v196_v41 = vld [vmem:[#allocation5 + $0xd0] sm:$0xff]  ;;  %v197_v42 = vld [vmem:[#allocation5 + $0xd8] sm:$0xff] }
  0x77   :  { %v2152_v40 = vpack.c.bf16 %v195_v39, %v194_v38  ;;  %v2155_v43 = vpack.c.bf16 %v197_v42, %v196_v41  ;;  %v198_v44 = vld [vmem:[#allocation5 + $0xe0] sm:$0xff]  ;;  %v199_v45 = vld [vmem:[#allocation5 + $0xe8] sm:$0xff]  ;;  %v200_v47 = vld [vmem:[#allocation5 + $0xf0] sm:$0xff] }
  0x78   :  { %2123 = vmatpush1.bf16.msra.mxu0 %v2122_v9  ;;  %v2158_v46 = vpack.c.bf16 %v199_v45, %v198_v44  ;;  %v201_v48 = vld [vmem:[#allocation5 + $0xf8] sm:$0xff]  ;;  %v459_v50 = vld [vmem:[#allocation7] sm:$0xff]  ;;  %v460_v51 = vld [vmem:[#allocation7 + $0x8] sm:$0xff] }
  0x79   :  { %2124 = vmatprep.subr.bf16.mxu0 %v2493_v0  ;;  %v2161_v49 = vpack.c.bf16 %v201_v48, %v200_v47  ;;  %v461_v52 = vld [vmem:[#allocation7 + $0x10] sm:$0xff]  ;;  %v106_v53 = vld [vmem:[#allocation2] sm:$0xff]  ;;  %v2163_v54 = vpack.c.bf16 %v460_v51, %v459_v50  ;;  %v462_v55 = vld [vmem:[#allocation7 + $0x18] sm:$0xff] }
  0x7a   :  { %v109_v56 = vld [vmem:[#allocation2 + $0x18] sm:$0xff]  ;;  %v2167_v57 = vpack.c.bf16 %v462_v55, %v461_v52  ;;  %v463_v58 = vld [vmem:[#allocation7 + $0x20] sm:$0xff]  ;;  %v464_v59 = vld [vmem:[#allocation7 + $0x28] sm:$0xff] }
  0x7b   :  { %2164 = vmatprep.subr.bf16.mxu1 %v2163_v54  ;;  %v108_v60 = vld [vmem:[#allocation2 + $0x10] sm:$0xff]  ;;  %v2171_v61 = vpack.c.bf16 %v464_v59, %v463_v58  ;;  %v111_v62 = vld [vmem:[#allocation2 + $0x28] sm:$0xff]  ;;  %v110_v1 = vld [vmem:[#allocation2 + $0x20] sm:$0xff] }
  0x7c   :  { %2126 = vmatpush1.bf16.msra.mxu0 %v2125_v13  ;;  %2166 = vmatpush3.bf16.msra.mxu1 %v2163_v54  ;;  %v465_v63 = vld [vmem:[#allocation7 + $0x30] sm:$0xff]  ;;  %v113_v3 = vld [vmem:[#allocation2 + $0x38] sm:$0xff]  ;;  %v467_v4 = vld [vmem:[#allocation7 + $0x40] sm:$0xff] }
  0x7d   :  { %2127 = vmatprep.subr.bf16.mxu0 %v2493_v0  ;;  %2168 = vmatprep.subr.bf16.mxu1 %v2167_v57  ;;  %v468_v5 = vld [vmem:[#allocation7 + $0x48] sm:$0xff]  ;;  %v112_v6 = vld [vmem:[#allocation2 + $0x30] sm:$0xff]  ;;  %v470_v10 = vld [vmem:[#allocation7 + $0x58] sm:$0xff] }
  0x7e   :  { %v2179_v7 = vpack.c.bf16 %v468_v5, %v467_v4  ;;  %v115_v8 = vld [vmem:[#allocation2 + $0x48] sm:$0xff]  ;;  %v469_v9 = vld [vmem:[#allocation7 + $0x50] sm:$0xff]  ;;  %v114_v11 = vld [vmem:[#allocation2 + $0x40] sm:$0xff] }
  0x7f   :  { %v2183_v12 = vpack.c.bf16 %v470_v10, %v469_v9  ;;  %v117_v13 = vld [vmem:[#allocation2 + $0x58] sm:$0xff]  ;;  %v471_v14 = vld [vmem:[#allocation7 + $0x60] sm:$0xff]  ;;  %v472_v15 = vld [vmem:[#allocation7 + $0x68] sm:$0xff] }
  0x80   :  { %2129 = vmatpush1.bf16.msra.mxu0 %v2128_v16  ;;  %2170 = vmatpush3.bf16.msra.mxu1 %v2167_v57  ;;  %v116_v16 = vld [vmem:[#allocation2 + $0x50] sm:$0xff]  ;;  %v2187_v17 = vpack.c.bf16 %v472_v15, %v471_v14  ;;  %v119_v18 = vld [vmem:[#allocation2 + $0x68] sm:$0xff]  ;;  %v121_v20 = vld [vmem:[#allocation2 + $0x78] sm:$0xff] }
  0x81   :  { %2130 = vmatprep.subr.bf16.mxu0 %v2493_v0  ;;  %2172 = vmatprep.subr.bf16.mxu1 %v2171_v61  ;;  %v120_v21 = vld [vmem:[#allocation2 + $0x70] sm:$0xff]  ;;  %v122_v23 = vld [vmem:[#allocation2 + $0x80] sm:$0xff]  ;;  %v125_v24 = vld [vmem:[#allocation2 + $0x98] sm:$0xff] }
  0x82   :  { %v127_v26 = vld [vmem:[#allocation2 + $0xa8] sm:$0xff]  ;;  %v126_v27 = vld [vmem:[#allocation2 + $0xa0] sm:$0xff]  ;;  %v128_v29 = vld [vmem:[#allocation2 + $0xb0] sm:$0xff] }
  0x83   :  { %v131_v30 = vld [vmem:[#allocation2 + $0xc8] sm:$0xff]  ;;  %v133_v32 = vld [vmem:[#allocation2 + $0xd8] sm:$0xff]  ;;  %v132_v33 = vld [vmem:[#allocation2 + $0xd0] sm:$0xff] }
  0x84   :  { %2132 = vmatpush1.bf16.msra.mxu0 %v2131_v19  ;;  %2174 = vmatpush3.bf16.msra.mxu1 %v2171_v61  ;;  %v118_v19 = vld [vmem:[#allocation2 + $0x60] sm:$0xff]  ;;  %v137_v36 = vld [vmem:[#allocation2 + $0xf8] sm:$0xff]  ;;  %v139_v38 = vld [vmem:[#allocation2 + $0x108] sm:$0xff] }
  0x85   :  { %2133 = vmatprep.subr.bf16.mxu0 %v2493_v0  ;;  %v134_v35 = vld [vmem:[#allocation2 + $0xe0] sm:$0xff]  ;;  %v140_v41 = vld [vmem:[#allocation2 + $0x110] sm:$0xff]  ;;  %v143_v42 = vld [vmem:[#allocation2 + $0x128] sm:$0xff] }
  0x86   :  { %v138_v39 = vld [vmem:[#allocation2 + $0x100] sm:$0xff]  ;;  %v145_v44 = vld [vmem:[#allocation2 + $0x138] sm:$0xff]  ;;  %v144_v45 = vld [vmem:[#allocation2 + $0x130] sm:$0xff] }
  0x87   :  { %v146_v47 = vld [vmem:[#allocation2 + $0x140] sm:$0xff]  ;;  %v149_v48 = vld [vmem:[#allocation2 + $0x158] sm:$0xff]  ;;  %v151_v50 = vld [vmem:[#allocation2 + $0x168] sm:$0xff] }
  0x88   :  { %2135 = vmatpush1.bf16.msra.mxu0 %v2134_v22  ;;  %v123_v22 = vld [vmem:[#allocation2 + $0x88] sm:$0xff]  ;;  %v473_v51 = vld [vmem:[#allocation7 + $0x70] sm:$0xff]  ;;  %v474_v52 = vld [vmem:[#allocation7 + $0x78] sm:$0xff] }
  0x89   :  { %2136 = vmatprep.subr.bf16.mxu0 %v2493_v0  ;;  %v150_v54 = vld [vmem:[#allocation2 + $0x160] sm:$0xff]  ;;  %v153_v55 = vld [vmem:[#allocation2 + $0x178] sm:$0xff]  ;;  %v155_v57 = vld [vmem:[#allocation2 + $0x188] sm:$0xff] }
  0x8a   :  { %v154_v58 = vld [vmem:[#allocation2 + $0x180] sm:$0xff]  ;;  %v157_v59 = vld [vmem:[#allocation2 + $0x198] sm:$0xff]  ;;  %v159_v61 = vld [vmem:[#allocation2 + $0x1a8] sm:$0xff] }
  0x8b   :  { %v164_v4 = vld [vmem:[#allocation2 + $0x1d0] sm:$0xff]  ;;  %v167_v5 = vld [vmem:[#allocation2 + $0x1e8] sm:$0xff]  ;;  %v475_v9 = vld [vmem:[#allocation8] sm:$0xff] }
  0x8c   :  { %2138 = vmatpush1.bf16.msra.mxu0 %v2137_v25  ;;  %v124_v25 = vld [vmem:[#allocation2 + $0x90] sm:$0xff]  ;;  %v476_v10 = vld [vmem:[#allocation8 + $0x8] sm:$0xff] }
  0x8d   :  { %2139 = vmatprep.subr.bf16.mxu0 %v2493_v0  ;;  %v477_v15 = vld [vmem:[#allocation8 + $0x10] sm:$0xff] }
  0x90   :  { %2141 = vmatpush1.bf16.msra.mxu0 %v2140_v28  ;;  %v129_v28 = vld [vmem:[#allocation2 + $0xb8] sm:$0xff] }
  0x91   :  { %2142 = vmatprep.subr.bf16.mxu0 %v2493_v0 }
  0x94   :  { %2144 = vmatpush1.bf16.msra.mxu0 %v2143_v31  ;;  %v130_v31 = vld [vmem:[#allocation2 + $0xc0] sm:$0xff] }
  0x95   :  { %2145 = vmatprep.subr.bf16.mxu0 %v2493_v0 }
  0x98   :  { %2147 = vmatpush1.bf16.msra.mxu0 %v2146_v34  ;;  %v135_v34 = vld [vmem:[#allocation2 + $0xe8] sm:$0xff] }
  0x99   :  { %2148 = vmatprep.subr.bf16.mxu0 %v2493_v0 }
  0x9c   :  { %2150 = vmatpush1.bf16.msra.mxu0 %v2149_v37  ;;  %v136_v37 = vld [vmem:[#allocation2 + $0xf0] sm:$0xff] }
  0x9d   :  { %2151 = vmatprep.subr.bf16.mxu0 %v2493_v0 }
  0xa0   :  { %2153 = vmatpush1.bf16.msra.mxu0 %v2152_v40  ;;  %v141_v40 = vld [vmem:[#allocation2 + $0x118] sm:$0xff] }
  0xa1   :  { %2154 = vmatprep.subr.bf16.mxu0 %v2493_v0 }
  0xa4   :  { %2156 = vmatpush1.bf16.msra.mxu0 %v2155_v43  ;;  %v142_v43 = vld [vmem:[#allocation2 + $0x120] sm:$0xff] }
  0xa5   :  { %2157 = vmatprep.subr.bf16.mxu0 %v2493_v0 }
  0xa8   :  { %2159 = vmatpush1.bf16.msra.mxu0 %v2158_v46  ;;  %v147_v46 = vld [vmem:[#allocation2 + $0x148] sm:$0xff] }
  0xa9   :  { %2160 = vmatprep.subr.bf16.mxu0 %v2493_v0  ;;  %v466_v0 = vld [vmem:[#allocation7 + $0x38] sm:$0xff] }
  0xaa   :  { %v2175_v2 = vpack.c.bf16 %v466_v0, %v465_v63  ;;  %v161_v63 = vld [vmem:[#allocation2 + $0x1b8] sm:$0xff]  ;;  %v160_v0 = vld [vmem:[#allocation2 + $0x1b0] sm:$0xff] }
  0xac   :  { %2162 = vmatpush1.bf16.msra.mxu0 %v2161_v49  ;;  %2176 = vmatprep.subr.bf16.mxu1 %v2175_v2  ;;  %v148_v49 = vld [vmem:[#allocation2 + $0x150] sm:$0xff] }
  0xad   :  { %2178 = vmatpush3.bf16.msra.mxu1 %v2175_v2  ;;  %v162_v2 = vld [vmem:[#allocation2 + $0x1c0] sm:$0xff] }
  0xae   :  { %2180 = vmatprep.subr.bf16.mxu1 %v2179_v7 }
  0xaf   :  { %267 = vmatmul.mubr.f32.vlgmr.msra.gmra.mrb[0].mxu0 %v106_v53  ;;  %v2191_v53 = vpack.c.bf16 %v474_v52, %v473_v51 }
  0xb0   :  { %271 = vmatprep.mubr.f32.mxu0 %v109_v56  ;;  %v152_v56 = vld [vmem:[#allocation2 + $0x170] sm:$0xff] }
  0xb1   :  { %2182 = vmatpush3.bf16.msra.mxu1 %v2179_v7  ;;  %v169_v7 = vld [vmem:[#allocation2 + $0x1f8] sm:$0xff] }
  0xb2   :  { %2184 = vmatprep.subr.bf16.mxu1 %v2183_v12 }
  0xb3   :  { %272 = vmatmul.mubr.f32.gmra.mrb[2].mxu0 %v108_v60  ;;  %v156_v60 = vld [vmem:[#allocation2 + $0x190] sm:$0xff] }
  0xb4   :  { %276 = vmatprep.mubr.f32.mxu0 %v111_v62  ;;  %v158_v62 = vld [vmem:[#allocation2 + $0x1a0] sm:$0xff] }
  0xb5   :  { %2186 = vmatpush3.bf16.msra.mxu1 %v2183_v12  ;;  %v2195_v12 = vpack.c.bf16 %v476_v10, %v475_v9 }
  0xb6   :  { %2188 = vmatprep.subr.bf16.mxu1 %v2187_v17 }
  0xb7   :  { %277 = vmatmul.mubr.f32.gmra.mrb[4].mxu0 %v110_v1  ;;  %v163_v1 = vld [vmem:[#allocation2 + $0x1c8] sm:$0xff] }
  0xb8   :  { %281 = vmatprep.mubr.f32.mxu0 %v113_v3  ;;  %v165_v3 = vld [vmem:[#allocation2 + $0x1d8] sm:$0xff] }
  0xb9   :  { %2190 = vmatpush3.bf16.msra.mxu1 %v2187_v17 }
  0xba   :  { %2192 = vmatprep.subr.bf16.mxu1 %v2191_v53 }
  0xbb   :  { %282 = vmatmul.mubr.f32.gmra.mrb[6].mxu0 %v112_v6  ;;  %v166_v6 = vld [vmem:[#allocation2 + $0x1e0] sm:$0xff] }
  0xbc   :  { %286 = vmatprep.mubr.f32.mxu0 %v115_v8  ;;  %v168_v8 = vld [vmem:[#allocation2 + $0x1f0] sm:$0xff] }
  0xbd   :  { %2194 = vmatpush3.bf16.msra.mxu1 %v2191_v53 }
  0xbe   :  { %2196 = vmatprep.subr.bf16.mxu1 %v2195_v12 }
  0xbf   :  { %287 = vmatmul.mubr.f32.gmra.mrb[8].mxu0 %v114_v11 }
  0xc0   :  { %291 = vmatprep.mubr.f32.mxu0 %v117_v13 }
  0xc3   :  { %292 = vmatmul.mubr.f32.gmra.mrb[10].mxu0 %v116_v16  ;;  %v478_v16 = vld [vmem:[#allocation8 + $0x18] sm:$0xff] }
  0xc4   :  { %296 = vmatprep.mubr.f32.mxu0 %v119_v18 }
  0xc7   :  { %297 = vmatmul.mubr.f32.gmra.mrb[12].mxu0 %v118_v19 }
  0xc8   :  { %301 = vmatprep.mubr.f32.mxu0 %v121_v20  ;;  %v2199_v20 = vpack.c.bf16 %v478_v16, %v477_v15 }
  0xcb   :  { %302 = vmatmul.mubr.f32.gmra.mrb[14].mxu0 %v120_v21  ;;  %v479_v21 = vld [vmem:[#allocation8 + $0x20] sm:$0xff] }
  0xcc   :  { %306 = vmatprep.mubr.f32.mxu0 %v123_v22  ;;  %v480_v22 = vld [vmem:[#allocation8 + $0x28] sm:$0xff] }
  0xcf   :  { %307 = vmatmul.mubr.f32.gmra.mrb[16].mxu0 %v122_v23 }
  0xd0   :  { %311 = vmatprep.mubr.f32.mxu0 %v125_v24 }
  0xd3   :  { %312 = vmatmul.mubr.f32.gmra.mrb[18].mxu0 %v124_v25 }
  0xd4   :  { %316 = vmatprep.mubr.f32.mxu0 %v127_v26  ;;  %v2203_v26 = vpack.c.bf16 %v480_v22, %v479_v21 }
  0xd7   :  { %317 = vmatmul.mubr.f32.gmra.mrb[20].mxu0 %v126_v27  ;;  %v481_v27 = vld [vmem:[#allocation8 + $0x30] sm:$0xff] }
  0xd8   :  { %321 = vmatprep.mubr.f32.mxu0 %v129_v28  ;;  %v482_v28 = vld [vmem:[#allocation8 + $0x38] sm:$0xff] }
  0xdb   :  { %322 = vmatmul.mubr.f32.gmra.mrb[22].mxu0 %v128_v29 }
  0xdc   :  { %326 = vmatprep.mubr.f32.mxu0 %v131_v30 }
  0xdf   :  { %327 = vmatmul.mubr.f32.gmra.mrb[24].mxu0 %v130_v31 }
  0xe0   :  { %331 = vmatprep.mubr.f32.mxu0 %v133_v32  ;;  %v2207_v32 = vpack.c.bf16 %v482_v28, %v481_v27 }
  0xe3   :  { %332 = vmatmul.mubr.f32.gmra.mrb[26].mxu0 %v132_v33  ;;  %v483_v33 = vld [vmem:[#allocation8 + $0x40] sm:$0xff] }
  0xe4   :  { %336 = vmatprep.mubr.f32.mxu0 %v135_v34  ;;  %v484_v34 = vld [vmem:[#allocation8 + $0x48] sm:$0xff] }
  0xe7   :  { %337 = vmatmul.mubr.f32.gmra.mrb[28].mxu0 %v134_v35 }
  0xe8   :  { %341 = vmatprep.mubr.f32.mxu0 %v137_v36 }
  0xeb   :  { %342 = vmatmul.mubr.f32.gmra.mrb[30].mxu0 %v136_v37 }
  0xec   :  { %346 = vmatprep.mubr.f32.mxu0 %v139_v38  ;;  %v2211_v38 = vpack.c.bf16 %v484_v34, %v483_v33 }
  0xef   :  { %347 = vmatmul.mubr.f32.gmra.mrb[32].mxu0 %v138_v39  ;;  %v485_v39 = vld [vmem:[#allocation8 + $0x50] sm:$0xff] }
  0xf0   :  { %351 = vmatprep.mubr.f32.mxu0 %v141_v40  ;;  %v486_v40 = vld [vmem:[#allocation8 + $0x58] sm:$0xff] }
  0xf3   :  { %352 = vmatmul.mubr.f32.gmra.mrb[34].mxu0 %v140_v41 }
  0xf4   :  { %356 = vmatprep.mubr.f32.mxu0 %v143_v42 }
  0xf7   :  { %357 = vmatmul.mubr.f32.gmra.mrb[36].mxu0 %v142_v43 }
  0xf8   :  { %361 = vmatprep.mubr.f32.mxu0 %v145_v44  ;;  %v2215_v44 = vpack.c.bf16 %v486_v40, %v485_v39 }
  0xfb   :  { %362 = vmatmul.mubr.f32.gmra.mrb[38].mxu0 %v144_v45  ;;  %v487_v45 = vld [vmem:[#allocation8 + $0x60] sm:$0xff] }
  0xfc   :  { %366 = vmatprep.mubr.f32.mxu0 %v147_v46  ;;  %v488_v46 = vld [vmem:[#allocation8 + $0x68] sm:$0xff] }
  0xff   :  { %367 = vmatmul.mubr.f32.gmra.mrb[40].mxu0 %v146_v47 }
 0x100   :  { %371 = vmatprep.mubr.f32.mxu0 %v149_v48 }
 0x103   :  { %372 = vmatmul.mubr.f32.gmra.mrb[42].mxu0 %v148_v49 }
 0x104   :  { %376 = vmatprep.mubr.f32.mxu0 %v151_v50  ;;  %v2219_v50 = vpack.c.bf16 %v488_v46, %v487_v45  ;;  %v489_v45 = vld [vmem:[#allocation8 + $0x70] sm:$0xff]  ;;  %v490_v46 = vld [vmem:[#allocation8 + $0x78] sm:$0xff] }
 0x107   :  { %377 = vmatmul.mubr.f32.gmra.mrb[44].mxu0 %v150_v54 }
 0x108   :  { %381 = vmatprep.mubr.f32.mxu0 %v153_v55 }
 0x10b   :  { %382 = vmatmul.mubr.f32.gmra.mrb[46].mxu0 %v152_v56 }
 0x10c   :  { %386 = vmatprep.mubr.f32.mxu0 %v155_v57 }
 0x10f   :  { %387 = vmatmul.mubr.f32.gmra.mrb[48].mxu0 %v154_v58 }
 0x110   :  { %391 = vmatprep.mubr.f32.mxu0 %v157_v59 }
 0x113   :  { %392 = vmatmul.mubr.f32.gmra.mrb[50].mxu0 %v156_v60 }
 0x114   :  { %396 = vmatprep.mubr.f32.mxu0 %v159_v61 }
 0x117   :  { %397 = vmatmul.mubr.f32.gmra.mrb[52].mxu0 %v158_v62 }
 0x118   :  { %401 = vmatprep.mubr.f32.mxu0 %v161_v63 }
 0x11b   :  { %402 = vmatmul.mubr.f32.gmra.mrb[54].mxu0 %v160_v0 }
 0x11c   :  { %406 = vmatprep.mubr.f32.mxu0 %v163_v1 }
 0x11f   :  { %407 = vmatmul.mubr.f32.gmra.mrb[56].mxu0 %v162_v2 }
 0x120   :  { %411 = vmatprep.mubr.f32.mxu0 %v165_v3 }
 0x123   :  { %412 = vmatmul.mubr.f32.gmra.mrb[58].mxu0 %v164_v4 }
 0x124   :  { %416 = vmatprep.mubr.f32.mxu0 %v167_v5 }
 0x127   :  { %417 = vmatmul.mubr.f32.gmra.mrb[60].mxu0 %v166_v6 }
 0x128   :  { %421 = vmatprep.mubr.f32.mxu0 %v169_v7 }
 0x12b   :  { %422 = vmatmul.mubr.f32.gmra.mrb[62].mxu0 %v168_v8 }
 0x182   :  { %v2633_v11 = vpop.f32.mrb[0].mxu0 }
 0x183   :  { %v427_v13 = vmax.f32 %v2633_v11, 0.0  ;;  %v270_v14 = vpop.f32.mrb[1].mxu0 }
 0x185   :  { %1827 = vmatprep.mubr.f32.mxu1 %v427_v13 }
 0x186   :  { %v2638_v17 = vpop.f32.mrb[2].mxu0 }
 0x187   :  { %v428_v18 = vmax.f32 %v2638_v17, 0.0  ;;  %v275_v19 = vpop.f32.mrb[3].mxu0  ;;  %v1027_v17 = vld [vmem:[#allocation11 + $0x30] sm:$0xff] }
 0x189   :  { %1828 = vmatmul.mubr.f32.vlgmr.msra.gmra.mrb[0].mxu1 %v428_v18 }
 0x18a   :  { %v2643_v23 = vpop.f32.mrb[4].mxu0  ;;  %2198 = vmatpush3.bf16.msra.mxu1 %v2195_v12 }
 0x18b   :  { %v429_v24 = vmax.f32 %v2643_v23, 0.0  ;;  %v280_v25 = vpop.f32.mrb[5].mxu0  ;;  %2200 = vmatprep.subr.bf16.mxu1 %v2199_v20 }
 0x18d   :  { %1830 = vmatprep.mubr.f32.mxu1 %v429_v24 }
 0x18e   :  { %v2648_v29 = vpop.f32.mrb[6].mxu0  ;;  %2202 = vmatpush3.bf16.msra.mxu1 %v2199_v20 }
 0x18f   :  { %v430_v30 = vmax.f32 %v2648_v29, 0.0  ;;  %v285_v31 = vpop.f32.mrb[7].mxu0  ;;  %2204 = vmatprep.subr.bf16.mxu1 %v2203_v26  ;;  %v1032_v29 = vld [vmem:[#allocation11 + $0x58] sm:$0xff] }
 0x191   :  { %1831 = vmatmul.mubr.f32.gmra.mrb[2].mxu1 %v430_v30 }
 0x192   :  { %v2653_v35 = vpop.f32.mrb[8].mxu0  ;;  %2206 = vmatpush3.bf16.msra.mxu1 %v2203_v26 }
 0x193   :  { %v431_v36 = vmax.f32 %v2653_v35, 0.0  ;;  %v290_v37 = vpop.f32.mrb[9].mxu0  ;;  %2208 = vmatprep.subr.bf16.mxu1 %v2207_v32 }
 0x195   :  { %1833 = vmatprep.mubr.f32.mxu1 %v431_v36 }
 0x196   :  { %v2658_v41 = vpop.f32.mrb[10].mxu0  ;;  %2210 = vmatpush3.bf16.msra.mxu1 %v2207_v32 }
 0x197   :  { %v432_v42 = vmax.f32 %v2658_v41, 0.0  ;;  %v295_v43 = vpop.f32.mrb[11].mxu0  ;;  %2212 = vmatprep.subr.bf16.mxu1 %v2211_v38 }
 0x199   :  { %1834 = vmatmul.mubr.f32.gmra.mrb[4].mxu1 %v432_v42 }
 0x19a   :  { %v2663_v47 = vpop.f32.mrb[12].mxu0  ;;  %2214 = vmatpush3.bf16.msra.mxu1 %v2211_v38 }
 0x19b   :  { %v433_v48 = vmax.f32 %v2663_v47, 0.0  ;;  %v300_v49 = vpop.f32.mrb[13].mxu0  ;;  %2216 = vmatprep.subr.bf16.mxu1 %v2215_v44 }
 0x19d   :  { %1836 = vmatprep.mubr.f32.mxu1 %v433_v48 }
 0x19e   :  { %v2668_v51 = vpop.f32.mrb[14].mxu0  ;;  %2218 = vmatpush3.bf16.msra.mxu1 %v2215_v44 }
 0x19f   :  { %v434_v52 = vmax.f32 %v2668_v51, 0.0  ;;  %v305_v53 = vpop.f32.mrb[15].mxu0  ;;  %2220 = vmatprep.subr.bf16.mxu1 %v2219_v50 }
 0x1a0   :  { %v2223_v53 = vpack.c.bf16 %v490_v46, %v489_v45 }
 0x1a1   :  { %1837 = vmatmul.mubr.f32.gmra.mrb[6].mxu1 %v434_v52 }
 0x1a2   :  { %v2673_v54 = vpop.f32.mrb[16].mxu0  ;;  %2222 = vmatpush3.bf16.msra.mxu1 %v2219_v50 }
 0x1a3   :  { %v435_v55 = vmax.f32 %v2673_v54, 0.0  ;;  %v310_v56 = vpop.f32.mrb[17].mxu0  ;;  %2224 = vmatprep.subr.bf16.mxu1 %v2223_v53 }
 0x1a5   :  { %1839 = vmatprep.mubr.f32.mxu1 %v435_v55 }
 0x1a6   :  { %v2678_v57 = vpop.f32.mrb[18].mxu0  ;;  %2226 = vmatpush3.bf16.msra.mxu1 %v2223_v53 }
 0x1a7   :  { %v436_v58 = vmax.f32 %v2678_v57, 0.0  ;;  %v315_v59 = vpop.f32.mrb[19].mxu0 }
 0x1a9   :  { %1840 = vmatmul.mubr.f32.gmra.mrb[8].mxu1 %v436_v58 }
 0x1aa   :  { %v2683_v60 = vpop.f32.mrb[20].mxu0 }
 0x1ab   :  { %v437_v61 = vmax.f32 %v2683_v60, 0.0  ;;  %v320_v62 = vpop.f32.mrb[21].mxu0 }
 0x1ad   :  { %1842 = vmatprep.mubr.f32.mxu1 %v437_v61 }
 0x1ae   :  { %v2688_v63 = vpop.f32.mrb[22].mxu0 }
 0x1af   :  { %v438_v0 = vmax.f32 %v2688_v63, 0.0  ;;  %v325_v1 = vpop.f32.mrb[23].mxu0 }
 0x1b1   :  { %1843 = vmatmul.mubr.f32.gmra.mrb[10].mxu1 %v438_v0 }
 0x1b2   :  { %v2693_v2 = vpop.f32.mrb[24].mxu0 }
 0x1b3   :  { %v439_v3 = vmax.f32 %v2693_v2, 0.0  ;;  %v330_v4 = vpop.f32.mrb[25].mxu0 }
 0x1b5   :  { %1845 = vmatprep.mubr.f32.mxu1 %v439_v3 }
 0x1b6   :  { %v2698_v5 = vpop.f32.mrb[26].mxu0 }
 0x1b7   :  { %v440_v6 = vmax.f32 %v2698_v5, 0.0  ;;  %v335_v7 = vpop.f32.mrb[27].mxu0 }
 0x1b9   :  { %1846 = vmatmul.mubr.f32.gmra.mrb[12].mxu1 %v440_v6 }
 0x1ba   :  { %v2703_v8 = vpop.f32.mrb[28].mxu0 }
 0x1bb   :  { %v3119_v9 = vmax.f32 %v2703_v8, 0.0  ;;  %v340_v10 = vpop.f32.mrb[29].mxu0  ;;  %v3138_v2 = vmax.f32 %v2703_v8, 0.0 }
 0x1bd   :  { %1848 = vmatprep.mubr.f32.mxu1 %v3119_v9 }
 0x1be   :  { %v2708_v12 = vpop.f32.mrb[30].mxu0 }
 0x1bf   :  { %v3120_v14 = vmax.f32 %v2708_v12, 0.0  ;;  %v345_v15 = vpop.f32.mrb[31].mxu0  ;;  %v3137_v5 = vmax.f32 %v2708_v12, 0.0 }
 0x1c1   :  { %1849 = vmatmul.mubr.f32.gmra.mrb[14].mxu1 %v3120_v14 }
 0x1c2   :  { %v2713_v16 = vpop.f32.mrb[32].mxu0 }
 0x1c3   :  { %v3116_v19 = vmax.f32 %v2713_v16, 0.0  ;;  %v350_v20 = vpop.f32.mrb[33].mxu0  ;;  %v3140_v8 = vmax.f32 %v2713_v16, 0.0 }
 0x1c5   :  { %1851 = vmatprep.mubr.f32.mxu1 %v3116_v19 }
 0x1c6   :  { %v2718_v21 = vpop.f32.mrb[34].mxu0 }
 0x1c7   :  { %v3118_v22 = vmax.f32 %v2718_v21, 0.0  ;;  %v355_v25 = vpop.f32.mrb[35].mxu0  ;;  %v3139_v12 = vmax.f32 %v2718_v21, 0.0 }
 0x1c9   :  { %1852 = vmatmul.mubr.f32.gmra.mrb[16].mxu1 %v3118_v22  ;;  %v1012_v22 = vld [vmem:[#allocation10 + $0x38] sm:$0xff] }
 0x1ca   :  { %v2723_v26 = vpop.f32.mrb[36].mxu0 }
 0x1cb   :  { %v3113_v27 = vmax.f32 %v2723_v26, 0.0  ;;  %v360_v28 = vpop.f32.mrb[37].mxu0  ;;  %v3142_v16 = vmax.f32 %v2723_v26, 0.0 }
 0x1cd   :  { %1854 = vmatprep.mubr.f32.mxu1 %v3113_v27 }
 0x1ce   :  { %v2728_v31 = vpop.f32.mrb[38].mxu0 }
 0x1cf   :  { %v3115_v32 = vmax.f32 %v2728_v31, 0.0  ;;  %v365_v33 = vpop.f32.mrb[39].mxu0  ;;  %v3141_v21 = vmax.f32 %v2728_v31, 0.0 }
 0x1d1   :  { %1855 = vmatmul.mubr.f32.gmra.mrb[18].mxu1 %v3115_v32  ;;  %v1010_v32 = vld [vmem:[#allocation10 + $0x28] sm:$0xff] }
 0x1d2   :  { %v2733_v34 = vpop.f32.mrb[40].mxu0 }
 0x1d3   :  { %v3111_v37 = vmax.f32 %v2733_v34, 0.0  ;;  %v370_v38 = vpop.f32.mrb[41].mxu0  ;;  %v3144_v26 = vmax.f32 %v2733_v34, 0.0 }
 0x1d5   :  { %1857 = vmatprep.mubr.f32.mxu1 %v3111_v37 }
 0x1d6   :  { %v2738_v39 = vpop.f32.mrb[42].mxu0 }
 0x1d7   :  { %v3112_v40 = vmax.f32 %v2738_v39, 0.0  ;;  %v375_v43 = vpop.f32.mrb[43].mxu0  ;;  %v3143_v31 = vmax.f32 %v2738_v39, 0.0  ;;  %v1036_v39 = vld [vmem:[#allocation11 + $0x78] sm:$0xff] }
 0x1d9   :  { %1858 = vmatmul.mubr.f32.gmra.mrb[20].mxu1 %v3112_v40 }
 0x1da   :  { %v2743_v44 = vpop.f32.mrb[44].mxu0 }
 0x1db   :  { %v3109_v49 = vmax.f32 %v2743_v44, 0.0  ;;  %v380_v50 = vpop.f32.mrb[45].mxu0 }
 0x1dd   :  { %1860 = vmatprep.mubr.f32.mxu1 %v3109_v49  ;;  %v1007_v49 = vld [vmem:[#allocation10 + $0x10] sm:$0xff] }
 0x1de   :  { %v2748_v56 = vpop.f32.mrb[46].mxu0 }
 0x1df   :  { %v3110_v59 = vmax.f32 %v2748_v56, 0.0  ;;  %v385_v62 = vpop.f32.mrb[47].mxu0 }
 0x1e1   :  { %1861 = vmatmul.mubr.f32.gmra.mrb[22].mxu1 %v3110_v59  ;;  %v1008_v59 = vld [vmem:[#allocation10 + $0x18] sm:$0xff] }
 0x1e2   :  { %v2753_v1 = vpop.f32.mrb[48].mxu0  ;;  %v2231_v27 = vpack.c.bf16 %v1008_v59, %v1007_v49  ;;  %v1015_v59 = vld [vmem:[#allocation10 + $0x50] sm:$0xff] }
 0x1e3   :  { %v3106_v4 = vmax.f32 %v2753_v1, 0.0  ;;  %v390_v7 = vpop.f32.mrb[49].mxu0 }
 0x1e5   :  { %1863 = vmatprep.mubr.f32.mxu1 %v3106_v4  ;;  %v1006_v4 = vld [vmem:[#allocation10 + $0x8] sm:$0xff] }
 0x1e6   :  { %v2758_v10 = vpop.f32.mrb[50].mxu0 }
 0x1e7   :  { %v3107_v15 = vmax.f32 %v2758_v10, 0.0  ;;  %v395_v20 = vpop.f32.mrb[51].mxu0 }
 0x1e9   :  { %1864 = vmatmul.mubr.f32.gmra.mrb[24].mxu1 %v3107_v15 }
 0x1ea   :  { %v2763_v25 = vpop.f32.mrb[52].mxu0 }
 0x1eb   :  { %v3103_v28 = vmax.f32 %v2763_v25, 0.0  ;;  %v400_v33 = vpop.f32.mrb[53].mxu0 }
 0x1ed   :  { %1866 = vmatprep.mubr.f32.mxu1 %v3103_v28 }
 0x1ee   :  { %v2768_v38 = vpop.f32.mrb[54].mxu0 }
 0x1ef   :  { %v3105_v43 = vmax.f32 %v2768_v38, 0.0  ;;  %v405_v45 = vpop.f32.mrb[55].mxu0 }
 0x1f1   :  { %1867 = vmatmul.mubr.f32.gmra.mrb[26].mxu1 %v3105_v43 }
 0x1f2   :  { %v2773_v46 = vpop.f32.mrb[56].mxu0 }
 0x1f3   :  { %v3104_v50 = vmax.f32 %v2773_v46, 0.0  ;;  %v410_v53 = vpop.f32.mrb[57].mxu0 }
 0x1f5   :  { %1869 = vmatprep.mubr.f32.mxu1 %v3104_v50 }
 0x1f6   :  { %v2778_v62 = vpop.f32.mrb[58].mxu0 }
 0x1f7   :  { %v3108_v7 = vmax.f32 %v2778_v62, 0.0  ;;  %v415_v20 = vpop.f32.mrb[59].mxu0 }
 0x1f8   :  { %v1005_v20 = vld [vmem:[#allocation10] sm:$0xff] }
 0x1f9   :  { %1870 = vmatmul.mubr.f32.gmra.mrb[28].mxu1 %v3108_v7  ;;  %v2227_v15 = vpack.c.bf16 %v1006_v4, %v1005_v20 }
 0x1fa   :  { %v2783_v33 = vpop.f32.mrb[60].mxu0 }
 0x1fb   :  { %v3114_v45 = vmax.f32 %v2783_v33, 0.0  ;;  %v420_v28 = vpop.f32.mrb[61].mxu0  ;;  %2228 = vmatprep.subr.bf16.mxu1 %v2227_v15 }
 0x1fd   :  { %1872 = vmatprep.mubr.f32.mxu1 %v3114_v45  ;;  %v1009_v45 = vld [vmem:[#allocation10 + $0x20] sm:$0xff] }
 0x1fe   :  { %v2788_v53 = vpop.f32.mrb[62].mxu0 }
 0x1ff   :  { %v3117_v50 = vmax.f32 %v2788_v53, 0.0  ;;  %v425_v43 = vpop.f32.mrb[63].mxu0 }
 0x200   :  { %v2235_v43 = vpack.c.bf16 %v1010_v32, %v1009_v45 }
 0x201   :  { %1873 = vmatmul.mubr.f32.gmra.mrb[30].mxu1 %v3117_v50  ;;  %v1011_v50 = vld [vmem:[#allocation10 + $0x30] sm:$0xff] }
 0x202   :  { %v2239_v14 = vpack.c.bf16 %v1012_v22, %v1011_v50 }
 0x25c   :  { %v1829_v7 = vpop.f32.mrb[0].mxu1 }
 0x25d   :  { %v557_v37 = vpop.f32.mrb[1].mxu1  ;;  %v717_v40 = vmax.f32 %v1829_v7, 0.0  ;;  %v1014_v7 = vld [vmem:[#allocation10 + $0x48] sm:$0xff] }
 0x25e   :  { %v716_v28 = vmax.f32 %v557_v37, 0.0  ;;  %v1013_v37 = vld [vmem:[#allocation10 + $0x40] sm:$0xff] }
 0x25f   :  { %v2243_v49 = vpack.c.bf16 %v1014_v7, %v1013_v37 }
 0x260   :  { %1907 = vmatprep.mubr.f32.mxu1 %v716_v28 }
 0x261   :  { %1908 = vmatmul.mubr.f32.vlgmr.msra.gmra.mrb[32].mxu1 %v717_v40 }
 0x262   :  { %2230 = vmatpush3.bf16.msra.mxu1 %v2227_v15  ;;  %v1016_v15 = vld [vmem:[#allocation10 + $0x58] sm:$0xff] }
 0x263   :  { %2232 = vmatprep.subr.bf16.mxu1 %v2231_v27 }
 0x264   :  { %v1832_v19 = vpop.f32.mrb[2].mxu1 }
 0x265   :  { %v567_v9 = vpop.f32.mrb[3].mxu1  ;;  %v719_v20 = vmax.f32 %v1832_v19, 0.0  ;;  %v1017_v19 = vld [vmem:[#allocation10 + $0x60] sm:$0xff] }
 0x266   :  { %v718_v4 = vmax.f32 %v567_v9, 0.0  ;;  %2234 = vmatpush3.bf16.msra.mxu1 %v2231_v27  ;;  %v2247_v9 = vpack.c.bf16 %v1016_v15, %v1015_v59  ;;  %v1018_v27 = vld [vmem:[#allocation10 + $0x68] sm:$0xff] }
 0x267   :  { %2236 = vmatprep.subr.bf16.mxu1 %v2235_v43  ;;  %v2251_v22 = vpack.c.bf16 %v1018_v27, %v1017_v19 }
 0x268   :  { %1910 = vmatprep.mubr.f32.mxu1 %v718_v4 }
 0x269   :  { %1911 = vmatmul.mubr.f32.gmra.mrb[34].mxu1 %v719_v20 }
 0x26a   :  { %2238 = vmatpush3.bf16.msra.mxu1 %v2235_v43 }
 0x26b   :  { %2240 = vmatprep.subr.bf16.mxu1 %v2239_v14 }
 0x26c   :  { %v1835_v40 = vpop.f32.mrb[4].mxu1 }
 0x26d   :  { %v577_v32 = vpop.f32.mrb[5].mxu1  ;;  %v721_v28 = vmax.f32 %v1835_v40, 0.0 }
 0x26e   :  { %v720_v45 = vmax.f32 %v577_v32, 0.0  ;;  %2242 = vmatpush3.bf16.msra.mxu1 %v2239_v14 }
 0x26f   :  { %2244 = vmatprep.subr.bf16.mxu1 %v2243_v49 }
 0x270   :  { %1913 = vmatprep.mubr.f32.mxu1 %v720_v45 }
 0x271   :  { %1914 = vmatmul.mubr.f32.gmra.mrb[36].mxu1 %v721_v28 }
 0x272   :  { %2246 = vmatpush3.bf16.msra.mxu1 %v2243_v49 }
 0x273   :  { %2248 = vmatprep.subr.bf16.mxu1 %v2247_v9 }
 0x274   :  { %v1838_v50 = vpop.f32.mrb[6].mxu1 }
 0x275   :  { %v587_v43 = vpop.f32.mrb[7].mxu1  ;;  %v723_v20 = vmax.f32 %v1838_v50, 0.0 }
 0x276   :  { %v722_v4 = vmax.f32 %v587_v43, 0.0  ;;  %2250 = vmatpush3.bf16.msra.mxu1 %v2247_v9 }
 0x277   :  { %2252 = vmatprep.subr.bf16.mxu1 %v2251_v22 }
 0x278   :  { %1916 = vmatprep.mubr.f32.mxu1 %v722_v4 }
 0x279   :  { %1917 = vmatmul.mubr.f32.gmra.mrb[38].mxu1 %v723_v20 }
 0x27a   :  { %2254 = vmatpush3.bf16.msra.mxu1 %v2251_v22 }
 0x27c   :  { %v1841_v14 = vpop.f32.mrb[8].mxu1 }
 0x27d   :  { %v597_v37 = vpop.f32.mrb[9].mxu1  ;;  %v725_v40 = vmax.f32 %v1841_v14, 0.0 }
 0x27e   :  { %v724_v7 = vmax.f32 %v597_v37, 0.0 }
 0x280   :  { %1919 = vmatprep.mubr.f32.mxu1 %v724_v7 }
 0x281   :  { %1920 = vmatmul.mubr.f32.gmra.mrb[40].mxu1 %v725_v40 }
 0x284   :  { %v1844_v59 = vpop.f32.mrb[10].mxu1 }
 0x285   :  { %v607_v15 = vpop.f32.mrb[11].mxu1  ;;  %v727_v32 = vmax.f32 %v1844_v59, 0.0 }
 0x286   :  { %v726_v49 = vmax.f32 %v607_v15, 0.0 }
 0x288   :  { %1922 = vmatprep.mubr.f32.mxu1 %v726_v49 }
 0x289   :  { %1923 = vmatmul.mubr.f32.gmra.mrb[42].mxu1 %v727_v32 }
 0x28c   :  { %v1847_v45 = vpop.f32.mrb[12].mxu1 }
 0x28d   :  { %v617_v28 = vpop.f32.mrb[13].mxu1  ;;  %v729_v19 = vmax.f32 %v1847_v45, 0.0 }
 0x28e   :  { %v728_v9 = vmax.f32 %v617_v28, 0.0 }
 0x290   :  { %1925 = vmatprep.mubr.f32.mxu1 %v728_v9 }
 0x291   :  { %1926 = vmatmul.mubr.f32.gmra.mrb[44].mxu1 %v729_v19  ;;  %v1019_v19 = vld [vmem:[#allocation10 + $0x70] sm:$0xff] }
 0x294   :  { %v1850_v27 = vpop.f32.mrb[14].mxu1 }
 0x295   :  { %v627_v22 = vpop.f32.mrb[15].mxu1  ;;  %v731_v43 = vmax.f32 %v1850_v27, 0.0  ;;  %v1020_v27 = vld [vmem:[#allocation10 + $0x78] sm:$0xff] }
 0x296   :  { %v730_v50 = vmax.f32 %v627_v22, 0.0 }
 0x298   :  { %1928 = vmatprep.mubr.f32.mxu1 %v730_v50  ;;  %v2255_v50 = vpack.c.bf16 %v1020_v27, %v1019_v19 }
 0x299   :  { %1929 = vmatmul.mubr.f32.gmra.mrb[46].mxu1 %v731_v43 }
 0x29a   :  { %2256 = vmatprep.subr.bf16.mxu1 %v2255_v50 }
 0x29b   :  { %2258 = vmatpush3.bf16.msra.mxu1 %v2255_v50 }
 0x29c   :  { %v1853_v4 = vpop.f32.mrb[16].mxu1 }
 0x29d   :  { %v637_v20 = vpop.f32.mrb[17].mxu1  ;;  %v733_v37 = vmax.f32 %v1853_v4, 0.0 }
 0x29e   :  { %v732_v14 = vmax.f32 %v637_v20, 0.0 }
 0x2a0   :  { %1931 = vmatprep.mubr.f32.mxu1 %v732_v14 }
 0x2a1   :  { %1932 = vmatmul.mubr.f32.gmra.mrb[48].mxu1 %v733_v37 }
 0x2a4   :  { %v1856_v7 = vpop.f32.mrb[18].mxu1 }
 0x2a5   :  { %v647_v40 = vpop.f32.mrb[19].mxu1  ;;  %v735_v15 = vmax.f32 %v1856_v7, 0.0 }
 0x2a6   :  { %v734_v59 = vmax.f32 %v647_v40, 0.0 }
 0x2a8   :  { %1934 = vmatprep.mubr.f32.mxu1 %v734_v59 }
 0x2a9   :  { %1935 = vmatmul.mubr.f32.gmra.mrb[50].mxu1 %v735_v15 }
 0x2ac   :  { %v1859_v49 = vpop.f32.mrb[20].mxu1 }
 0x2ad   :  { %v657_v32 = vpop.f32.mrb[21].mxu1  ;;  %v737_v28 = vmax.f32 %v1859_v49, 0.0 }
 0x2ae   :  { %v736_v45 = vmax.f32 %v657_v32, 0.0 }
 0x2b0   :  { %1937 = vmatprep.mubr.f32.mxu1 %v736_v45 }
 0x2b1   :  { %1938 = vmatmul.mubr.f32.gmra.mrb[52].mxu1 %v737_v28 }
 0x2b4   :  { %v1862_v9 = vpop.f32.mrb[22].mxu1 }
 0x2b5   :  { %v667_v22 = vpop.f32.mrb[23].mxu1  ;;  %v739_v4 = vmax.f32 %v1862_v9, 0.0 }
 0x2b6   :  { %v738_v43 = vmax.f32 %v667_v22, 0.0 }
 0x2b8   :  { %1940 = vmatprep.mubr.f32.mxu1 %v738_v43  ;;  %v1021_v43 = vld [vmem:[#allocation11] sm:$0xff] }
 0x2b9   :  { %1941 = vmatmul.mubr.f32.gmra.mrb[54].mxu1 %v739_v4  ;;  %v1022_v4 = vld [vmem:[#allocation11 + $0x8] sm:$0xff] }
 0x2bc   :  { %v1865_v20 = vpop.f32.mrb[24].mxu1 }
 0x2bd   :  { %v677_v14 = vpop.f32.mrb[25].mxu1  ;;  %v741_v7 = vmax.f32 %v1865_v20, 0.0  ;;  %v1023_v20 = vld [vmem:[#allocation11 + $0x10] sm:$0xff] }
 0x2be   :  { %v740_v37 = vmax.f32 %v677_v14, 0.0 }
 0x2c0   :  { %1943 = vmatprep.mubr.f32.mxu1 %v740_v37  ;;  %v2259_v37 = vpack.c.bf16 %v1022_v4, %v1021_v43  ;;  %v1030_v43 = vld [vmem:[#allocation11 + $0x48] sm:$0xff] }
 0x2c1   :  { %1944 = vmatmul.mubr.f32.gmra.mrb[56].mxu1 %v741_v7  ;;  %v1024_v7 = vld [vmem:[#allocation11 + $0x18] sm:$0xff] }
 0x2c2   :  { %2260 = vmatprep.subr.bf16.mxu0 %v2259_v37  ;;  %2291 = vmatprep.subr.bf16.mxu1 %v2259_v37 }
 0x2c3   :  { %2262 = vmatpush3.bf16.msra.mxu0 %v2259_v37 }
 0x2c4   :  { %v1868_v40 = vpop.f32.mrb[26].mxu1 }
 0x2c5   :  { %v687_v59 = vpop.f32.mrb[27].mxu1  ;;  %v743_v49 = vmax.f32 %v1868_v40, 0.0 }
 0x2c6   :  { %v742_v15 = vmax.f32 %v687_v59, 0.0 }
 0x2c8   :  { %1946 = vmatprep.mubr.f32.mxu1 %v742_v15  ;;  %v2263_v15 = vpack.c.bf16 %v1024_v7, %v1023_v20  ;;  %v1031_v7 = vld [vmem:[#allocation11 + $0x50] sm:$0xff] }
 0x2c9   :  { %1947 = vmatmul.mubr.f32.gmra.mrb[58].mxu1 %v743_v49  ;;  %v1025_v49 = vld [vmem:[#allocation11 + $0x20] sm:$0xff] }
 0x2ca   :  { %2264 = vmatprep.subr.bf16.mxu0 %v2263_v15 }
 0x2cb   :  { %2266 = vmatpush3.bf16.msra.mxu0 %v2263_v15 }
 0x2cc   :  { %v1871_v32 = vpop.f32.mrb[28].mxu1 }
 0x2cd   :  { %v697_v45 = vpop.f32.mrb[29].mxu1  ;;  %v745_v9 = vmax.f32 %v1871_v32, 0.0  ;;  %v1026_v32 = vld [vmem:[#allocation11 + $0x28] sm:$0xff] }
 0x2ce   :  { %v744_v28 = vmax.f32 %v697_v45, 0.0 }
 0x2d0   :  { %1949 = vmatprep.mubr.f32.mxu1 %v744_v28 }
 0x2d1   :  { %1950 = vmatmul.mubr.f32.gmra.mrb[60].mxu1 %v745_v9  ;;  %v2267_v9 = vpack.c.bf16 %v1026_v32, %v1025_v49  ;;  %v1034_v49 = vld [vmem:[#allocation11 + $0x68] sm:$0xff] }
 0x2d3   :  { %2268 = vmatprep.subr.bf16.mxu0 %v2267_v9 }
 0x2d4   :  { %v1874_v19 = vpop.f32.mrb[30].mxu1  ;;  %2270 = vmatpush3.bf16.msra.mxu0 %v2267_v9 }
 0x2d5   :  { %v707_v27 = vpop.f32.mrb[31].mxu1  ;;  %v747_v50 = vmax.f32 %v1874_v19, 0.0 }
 0x2d6   :  { %v746_v22 = vmax.f32 %v707_v27, 0.0 }
 0x2d8   :  { %1952 = vmatprep.mubr.f32.mxu1 %v746_v22 }
 0x2d9   :  { %1953 = vmatmul.mubr.f32.gmra.mrb[62].mxu1 %v747_v50  ;;  %v1029_v50 = vld [vmem:[#allocation11 + $0x40] sm:$0xff] }
 0x334   :  { %v1909_v14 = vpop.f32.mrb[32].mxu1 }
 0x335   :  { %v2795_v40 = vadd.f32 %v1909_v14, %v428_v18  ;;  %v814_v59 = vpop.f32.mrb[33].mxu1  ;;  %v1028_v18 = vld [vmem:[#allocation11 + $0x38] sm:$0xff]  ;;  %v2275_v14 = vpack.c.bf16 %v1030_v43, %v1029_v50 }
 0x336   :  { %v2799_v45 = vadd.f32 %v814_v59, %v427_v13  ;;  %v2271_v13 = vpack.c.bf16 %v1028_v18, %v1027_v17 }
 0x337   :  { %v974_v19 = vmax.f32 %v2795_v40, 0.0 }
 0x338   :  { %v973_v28 = vmax.f32 %v2799_v45, 0.0  ;;  %2272 = vmatprep.subr.bf16.mxu0 %v2271_v13 }
 0x339   :  { %2274 = vmatpush3.bf16.msra.mxu0 %v2271_v13 }
 0x33a   :  { %1987 = vmatprep.mubr.f32.mxu1 %v973_v28  ;;  %2276 = vmatprep.subr.bf16.mxu0 %v2275_v14 }
 0x33b   :  { %1988 = vmatmul.mubr.f32.vlgmr.msra.gmra.mrb[64].mxu1 %v974_v19 }
 0x33c   :  { %v1912_v11 = vpop.f32.mrb[34].mxu1  ;;  %2299 = vmatpush3.bf16.msra.mxu1 %v2259_v37 }
 0x33d   :  { %v2809_v27 = vadd.f32 %v1912_v11, %v430_v30  ;;  %v824_v22 = vpop.f32.mrb[35].mxu1  ;;  %2292 = vmatprep.subr.bf16.mxu1 %v2263_v15  ;;  %2278 = vmatpush3.bf16.msra.mxu0 %v2275_v14 }
 0x33e   :  { %v2813_v4 = vadd.f32 %v824_v22, %v429_v24  ;;  %v2279_v24 = vpack.c.bf16 %v1032_v29, %v1031_v7 }
 0x33f   :  { %v976_v37 = vmax.f32 %v2809_v27, 0.0 }
 0x340   :  { %v975_v20 = vmax.f32 %v2813_v4, 0.0  ;;  %2300 = vmatpush3.bf16.msra.mxu1 %v2263_v15  ;;  %v1033_v15 = vld [vmem:[#allocation11 + $0x60] sm:$0xff]  ;;  %2280 = vmatprep.subr.bf16.mxu0 %v2279_v24 }
 0x341   :  { %2293 = vmatprep.subr.bf16.mxu1 %v2267_v9  ;;  %v2283_v18 = vpack.c.bf16 %v1034_v49, %v1033_v15  ;;  %2282 = vmatpush3.bf16.msra.mxu0 %v2279_v24 }
 0x342   :  { %1990 = vmatprep.mubr.f32.mxu1 %v975_v20 }
 0x343   :  { %1991 = vmatmul.mubr.f32.gmra.mrb[66].mxu1 %v976_v37  ;;  %2284 = vmatprep.subr.bf16.mxu0 %v2283_v18 }
 0x344   :  { %v1915_v23 = vpop.f32.mrb[36].mxu1  ;;  %2301 = vmatpush3.bf16.msra.mxu1 %v2267_v9 }
 0x345   :  { %v2823_v30 = vadd.f32 %v1915_v23, %v432_v42  ;;  %v834_v59 = vpop.f32.mrb[37].mxu1  ;;  %2294 = vmatprep.subr.bf16.mxu1 %v2271_v13  ;;  %2286 = vmatpush3.bf16.msra.mxu0 %v2283_v18 }
 0x346   :  { %v2827_v32 = vadd.f32 %v834_v59, %v431_v36 }
 0x347   :  { %v978_v9 = vmax.f32 %v2823_v30, 0.0 }
 0x348   :  { %v977_v17 = vmax.f32 %v2827_v32, 0.0  ;;  %2302 = vmatpush3.bf16.msra.mxu1 %v2271_v13 }
 0x349   :  { %2295 = vmatprep.subr.bf16.mxu1 %v2275_v14 }
 0x34a   :  { %1993 = vmatprep.mubr.f32.mxu1 %v977_v17 }
 0x34b   :  { %1994 = vmatmul.mubr.f32.gmra.mrb[68].mxu1 %v978_v9 }
 0x34c   :  { %v1918_v41 = vpop.f32.mrb[38].mxu1  ;;  %2303 = vmatpush3.bf16.msra.mxu1 %v2275_v14 }
 0x34d   :  { %v2837_v35 = vadd.f32 %v1918_v41, %v434_v52  ;;  %v844_v36 = vpop.f32.mrb[39].mxu1  ;;  %2296 = vmatprep.subr.bf16.mxu1 %v2279_v24 }
 0x34e   :  { %v2841_v42 = vadd.f32 %v844_v36, %v433_v48 }
 0x34f   :  { %v980_v13 = vmax.f32 %v2837_v35, 0.0 }
 0x350   :  { %v979_v11 = vmax.f32 %v2841_v42, 0.0  ;;  %2304 = vmatpush3.bf16.msra.mxu1 %v2279_v24 }
 0x351   :  { %2297 = vmatprep.subr.bf16.mxu1 %v2283_v18 }
 0x352   :  { %1996 = vmatprep.mubr.f32.mxu1 %v979_v11 }
 0x353   :  { %1997 = vmatmul.mubr.f32.gmra.mrb[70].mxu1 %v980_v13 }
 0x354   :  { %v1921_v51 = vpop.f32.mrb[40].mxu1  ;;  %2305 = vmatpush3.bf16.msra.mxu1 %v2283_v18 }
 0x355   :  { %v2851_v47 = vadd.f32 %v1921_v51, %v436_v58  ;;  %v854_v48 = vpop.f32.mrb[41].mxu1 }
 0x356   :  { %v2855_v52 = vadd.f32 %v854_v48, %v435_v55 }
 0x357   :  { %v982_v50 = vmax.f32 %v2851_v47, 0.0 }
 0x358   :  { %v981_v22 = vmax.f32 %v2855_v52, 0.0 }
 0x35a   :  { %1999 = vmatprep.mubr.f32.mxu1 %v981_v22 }
 0x35b   :  { %2000 = vmatmul.mubr.f32.gmra.mrb[72].mxu1 %v982_v50 }
 0x35c   :  { %v1924_v43 = vpop.f32.mrb[42].mxu1 }
 0x35d   :  { %v2865_v57 = vadd.f32 %v1924_v43, %v438_v0  ;;  %v864_v58 = vpop.f32.mrb[43].mxu1 }
 0x35e   :  { %v2869_v54 = vadd.f32 %v864_v58, %v437_v61 }
 0x35f   :  { %v984_v14 = vmax.f32 %v2865_v57, 0.0 }
 0x360   :  { %v983_v55 = vmax.f32 %v2869_v54, 0.0 }
 0x362   :  { %2002 = vmatprep.mubr.f32.mxu1 %v983_v55 }
 0x363   :  { %2003 = vmatmul.mubr.f32.gmra.mrb[74].mxu1 %v984_v14 }
 0x364   :  { %v1927_v7 = vpop.f32.mrb[44].mxu1 }
 0x365   :  { %v2879_v63 = vadd.f32 %v1927_v7, %v440_v6  ;;  %v874_v0 = vpop.f32.mrb[45].mxu1 }
 0x366   :  { %v2883_v60 = vadd.f32 %v874_v0, %v439_v3 }
 0x367   :  { %v986_v29 = vmax.f32 %v2879_v63, 0.0 }
 0x368   :  { %v985_v61 = vmax.f32 %v2883_v60, 0.0 }
 0x36a   :  { %2005 = vmatprep.mubr.f32.mxu1 %v985_v61 }
 0x36b   :  { %2006 = vmatmul.mubr.f32.gmra.mrb[76].mxu1 %v986_v29 }
 0x36c   :  { %v1930_v23 = vpop.f32.mrb[46].mxu1 }
 0x36d   :  { %v2893_v6 = vadd.f32 %v1930_v23, %v3137_v5  ;;  %v884_v24 = vpop.f32.mrb[47].mxu1 }
 0x36e   :  { %v2897_v3 = vadd.f32 %v884_v24, %v3138_v2 }
 0x36f   :  { %v988_v15 = vmax.f32 %v2893_v6, 0.0 }
 0x370   :  { %v987_v59 = vmax.f32 %v2897_v3, 0.0 }
 0x372   :  { %2008 = vmatprep.mubr.f32.mxu1 %v987_v59 }
 0x373   :  { %2009 = vmatmul.mubr.f32.gmra.mrb[78].mxu1 %v988_v15 }
 0x374   :  { %v1933_v49 = vpop.f32.mrb[48].mxu1 }
 0x375   :  { %v2907_v18 = vadd.f32 %v1933_v49, %v3139_v12  ;;  %v894_v41 = vpop.f32.mrb[49].mxu1 }
 0x376   :  { %v2911_v36 = vadd.f32 %v894_v41, %v3140_v8 }
 0x377   :  { %v3136_v48 = vmax.f32 %v2907_v18, 0.0  ;;  %v3155_v60 = vmax.f32 %v2907_v18, 0.0 }
 0x378   :  { %v3135_v51 = vmax.f32 %v2911_v36, 0.0 }
 0x37a   :  { %2011 = vmatprep.mubr.f32.mxu1 %v3135_v51 }
 0x37b   :  { %2012 = vmatmul.mubr.f32.gmra.mrb[80].mxu1 %v3136_v48 }
 0x37c   :  { %v1936_v43 = vpop.f32.mrb[50].mxu1 }
 0x37d   :  { %v2921_v58 = vadd.f32 %v1936_v43, %v3141_v21  ;;  %v904_v7 = vpop.f32.mrb[51].mxu1  ;;  %v1035_v21 = vld [vmem:[#allocation11 + $0x70] sm:$0xff] }
 0x37e   :  { %v2925_v0 = vadd.f32 %v904_v7, %v3142_v16  ;;  %v3145_v7 = vmax.f32 %v2748_v56, 0.0 }
 0x37f   :  { %v3132_v5 = vmax.f32 %v2921_v58, 0.0  ;;  %v3157_v3 = vmax.f32 %v2921_v58, 0.0 }
 0x380   :  { %v3131_v23 = vmax.f32 %v2925_v0, 0.0 }
 0x382   :  { %2014 = vmatprep.mubr.f32.mxu1 %v3131_v23 }
 0x383   :  { %2015 = vmatmul.mubr.f32.gmra.mrb[82].mxu1 %v3132_v5 }
 0x384   :  { %v1939_v24 = vpop.f32.mrb[52].mxu1 }
 0x385   :  { %v2935_v2 = vadd.f32 %v1939_v24, %v3143_v31  ;;  %v914_v49 = vpop.f32.mrb[53].mxu1  ;;  %v2287_v24 = vpack.c.bf16 %v1036_v39, %v1035_v21  ;;  %v3146_v31 = vmax.f32 %v2743_v44, 0.0  ;;  %v3148_v39 = vmax.f32 %v2753_v1, 0.0 }
 0x386   :  { %v2939_v12 = vadd.f32 %v914_v49, %v3144_v26  ;;  %v3150_v1 = vmax.f32 %v2763_v25, 0.0  ;;  %v3152_v25 = vmax.f32 %v2773_v46, 0.0  ;;  %v3154_v46 = vmax.f32 %v2783_v33, 0.0 }
 0x387   :  { %v3130_v8 = vmax.f32 %v2935_v2, 0.0  ;;  %2288 = vmatprep.subr.bf16.mxu0 %v2287_v24  ;;  %2298 = vmatprep.subr.bf16.mxu1 %v2287_v24 }
 0x388   :  { %v3121_v41 = vmax.f32 %v2939_v12, 0.0  ;;  %2290 = vmatpush3.bf16.msra.mxu0 %v2287_v24  ;;  %2306 = vmatpush3.bf16.msra.mxu1 %v2287_v24 }
 0x38a   :  { %2017 = vmatprep.mubr.f32.mxu1 %v3121_v41 }
 0x38b   :  { %2018 = vmatmul.mubr.f32.gmra.mrb[84].mxu1 %v3130_v8 }
 0x38c   :  { %v1942_v43 = vpop.f32.mrb[54].mxu1 }
 0x38d   :  { %v2949_v16 = vadd.f32 %v1942_v43, %v3145_v7  ;;  %v924_v34 = vpop.f32.mrb[55].mxu1  ;;  %v3147_v43 = vmax.f32 %v2758_v10, 0.0  ;;  %v3149_v10 = vmax.f32 %v2768_v38, 0.0  ;;  %v3151_v38 = vmax.f32 %v2778_v62, 0.0 }
 0x38e   :  { %v2953_v49 = vadd.f32 %v924_v34, %v3146_v31  ;;  %v3153_v62 = vmax.f32 %v2788_v53, 0.0 }
 0x38f   :  { %v3129_v41 = vmax.f32 %v2949_v16, 0.0 }
 0x390   :  { %v3122_v26 = vmax.f32 %v2953_v49, 0.0 }
 0x392   :  { %2020 = vmatprep.mubr.f32.mxu1 %v3122_v26 }
 0x393   :  { %2021 = vmatmul.mubr.f32.gmra.mrb[86].mxu1 %v3129_v41 }
 0x394   :  { %v1945_v56 = vpop.f32.mrb[56].mxu1 }
 0x395   :  { %v2963_v44 = vadd.f32 %v1945_v56, %v3147_v43  ;;  %v934_v21 = vpop.f32.mrb[57].mxu1 }
 0x396   :  { %v2967_v7 = vadd.f32 %v934_v21, %v3148_v39 }
 0x397   :  { %v3124_v24 = vmax.f32 %v2963_v44, 0.0 }
 0x398   :  { %v3123_v34 = vmax.f32 %v2967_v7, 0.0 }
 0x39a   :  { %2023 = vmatprep.mubr.f32.mxu1 %v3123_v34 }
 0x39b   :  { %2024 = vmatmul.mubr.f32.gmra.mrb[88].mxu1 %v3124_v24 }
 0x39c   :  { %v1948_v31 = vpop.f32.mrb[58].mxu1 }
 0x39d   :  { %v2977_v56 = vadd.f32 %v1948_v31, %v3149_v10  ;;  %v944_v43 = vpop.f32.mrb[59].mxu1 }
 0x39e   :  { %v2981_v21 = vadd.f32 %v944_v43, %v3150_v1 }
 0x39f   :  { %v3126_v26 = vmax.f32 %v2977_v56, 0.0 }
 0x3a0   :  { %v3125_v39 = vmax.f32 %v2981_v21, 0.0 }
 0x3a2   :  { %2026 = vmatprep.mubr.f32.mxu1 %v3125_v39 }
 0x3a3   :  { %2027 = vmatmul.mubr.f32.gmra.mrb[90].mxu1 %v3126_v26 }
 0x3a4   :  { %v1951_v34 = vpop.f32.mrb[60].mxu1 }
 0x3a5   :  { %v2991_v31 = vadd.f32 %v1951_v34, %v3151_v38  ;;  %v954_v10 = vpop.f32.mrb[61].mxu1 }
 0x3a6   :  { %v2995_v43 = vadd.f32 %v954_v10, %v3152_v25 }
 0x3a7   :  { %v3128_v24 = vmax.f32 %v2991_v31, 0.0 }
 0x3a8   :  { %v3127_v1 = vmax.f32 %v2995_v43, 0.0 }
 0x3aa   :  { %2029 = vmatprep.mubr.f32.mxu1 %v3127_v1 }
 0x3ab   :  { %2030 = vmatmul.mubr.f32.gmra.mrb[92].mxu1 %v3128_v24 }
 0x3ac   :  { %v1954_v39 = vpop.f32.mrb[62].mxu1 }
 0x3ad   :  { %v3005_v34 = vadd.f32 %v1954_v39, %v3153_v62  ;;  %v964_v38 = vpop.f32.mrb[63].mxu1 }
 0x3ae   :  { %v3009_v10 = vadd.f32 %v964_v38, %v3154_v46 }
 0x3af   :  { %v3134_v26 = vmax.f32 %v3005_v34, 0.0 }
 0x3b0   :  { %v3133_v25 = vmax.f32 %v3009_v10, 0.0 }
 0x3b2   :  { %2032 = vmatprep.mubr.f32.mxu1 %v3133_v25 }
 0x3b3   :  { %2033 = vmatmul.mubr.f32.gmra.mrb[94].mxu1 %v3134_v26 }
 0x40e   :  { %v1989_v1 = vpop.f32.mrb[64].mxu1 }
 0x40f   :  { %v1103_v24 = vpop.f32.mrb[65].mxu1  ;;  %v1263_v39 = vmax.f32 %v1989_v1, 0.0 }
 0x410   :  { %v1262_v53 = vmax.f32 %v1103_v24, 0.0 }
 0x412   :  { %2067 = vmatprep.mubr.f32.mxu0 %v1262_v53 }
 0x413   :  { %2068 = vmatmul.mubr.f32.vlgmr.msra.gmra.mrb[64].mxu0 %v1263_v39 }
 0x416   :  { %v1992_v62 = vpop.f32.mrb[66].mxu1 }
 0x417   :  { %v1113_v33 = vpop.f32.mrb[67].mxu1  ;;  %v1265_v46 = vmax.f32 %v1992_v62, 0.0 }
 0x418   :  { %v1264_v38 = vmax.f32 %v1113_v33, 0.0 }
 0x41a   :  { %2070 = vmatprep.mubr.f32.mxu0 %v1264_v38 }
 0x41b   :  { %2071 = vmatmul.mubr.f32.gmra.mrb[66].mxu0 %v1265_v46 }
 0x41e   :  { %v1995_v41 = vpop.f32.mrb[68].mxu1 }
 0x41f   :  { %v1123_v8 = vpop.f32.mrb[69].mxu1  ;;  %v1267_v5 = vmax.f32 %v1995_v41, 0.0 }
 0x420   :  { %v1266_v23 = vmax.f32 %v1123_v8, 0.0 }
 0x422   :  { %2073 = vmatprep.mubr.f32.mxu0 %v1266_v23 }
 0x423   :  { %2074 = vmatmul.mubr.f32.gmra.mrb[68].mxu0 %v1267_v5 }
 0x426   :  { %v1998_v25 = vpop.f32.mrb[70].mxu1 }
 0x427   :  { %v1133_v26 = vpop.f32.mrb[71].mxu1  ;;  %v1269_v48 = vmax.f32 %v1998_v25, 0.0 }
 0x428   :  { %v1268_v51 = vmax.f32 %v1133_v26, 0.0 }
 0x42a   :  { %2076 = vmatprep.mubr.f32.mxu0 %v1268_v51 }
 0x42b   :  { %2077 = vmatmul.mubr.f32.gmra.mrb[70].mxu0 %v1269_v48 }
 0x42e   :  { %v2001_v24 = vpop.f32.mrb[72].mxu1 }
 0x42f   :  { %v1143_v1 = vpop.f32.mrb[73].mxu1  ;;  %v1271_v39 = vmax.f32 %v2001_v24, 0.0 }
 0x430   :  { %v1270_v53 = vmax.f32 %v1143_v1, 0.0 }
 0x432   :  { %2079 = vmatprep.mubr.f32.mxu0 %v1270_v53 }
 0x433   :  { %2080 = vmatmul.mubr.f32.gmra.mrb[72].mxu0 %v1271_v39 }
 0x436   :  { %v2004_v62 = vpop.f32.mrb[74].mxu1 }
 0x437   :  { %v1153_v33 = vpop.f32.mrb[75].mxu1  ;;  %v1273_v46 = vmax.f32 %v2004_v62, 0.0 }
 0x438   :  { %v1272_v38 = vmax.f32 %v1153_v33, 0.0 }
 0x43a   :  { %2082 = vmatprep.mubr.f32.mxu0 %v1272_v38 }
 0x43b   :  { %2083 = vmatmul.mubr.f32.gmra.mrb[74].mxu0 %v1273_v46 }
 0x43e   :  { %v2007_v23 = vpop.f32.mrb[76].mxu1 }
 0x43f   :  { %v1163_v5 = vpop.f32.mrb[77].mxu1  ;;  %v1275_v8 = vmax.f32 %v2007_v23, 0.0 }
 0x440   :  { %v1274_v41 = vmax.f32 %v1163_v5, 0.0 }
 0x442   :  { %2085 = vmatprep.mubr.f32.mxu0 %v1274_v41 }
 0x443   :  { %2086 = vmatmul.mubr.f32.gmra.mrb[76].mxu0 %v1275_v8 }
 0x446   :  { %v2010_v51 = vpop.f32.mrb[78].mxu1 }
 0x447   :  { %v1173_v48 = vpop.f32.mrb[79].mxu1  ;;  %v1277_v25 = vmax.f32 %v2010_v51, 0.0 }
 0x448   :  { %v1276_v26 = vmax.f32 %v1173_v48, 0.0 }
 0x44a   :  { %2088 = vmatprep.mubr.f32.mxu0 %v1276_v26 }
 0x44b   :  { %2089 = vmatmul.mubr.f32.gmra.mrb[78].mxu0 %v1277_v25 }
 0x44e   :  { %v2013_v24 = vpop.f32.mrb[80].mxu1 }
 0x44f   :  { %v1183_v1 = vpop.f32.mrb[81].mxu1  ;;  %v1279_v39 = vmax.f32 %v2013_v24, 0.0 }
 0x450   :  { %v1278_v53 = vmax.f32 %v1183_v1, 0.0 }
 0x452   :  { %2091 = vmatprep.mubr.f32.mxu0 %v1278_v53 }
 0x453   :  { %2092 = vmatmul.mubr.f32.gmra.mrb[80].mxu0 %v1279_v39 }
 0x456   :  { %v2016_v62 = vpop.f32.mrb[82].mxu1 }
 0x457   :  { %v1193_v33 = vpop.f32.mrb[83].mxu1  ;;  %v1281_v46 = vmax.f32 %v2016_v62, 0.0 }
 0x458   :  { %v1280_v38 = vmax.f32 %v1193_v33, 0.0 }
 0x45a   :  { %2094 = vmatprep.mubr.f32.mxu0 %v1280_v38 }
 0x45b   :  { %2095 = vmatmul.mubr.f32.gmra.mrb[82].mxu0 %v1281_v46 }
 0x45e   :  { %v2019_v23 = vpop.f32.mrb[84].mxu1 }
 0x45f   :  { %v1203_v5 = vpop.f32.mrb[85].mxu1  ;;  %v1283_v8 = vmax.f32 %v2019_v23, 0.0 }
 0x460   :  { %v1282_v41 = vmax.f32 %v1203_v5, 0.0 }
 0x462   :  { %2097 = vmatprep.mubr.f32.mxu0 %v1282_v41 }
 0x463   :  { %2098 = vmatmul.mubr.f32.gmra.mrb[84].mxu0 %v1283_v8 }
 0x466   :  { %v2022_v51 = vpop.f32.mrb[86].mxu1 }
 0x467   :  { %v1213_v48 = vpop.f32.mrb[87].mxu1  ;;  %v1285_v25 = vmax.f32 %v2022_v51, 0.0 }
 0x468   :  { %v1284_v26 = vmax.f32 %v1213_v48, 0.0 }
 0x46a   :  { %2100 = vmatprep.mubr.f32.mxu0 %v1284_v26 }
 0x46b   :  { %2101 = vmatmul.mubr.f32.gmra.mrb[86].mxu0 %v1285_v25 }
 0x46e   :  { %v2025_v24 = vpop.f32.mrb[88].mxu1 }
 0x46f   :  { %v1223_v1 = vpop.f32.mrb[89].mxu1  ;;  %v1287_v39 = vmax.f32 %v2025_v24, 0.0 }
 0x470   :  { %v1286_v53 = vmax.f32 %v1223_v1, 0.0 }
 0x472   :  { %2103 = vmatprep.mubr.f32.mxu1 %v1286_v53 }
 0x473   :  { %2104 = vmatmul.mubr.f32.vlgmr.msra.gmra.mrb[96].mxu1 %v1287_v39 }
 0x476   :  { %v2028_v62 = vpop.f32.mrb[90].mxu1 }
 0x477   :  { %v1233_v33 = vpop.f32.mrb[91].mxu1  ;;  %v1289_v46 = vmax.f32 %v2028_v62, 0.0 }
 0x478   :  { %v1288_v38 = vmax.f32 %v1233_v33, 0.0 }
 0x47a   :  { %2106 = vmatprep.mubr.f32.mxu1 %v1288_v38 }
 0x47b   :  { %2107 = vmatmul.mubr.f32.gmra.mrb[98].mxu1 %v1289_v46 }
 0x47e   :  { %v2031_v23 = vpop.f32.mrb[92].mxu1 }
 0x47f   :  { %v1243_v5 = vpop.f32.mrb[93].mxu1  ;;  %v1291_v8 = vmax.f32 %v2031_v23, 0.0 }
 0x480   :  { %v1290_v41 = vmax.f32 %v1243_v5, 0.0 }
 0x482   :  { %2109 = vmatprep.mubr.f32.mxu1 %v1290_v41 }
 0x483   :  { %2110 = vmatmul.mubr.f32.gmra.mrb[100].mxu1 %v1291_v8 }
 0x486   :  { %v2034_v51 = vpop.f32.mrb[94].mxu1 }
 0x487   :  { %v1253_v48 = vpop.f32.mrb[95].mxu1  ;;  %v1293_v25 = vmax.f32 %v2034_v51, 0.0 }
 0x488   :  { %v1292_v26 = vmax.f32 %v1253_v48, 0.0 }
 0x48a   :  { %2112 = vmatprep.mubr.f32.mxu1 %v1292_v26 }
 0x48b   :  { %2113 = vmatmul.mubr.f32.gmra.mrb[102].mxu1 %v1293_v25 }
 0x4e6   :  { %v2069_v24 = vpop.f32.mrb[64].mxu0 }
 0x4e7   :  { %v1366_v1 = vadd.f32 %v2069_v24, %v974_v19  ;;  %v1360_v53 = vpop.f32.mrb[65].mxu0 }
 0x4e8   :  { %v1361_v39 = vadd.f32 %v1360_v53, %v973_v28 }
 0x4e9   :  { %v1520_v62 = vmax.f32 %v1366_v1, 0.0 }
 0x4ea   :  { %v1519_v33 = vmax.f32 %v1361_v39, 0.0 }
 0x4eb   :  { %1552 = vst [vmem:[#allocation13 + $0x8] sm:$0xff] %v1520_v62 }
 0x4ec   :  { %1551 = vst [vmem:[#allocation13] sm:$0xff] %v1519_v33 }
 0x4ee   :  { %v2072_v38 = vpop.f32.mrb[66].mxu0 }
 0x4ef   :  { %v1376_v46 = vadd.f32 %v2072_v38, %v976_v37  ;;  %v1370_v23 = vpop.f32.mrb[67].mxu0 }
 0x4f0   :  { %v1371_v5 = vadd.f32 %v1370_v23, %v975_v20  ;;  %v3156_v23 = vmax.f32 %v2911_v36, 0.0  ;;  %v3159_v36 = vmax.f32 %v2935_v2, 0.0 }
 0x4f1   :  { %v1522_v41 = vmax.f32 %v1376_v46, 0.0 }
 0x4f2   :  { %v1521_v8 = vmax.f32 %v1371_v5, 0.0 }
 0x4f3   :  { %1554 = vst [vmem:[#allocation13 + $0x18] sm:$0xff] %v1522_v41 }
 0x4f4   :  { %1553 = vst [vmem:[#allocation13 + $0x10] sm:$0xff] %v1521_v8 }
 0x4f6   :  { %v2075_v40 = vpop.f32.mrb[68].mxu0 }
 0x4f7   :  { %v1386_v45 = vadd.f32 %v2075_v40, %v978_v9  ;;  %v1380_v28 = vpop.f32.mrb[69].mxu0  ;;  %v3158_v40 = vmax.f32 %v2925_v0, 0.0  ;;  %v3161_v0 = vmax.f32 %v2949_v16, 0.0 }
 0x4f8   :  { %v1381_v19 = vadd.f32 %v1380_v28, %v977_v17 }
 0x4f9   :  { %v1524_v51 = vmax.f32 %v1386_v45, 0.0 }
 0x4fa   :  { %v1523_v48 = vmax.f32 %v1381_v19, 0.0 }
 0x4fb   :  { %1556 = vst [vmem:[#allocation13 + $0x28] sm:$0xff] %v1524_v51 }
 0x4fc   :  { %1555 = vst [vmem:[#allocation13 + $0x20] sm:$0xff] %v1523_v48 }
 0x4fe   :  { %v2078_v27 = vpop.f32.mrb[70].mxu0 }
 0x4ff   :  { %v1396_v4 = vadd.f32 %v2078_v27, %v980_v13  ;;  %v1390_v20 = vpop.f32.mrb[71].mxu0  ;;  %v3160_v27 = vmax.f32 %v2939_v12, 0.0  ;;  %v3163_v12 = vmax.f32 %v2963_v44, 0.0 }
 0x500   :  { %v1391_v37 = vadd.f32 %v1390_v20, %v979_v11 }
 0x501   :  { %v1526_v26 = vmax.f32 %v1396_v4, 0.0 }
 0x502   :  { %v1525_v25 = vmax.f32 %v1391_v37, 0.0 }
 0x503   :  { %1558 = vst [vmem:[#allocation13 + $0x38] sm:$0xff] %v1526_v26 }
 0x504   :  { %1557 = vst [vmem:[#allocation13 + $0x30] sm:$0xff] %v1525_v25 }
 0x506   :  { %v2081_v30 = vpop.f32.mrb[72].mxu0 }
 0x507   :  { %v1406_v32 = vadd.f32 %v2081_v30, %v982_v50  ;;  %v1400_v17 = vpop.f32.mrb[73].mxu0  ;;  %v3162_v30 = vmax.f32 %v2953_v49, 0.0  ;;  %v3165_v49 = vmax.f32 %v2977_v56, 0.0 }
 0x508   :  { %v1401_v9 = vadd.f32 %v1400_v17, %v981_v22 }
 0x509   :  { %v1528_v24 = vmax.f32 %v1406_v32, 0.0 }
 0x50a   :  { %v1527_v1 = vmax.f32 %v1401_v9, 0.0 }
 0x50b   :  { %1560 = vst [vmem:[#allocation13 + $0x48] sm:$0xff] %v1528_v24 }
 0x50c   :  { %1559 = vst [vmem:[#allocation13 + $0x40] sm:$0xff] %v1527_v1 }
 0x50e   :  { %v2084_v35 = vpop.f32.mrb[74].mxu0 }
 0x50f   :  { %v1416_v42 = vadd.f32 %v2084_v35, %v984_v14  ;;  %v1410_v11 = vpop.f32.mrb[75].mxu0  ;;  %v3164_v35 = vmax.f32 %v2967_v7, 0.0  ;;  %v3167_v7 = vmax.f32 %v2991_v31, 0.0 }
 0x510   :  { %v1411_v13 = vadd.f32 %v1410_v11, %v983_v55 }
 0x511   :  { %v1530_v53 = vmax.f32 %v1416_v42, 0.0 }
 0x512   :  { %v1529_v39 = vmax.f32 %v1411_v13, 0.0 }
 0x513   :  { %1562 = vst [vmem:[#allocation13 + $0x58] sm:$0xff] %v1530_v53 }
 0x514   :  { %1561 = vst [vmem:[#allocation13 + $0x50] sm:$0xff] %v1529_v39 }
 0x516   :  { %v2087_v47 = vpop.f32.mrb[76].mxu0 }
 0x517   :  { %v1426_v52 = vadd.f32 %v2087_v47, %v986_v29  ;;  %v1420_v22 = vpop.f32.mrb[77].mxu0  ;;  %v3166_v47 = vmax.f32 %v2981_v21, 0.0  ;;  %v3169_v21 = vmax.f32 %v3005_v34, 0.0 }
 0x518   :  { %v1421_v50 = vadd.f32 %v1420_v22, %v985_v61 }
 0x519   :  { %v1532_v62 = vmax.f32 %v1426_v52, 0.0 }
 0x51a   :  { %v1531_v33 = vmax.f32 %v1421_v50, 0.0 }
 0x51b   :  { %1564 = vst [vmem:[#allocation13 + $0x68] sm:$0xff] %v1532_v62 }
 0x51c   :  { %1563 = vst [vmem:[#allocation13 + $0x60] sm:$0xff] %v1531_v33 }
 0x51e   :  { %v2090_v57 = vpop.f32.mrb[78].mxu0 }
 0x51f   :  { %v1436_v54 = vadd.f32 %v2090_v57, %v988_v15  ;;  %v1430_v55 = vpop.f32.mrb[79].mxu0  ;;  %v3168_v57 = vmax.f32 %v2995_v43, 0.0 }
 0x520   :  { %v1431_v14 = vadd.f32 %v1430_v55, %v987_v59 }
 0x521   :  { %v1534_v38 = vmax.f32 %v1436_v54, 0.0 }
 0x522   :  { %v1533_v46 = vmax.f32 %v1431_v14, 0.0 }
 0x523   :  { %1566 = vst [vmem:[#allocation13 + $0x78] sm:$0xff] %v1534_v38 }
 0x524   :  { %1565 = vst [vmem:[#allocation13 + $0x70] sm:$0xff] %v1533_v46 }
 0x526   :  { %v2093_v63 = vpop.f32.mrb[80].mxu0 }
 0x527   :  { %v1446_v61 = vadd.f32 %v2093_v63, %v3155_v60  ;;  %v1440_v29 = vpop.f32.mrb[81].mxu0  ;;  %v3170_v63 = vmax.f32 %v3009_v10, 0.0 }
 0x528   :  { %v1441_v5 = vadd.f32 %v1440_v29, %v3156_v23 }
 0x529   :  { %v1536_v41 = vmax.f32 %v1446_v61, 0.0 }
 0x52a   :  { %v1535_v8 = vmax.f32 %v1441_v5, 0.0 }
 0x52b   :  { %1568 = vst [vmem:[#allocation13 + $0x88] sm:$0xff] %v1536_v41 }
 0x52c   :  { %1567 = vst [vmem:[#allocation13 + $0x80] sm:$0xff] %v1535_v8 }
 0x52e   :  { %v2096_v6 = vpop.f32.mrb[82].mxu0 }
 0x52f   :  { %v1456_v59 = vadd.f32 %v2096_v6, %v3157_v3  ;;  %v1450_v15 = vpop.f32.mrb[83].mxu0 }
 0x530   :  { %v1451_v45 = vadd.f32 %v1450_v15, %v3158_v40 }
 0x531   :  { %v1538_v28 = vmax.f32 %v1456_v59, 0.0 }
 0x532   :  { %v1537_v19 = vmax.f32 %v1451_v45, 0.0 }
 0x533   :  { %1570 = vst [vmem:[#allocation13 + $0x98] sm:$0xff] %v1538_v28 }
 0x534   :  { %1569 = vst [vmem:[#allocation13 + $0x90] sm:$0xff] %v1537_v19 }
 0x536   :  { %v2099_v18 = vpop.f32.mrb[84].mxu0 }
 0x537   :  { %v1466_v51 = vadd.f32 %v2099_v18, %v3159_v36  ;;  %v1460_v48 = vpop.f32.mrb[85].mxu0 }
 0x538   :  { %v1461_v4 = vadd.f32 %v1460_v48, %v3160_v27 }
 0x539   :  { %v1540_v20 = vmax.f32 %v1466_v51, 0.0 }
 0x53a   :  { %v1539_v37 = vmax.f32 %v1461_v4, 0.0 }
 0x53b   :  { %1572 = vst [vmem:[#allocation13 + $0xa8] sm:$0xff] %v1540_v20 }
 0x53c   :  { %1571 = vst [vmem:[#allocation13 + $0xa0] sm:$0xff] %v1539_v37 }
 0x53e   :  { %v2102_v58 = vpop.f32.mrb[86].mxu0 }
 0x53f   :  { %v1476_v26 = vadd.f32 %v2102_v58, %v3161_v0  ;;  %v1470_v25 = vpop.f32.mrb[87].mxu0 }
 0x540   :  { %v1471_v32 = vadd.f32 %v1470_v25, %v3162_v30 }
 0x541   :  { %v1542_v17 = vmax.f32 %v1476_v26, 0.0 }
 0x542   :  { %v1541_v9 = vmax.f32 %v1471_v32, 0.0 }
 0x543   :  { %1574 = vst [vmem:[#allocation13 + $0xb8] sm:$0xff] %v1542_v17 }
 0x544   :  { %1573 = vst [vmem:[#allocation13 + $0xb0] sm:$0xff] %v1541_v9 }
 0x546   :  { %v2105_v2 = vpop.f32.mrb[96].mxu1 }
 0x547   :  { %v1486_v24 = vadd.f32 %v2105_v2, %v3163_v12  ;;  %v1480_v1 = vpop.f32.mrb[97].mxu1 }
 0x548   :  { %v1481_v42 = vadd.f32 %v1480_v1, %v3164_v35 }
 0x549   :  { %v1544_v11 = vmax.f32 %v1486_v24, 0.0 }
 0x54a   :  { %v1543_v13 = vmax.f32 %v1481_v42, 0.0 }
 0x54b   :  { %1576 = vst [vmem:[#allocation13 + $0xc8] sm:$0xff] %v1544_v11 }
 0x54c   :  { %1575 = vst [vmem:[#allocation13 + $0xc0] sm:$0xff] %v1543_v13 }
 0x54e   :  { %v2108_v16 = vpop.f32.mrb[98].mxu1 }
 0x54f   :  { %v1496_v53 = vadd.f32 %v2108_v16, %v3165_v49  ;;  %v1490_v39 = vpop.f32.mrb[99].mxu1 }
 0x550   :  { %v1491_v52 = vadd.f32 %v1490_v39, %v3166_v47 }
 0x551   :  { %v1546_v22 = vmax.f32 %v1496_v53, 0.0 }
 0x552   :  { %v1545_v50 = vmax.f32 %v1491_v52, 0.0 }
 0x553   :  { %1578 = vst [vmem:[#allocation13 + $0xd8] sm:$0xff] %v1546_v22 }
 0x554   :  { %1577 = vst [vmem:[#allocation13 + $0xd0] sm:$0xff] %v1545_v50 }
 0x556   :  { %v2111_v44 = vpop.f32.mrb[100].mxu1 }
 0x557   :  { %v1506_v62 = vadd.f32 %v2111_v44, %v3167_v7  ;;  %v1500_v33 = vpop.f32.mrb[101].mxu1 }
 0x558   :  { %v1501_v54 = vadd.f32 %v1500_v33, %v3168_v57 }
 0x559   :  { %v1548_v55 = vmax.f32 %v1506_v62, 0.0 }
 0x55a   :  { %v1547_v14 = vmax.f32 %v1501_v54, 0.0 }
 0x55b   :  { %1580 = vst [vmem:[#allocation13 + $0xe8] sm:$0xff] %v1548_v55 }
 0x55c   :  { %1579 = vst [vmem:[#allocation13 + $0xe0] sm:$0xff] %v1547_v14 }
 0x55e   :  { %v2114_v56 = vpop.f32.mrb[102].mxu1 }
 0x55f   :  { %v1516_v38 = vadd.f32 %v2114_v56, %v3169_v21  ;;  %v1510_v46 = vpop.f32.mrb[103].mxu1 }
 0x560   :  { %v1511_v60 = vadd.f32 %v1510_v46, %v3170_v63 }
 0x561   :  { %v1550_v31 = vmax.f32 %v1516_v38, 0.0 }
 0x562   :  { %v1549_v61 = vmax.f32 %v1511_v60, 0.0 }
 0x563   :  { %1582 = vst [vmem:[#allocation13 + $0xf8] sm:$0xff] %v1550_v31 }
 0x564   :  { %1581 = vst [vmem:[#allocation13 + $0xf0] sm:$0xff] %v1549_v61 }
 0x565   :  { %2462 = shalt.err (!%p2459_p10)
}
 0x566   :  { %s2463_s24 = scalar_lea.hbm %s3102_s6, 4096 }
 0x567   :  { %p2464_p11 = scmp.ne.s32.totalorder %s3102_s6, %s2463_s24  ;;  %p2467_p12 = scmp.lt.u32.totalorder %s2463_s24, %s3102_s6 }
 0x569   :  { %p2469_p13 = pnand %p2467_p12, %p2464_p11 }
 0x56b   :  { %2472 = shalt.err (!%p2469_p13)
}
 0x56c   :  { %1594 = dma.vmem_to_hbm [thread:$0]  %s1589_s22, 4096, %s3102_s6, [#allocation4], %s2484_s7, %s2484_s7, %s2485_s8  }
 0x56d   :  { %2481 = dma.done.wait [#allocation4], 4096  }
 0x56e   :  { %2482 = vsyncadd [#allocation4], 4294963200 }
 0x56f   :  { %1598 = vsyncpa [#allocation3], 1 }
 0x570   :  { %1599 = vsyncpa [#allocation6], 1 }
 0x571   :  { %1600 = vsyncpa [#allocation9], 1 }
 0x572   :  { %1601 = vsyncpa [#allocation12], 1 }
 0x573   :  { %1602 = vsyncpa [#allocation4], 1 }

</bundles_post_ra>
